<compile_context>
chip_gen: v7x
topology: tpu7x:2x2x1
jax: 0.10.0
libtpu: 0.0.40
codegen_flags: <defaults>
</compile_context>

<pallas_src>
import jax
import jax.numpy as jnp
from jax.experimental import pallas as pl
from jax.experimental.pallas import tpu as pltpu

# --------------------------- module-consistent shapes ---------------------------
B = 2                      # batch
H = W = 8                  # spatial (ob_shape = (1, H, W))
NUM_CATEGORIES = 10        # default
EMB_DIM = NUM_CATEGORIES   # use_embedding_mapping=False -> emb_dim = num_categories
COS_OUT = 64               # cos_out_channels default
KSIZE = 3                  # kernel_size default
PAD = KSIZE // 2           # 'same' padding
LAYER_SIZE = 32            # MLP hidden size (n_layers = 2 tanh layers)
AC_DIM = 4
EPS = 1e-8

HW = H * W
PACK = 2                          # spatial positions packed per conv-matmul row
NPAIR = HW // PACK                # 32 packed row-groups
ROWS = NPAIR * B                  # 64 rows, pair-major / batch-minor
KKC = KSIZE * KSIZE * EMB_DIM     # 90 real im2col columns per position
KKC_PAD = 128                     # per-position contraction padded to one lane tile
CDIM = PACK * KKC_PAD             # 256  packed contraction width
ODIM = PACK * COS_OUT             # 128  packed conv-output width (one lane tile)
NTAP = PACK * KSIZE * KSIZE       # 18 column codes per packed row
CONV_OUT_DIM = COS_OUT * HW       # 4096 = MLP input width
SENTINEL = 10_000                 # out-of-image marker; never matches a lane index


# ------------------------------- fused kernel ----------------------------------
def fused_policy_kernel(code_ref, scale_ref, wcb_ref, w1_ref, b1_ref, w2_ref,
                        b2_ref, w3_ref, b3_ref, std_ref,
                        mean_ref, std_out_ref, hflat_ref):
    """one-hot -> cosine conv -> flatten -> MLP, single grid step, all in VMEM.

    code_ref  : (ROWS, NTAP) int32  packed im2col column per row/tap
                                    (= s*128 + tap*EMB_DIM + category for the
                                    s-th position of the pair); >= CDIM when the
                                    neighbor is zero-padding.
    scale_ref : (ROWS, ODIM) f32    1/(||patch||+eps) per (row, packed position)
                                    broadcast over channels (one-hot -> constant).
    wcb_ref   : (CDIM, ODIM)        block-diagonal conv weights, im2col layout,
                                    pre-scaled by 1/(||w_c||+eps); zero pad rows.
    w1..b3    :                     MLP params (w1 rows in (position, channel) order)
    std_ref   : (1, AC_DIM)         pre-softplus std parameter
    hflat_ref : (B, CONV_OUT_DIM)   VMEM scratch for the flattened conv activation
    """
    # 1) In-kernel one-hot / im2col build: patches[r, j] = 1 iff the one-hot of
    #    one of this packed row's 18 neighbor taps lands in column j.  Taps of
    #    the two packed positions live in disjoint 128-lane halves, so OR == sum.
    lane = jax.lax.broadcasted_iota(jnp.int32, (ROWS, CDIM), 1)
    code = code_ref[...]
    hit = lane == code[:, 0:1]
    for t in range(1, NTAP):
        hit = hit | (lane == code[:, t:t + 1])
    patches = hit.astype(jnp.float32)

    # 2) Cosine-similarity conv as ONE (64,256)x(256,128) MXU matmul with the
    #    block-diagonal weight; per-filter weight norm already folded into wcb,
    #    per-position patch norm applied on the (smaller) output.
    a = jnp.dot(patches, wcb_ref[...], preferred_element_type=jnp.float32)
    a = a * scale_ref[...]

    # 3) Flatten to (B, HW*COS_OUT) in natural (position, channel) order: each
    #    packed row-group q holds positions (2q, 2q+1) x channels = exactly one
    #    full 128-lane tile, stored lane-aligned at offset q*128.
    for q in range(NPAIR):
        hflat_ref[:, q * ODIM:(q + 1) * ODIM] = a[q * B:(q + 1) * B, :]

    # 4) build_mlp: n_layers x (Linear -> tanh), then Linear head; softplus(std)+0.01.
    h = hflat_ref[...]
    z = jnp.tanh(jnp.dot(h, w1_ref[...], preferred_element_type=jnp.float32) + b1_ref[...])
    z = jnp.tanh(jnp.dot(z, w2_ref[...], preferred_element_type=jnp.float32) + b2_ref[...])
    mean_ref[...] = jnp.dot(z, w3_ref[...], preferred_element_type=jnp.float32) + b3_ref[...]
    std = jax.nn.softplus(std_ref[...]) + 0.01
    std_out_ref[...] = jnp.broadcast_to(std, std_out_ref.shape)


# --------------------------------- wrapper --------------------------------------
def _vmem_spec():
    return pl.BlockSpec(memory_space=pltpu.MemorySpace.VMEM)


def policy_forward(obs, params):
    """obs: (B, 1, H, W) int32 categorical observation; params from init_params()."""
    wcb, w1, b1, w2, b2, w3, b3, std_p, scale = params

    # Tiny integer prep (a few KiB of int32 ops, fused by XLA): for output
    # position p = 2q+s and tap t, the packed im2col column holding the one-hot 1
    # is s*128 + t*EMB_DIM + obs[neighbor]; out-of-image neighbors get a sentinel.
    obs2d = obs[:, 0].astype(jnp.int32)                                   # (B, H, W)
    obs_p = jnp.pad(obs2d, ((0, 0), (PAD, PAD), (PAD, PAD)),
                    constant_values=SENTINEL)
    cols = []
    for t in range(KSIZE * KSIZE):
        dh, dw = t // KSIZE, t % KSIZE
        cols.append(obs_p[:, dh:dh + H, dw:dw + W] + t * EMB_DIM)         # (B, H, W)
    codes = jnp.stack(cols, axis=-1).reshape(B, HW, KSIZE * KSIZE)        # (B, 64, 9)
    codes = codes.reshape(B, NPAIR, PACK, KSIZE * KSIZE)                  # p = 2q + s
    codes = codes + (jnp.arange(PACK, dtype=jnp.int32)[None, None, :, None] * KKC_PAD)
    codes = codes.reshape(B, NPAIR, NTAP)
    code = jnp.transpose(codes, (1, 0, 2)).reshape(ROWS, NTAP)            # rows = q*B + b

    mean, std = pl.pallas_call(
        fused_policy_kernel,
        out_shape=(jax.ShapeDtypeStruct((B, AC_DIM), jnp.float32),
                   jax.ShapeDtypeStruct((B, AC_DIM), jnp.float32)),
        in_specs=[_vmem_spec() for _ in range(10)],
        out_specs=(_vmem_spec(), _vmem_spec()),
        scratch_shapes=[pltpu.VMEM((B, CONV_OUT_DIM), jnp.float32)],
    )(code, scale, wcb, w1, b1, w2, b2, w3, b3, std_p)
    # TODO(synk): torch.distributions (tanh-transformed Normal) has no Pallas
    #             equivalent; returning the Normal's (mean, std) instead.
    return mean, std


# ---------------------------------- params --------------------------------------
def init_params(key):
    k_conv, k1, k2, k3 = jax.random.split(key, 4)

    # CosineSimConv2D_v2 weight, tap-major im2col layout (K*K, Cin, Cout).
    # A real PyTorch (Cout, Cin, K, K) weight maps via w.permute(2,3,1,0).reshape(K*K*Cin, Cout).
    wc_raw = 0.1 * jax.random.normal(
        k_conv, (KSIZE * KSIZE, EMB_DIM, COS_OUT), dtype=jnp.float32)
    w_norm = jnp.sqrt(jnp.sum(wc_raw * wc_raw, axis=(0, 1)))              # per-filter ||w||
    wc = (wc_raw / (w_norm[None, None, :] + EPS)).reshape(KKC, COS_OUT)   # fold 1/(||w||+eps)
    wc = jnp.pad(wc, ((0, KKC_PAD - KKC), (0, 0)))                        # (128, COS_OUT)
    # Block-diagonal packed weight: block s covers contraction rows s*128:(s+1)*128
    # and output channels s*64:(s+1)*64 (two packed positions share the filter).
    wcb = jnp.zeros((CDIM, ODIM), jnp.float32)
    wcb = wcb.at[0:KKC_PAD, 0:COS_OUT].set(wc)
    wcb = wcb.at[KKC_PAD:CDIM, COS_OUT:ODIM].set(wc)

    def linear_init(k, fan_in, fan_out):
        kw, kb = jax.random.split(k)
        bound = float(1.0 / (fan_in ** 0.5))
        wgt = jax.random.uniform(kw, (fan_in, fan_out), jnp.float32, -bound, bound)
        bia = jax.random.uniform(kb, (1, fan_out), jnp.float32, -bound, bound)
        return wgt, bia

    # w1 rows are in the kernel's flatten order j = p*COS_OUT + c (a PyTorch
    # first-layer weight (LAYER_SIZE, Cout*H*W) would map via
    # w.T.reshape(Cout, H*W, LAYER_SIZE).transpose(1,0,2).reshape(CONV_OUT_DIM, LAYER_SIZE)).
    w1, b1 = linear_init(k1, CONV_OUT_DIM, LAYER_SIZE)
    w2, b2 = linear_init(k2, LAYER_SIZE, LAYER_SIZE)
    w3, b3 = linear_init(k3, LAYER_SIZE, AC_DIM)
    std_p = jnp.zeros((1, AC_DIM), jnp.float32)  # nn.Parameter(torch.full((ac_dim,), 0.0))

    # One-hot patch norm is data independent: every in-image pixel contributes
    # exactly 1 to ||patch||^2.  Valid only while use_embedding_mapping=False.
    def _edge_count(n):
        idx = jnp.arange(n)
        return 1.0 + (idx > 0).astype(jnp.float32) + (idx < n - 1).astype(jnp.float32)

    cnt = _edge_count(H)[:, None] * _edge_count(W)[None, :]               # (H, W) window sizes
    inv_pn = 1.0 / (jnp.sqrt(cnt).reshape(HW) + EPS)                      # (HW,)
    inv_pairs = inv_pn.reshape(NPAIR, PACK)                               # (32, 2), p = 2q + s
    scale = jnp.repeat(inv_pairs, COS_OUT, axis=1)                        # (32, 128): cols s*64+c
    scale = jnp.repeat(scale, B, axis=0)                                  # (64, 128): rows q*B+b

    return (wcb, w1, b1, w2, b2, w3, b3, std_p, scale)


# ----------------------------------- main ----------------------------------------
if __name__ == "__main__":
    key = jax.random.PRNGKey(0)
    k_param, k_obs = jax.random.split(key)
    params = init_params(k_param)
    obs = jax.random.randint(k_obs, (B, 1, H, W), 0, NUM_CATEGORIES, dtype=jnp.int32)

    fwd = jax.jit(policy_forward)
    mean, std = fwd(obs, params)
    jax.block_until_ready((mean, std))

    assert mean.shape == (B, AC_DIM) and std.shape == (B, AC_DIM)
    assert bool(jnp.all(jnp.isfinite(mean))) and bool(jnp.all(std > 0))
    print("KERNEL_OK")
</pallas_src>

<mosaic_0001>
module attributes {stable_mosaic.version = 11 : i64} {
  func.func @fused_policy_kernel(%arg0: memref<64x18xi32, #tpu.memory_space<vmem>>, %arg1: memref<64x128xf32, #tpu.memory_space<vmem>>, %arg2: memref<256x128xf32, #tpu.memory_space<vmem>>, %arg3: memref<4096x32xf32, #tpu.memory_space<vmem>>, %arg4: memref<1x32xf32, #tpu.memory_space<vmem>>, %arg5: memref<32x32xf32, #tpu.memory_space<vmem>>, %arg6: memref<1x32xf32, #tpu.memory_space<vmem>>, %arg7: memref<32x4xf32, #tpu.memory_space<vmem>>, %arg8: memref<1x4xf32, #tpu.memory_space<vmem>>, %arg9: memref<1x4xf32, #tpu.memory_space<vmem>>, %arg10: memref<2x4xf32, #tpu.memory_space<vmem>>, %arg11: memref<2x4xf32, #tpu.memory_space<vmem>>, %arg12: memref<2x4096xf32, #tpu.memory_space<vmem>>) attributes {dimension_semantics = [], scalar_prefetch = 0 : i64, scratch_operands = 1 : i64, tpu.core_type = #tpu.core_type<tc>} {
    %0 = tpu.iota {dimensions = array<i32: 1>} : vector<64x256xi32>
    %c0 = arith.constant 0 : index
    %c0_0 = arith.constant 0 : index
    %1 = vector.load %arg0[%c0, %c0_0] : memref<64x18xi32, #tpu.memory_space<vmem>>, vector<64x18xi32>
    %2 = vector.extract_strided_slice %1 {offsets = [0, 0], sizes = [64, 1], strides = [1, 1]} : vector<64x18xi32> to vector<64x1xi32>
    %3 = vector.broadcast %2 : vector<64x1xi32> to vector<64x256xi32>
    %4 = arith.cmpi eq, %0, %3 : vector<64x256xi32>
    %5 = vector.extract_strided_slice %1 {offsets = [0, 1], sizes = [64, 1], strides = [1, 1]} : vector<64x18xi32> to vector<64x1xi32>
    %6 = vector.broadcast %5 : vector<64x1xi32> to vector<64x256xi32>
    %7 = arith.cmpi eq, %0, %6 : vector<64x256xi32>
    %8 = arith.ori %4, %7 : vector<64x256xi1>
    %9 = vector.extract_strided_slice %1 {offsets = [0, 2], sizes = [64, 1], strides = [1, 1]} : vector<64x18xi32> to vector<64x1xi32>
    %10 = vector.broadcast %9 : vector<64x1xi32> to vector<64x256xi32>
    %11 = arith.cmpi eq, %0, %10 : vector<64x256xi32>
    %12 = arith.ori %8, %11 : vector<64x256xi1>
    %13 = vector.extract_strided_slice %1 {offsets = [0, 3], sizes = [64, 1], strides = [1, 1]} : vector<64x18xi32> to vector<64x1xi32>
    %14 = vector.broadcast %13 : vector<64x1xi32> to vector<64x256xi32>
    %15 = arith.cmpi eq, %0, %14 : vector<64x256xi32>
    %16 = arith.ori %12, %15 : vector<64x256xi1>
    %17 = vector.extract_strided_slice %1 {offsets = [0, 4], sizes = [64, 1], strides = [1, 1]} : vector<64x18xi32> to vector<64x1xi32>
    %18 = vector.broadcast %17 : vector<64x1xi32> to vector<64x256xi32>
    %19 = arith.cmpi eq, %0, %18 : vector<64x256xi32>
    %20 = arith.ori %16, %19 : vector<64x256xi1>
    %21 = vector.extract_strided_slice %1 {offsets = [0, 5], sizes = [64, 1], strides = [1, 1]} : vector<64x18xi32> to vector<64x1xi32>
    %22 = vector.broadcast %21 : vector<64x1xi32> to vector<64x256xi32>
    %23 = arith.cmpi eq, %0, %22 : vector<64x256xi32>
    %24 = arith.ori %20, %23 : vector<64x256xi1>
    %25 = vector.extract_strided_slice %1 {offsets = [0, 6], sizes = [64, 1], strides = [1, 1]} : vector<64x18xi32> to vector<64x1xi32>
    %26 = vector.broadcast %25 : vector<64x1xi32> to vector<64x256xi32>
    %27 = arith.cmpi eq, %0, %26 : vector<64x256xi32>
    %28 = arith.ori %24, %27 : vector<64x256xi1>
    %29 = vector.extract_strided_slice %1 {offsets = [0, 7], sizes = [64, 1], strides = [1, 1]} : vector<64x18xi32> to vector<64x1xi32>
    %30 = vector.broadcast %29 : vector<64x1xi32> to vector<64x256xi32>
    %31 = arith.cmpi eq, %0, %30 : vector<64x256xi32>
    %32 = arith.ori %28, %31 : vector<64x256xi1>
    %33 = vector.extract_strided_slice %1 {offsets = [0, 8], sizes = [64, 1], strides = [1, 1]} : vector<64x18xi32> to vector<64x1xi32>
    %34 = vector.broadcast %33 : vector<64x1xi32> to vector<64x256xi32>
    %35 = arith.cmpi eq, %0, %34 : vector<64x256xi32>
    %36 = arith.ori %32, %35 : vector<64x256xi1>
    %37 = vector.extract_strided_slice %1 {offsets = [0, 9], sizes = [64, 1], strides = [1, 1]} : vector<64x18xi32> to vector<64x1xi32>
    %38 = vector.broadcast %37 : vector<64x1xi32> to vector<64x256xi32>
    %39 = arith.cmpi eq, %0, %38 : vector<64x256xi32>
    %40 = arith.ori %36, %39 : vector<64x256xi1>
    %41 = vector.extract_strided_slice %1 {offsets = [0, 10], sizes = [64, 1], strides = [1, 1]} : vector<64x18xi32> to vector<64x1xi32>
    %42 = vector.broadcast %41 : vector<64x1xi32> to vector<64x256xi32>
    %43 = arith.cmpi eq, %0, %42 : vector<64x256xi32>
    %44 = arith.ori %40, %43 : vector<64x256xi1>
    %45 = vector.extract_strided_slice %1 {offsets = [0, 11], sizes = [64, 1], strides = [1, 1]} : vector<64x18xi32> to vector<64x1xi32>
    %46 = vector.broadcast %45 : vector<64x1xi32> to vector<64x256xi32>
    %47 = arith.cmpi eq, %0, %46 : vector<64x256xi32>
    %48 = arith.ori %44, %47 : vector<64x256xi1>
    %49 = vector.extract_strided_slice %1 {offsets = [0, 12], sizes = [64, 1], strides = [1, 1]} : vector<64x18xi32> to vector<64x1xi32>
    %50 = vector.broadcast %49 : vector<64x1xi32> to vector<64x256xi32>
    %51 = arith.cmpi eq, %0, %50 : vector<64x256xi32>
    %52 = arith.ori %48, %51 : vector<64x256xi1>
    %53 = vector.extract_strided_slice %1 {offsets = [0, 13], sizes = [64, 1], strides = [1, 1]} : vector<64x18xi32> to vector<64x1xi32>
    %54 = vector.broadcast %53 : vector<64x1xi32> to vector<64x256xi32>
    %55 = arith.cmpi eq, %0, %54 : vector<64x256xi32>
    %56 = arith.ori %52, %55 : vector<64x256xi1>
    %57 = vector.extract_strided_slice %1 {offsets = [0, 14], sizes = [64, 1], strides = [1, 1]} : vector<64x18xi32> to vector<64x1xi32>
    %58 = vector.broadcast %57 : vector<64x1xi32> to vector<64x256xi32>
    %59 = arith.cmpi eq, %0, %58 : vector<64x256xi32>
    %60 = arith.ori %56, %59 : vector<64x256xi1>
    %61 = vector.extract_strided_slice %1 {offsets = [0, 15], sizes = [64, 1], strides = [1, 1]} : vector<64x18xi32> to vector<64x1xi32>
    %62 = vector.broadcast %61 : vector<64x1xi32> to vector<64x256xi32>
    %63 = arith.cmpi eq, %0, %62 : vector<64x256xi32>
    %64 = arith.ori %60, %63 : vector<64x256xi1>
    %65 = vector.extract_strided_slice %1 {offsets = [0, 16], sizes = [64, 1], strides = [1, 1]} : vector<64x18xi32> to vector<64x1xi32>
    %66 = vector.broadcast %65 : vector<64x1xi32> to vector<64x256xi32>
    %67 = arith.cmpi eq, %0, %66 : vector<64x256xi32>
    %68 = arith.ori %64, %67 : vector<64x256xi1>
    %69 = vector.extract_strided_slice %1 {offsets = [0, 17], sizes = [64, 1], strides = [1, 1]} : vector<64x18xi32> to vector<64x1xi32>
    %70 = vector.broadcast %69 : vector<64x1xi32> to vector<64x256xi32>
    %71 = arith.cmpi eq, %0, %70 : vector<64x256xi32>
    %72 = arith.ori %68, %71 : vector<64x256xi1>
    %73 = arith.extui %72 : vector<64x256xi1> to vector<64x256xi32>
    %74 = arith.sitofp %73 : vector<64x256xi32> to vector<64x256xf32>
    %c0_1 = arith.constant 0 : index
    %c0_2 = arith.constant 0 : index
    %75 = vector.load %arg2[%c0_1, %c0_2] : memref<256x128xf32, #tpu.memory_space<vmem>>, vector<256x128xf32>
    %cst = arith.constant dense<0.000000e+00> : vector<64x128xf32>
    %76 = tpu.matmul %74, %75, %cst {dimension_numbers = #tpu.dot_dimension_numbers<[1], [0], [0], [1], [0, 0, 1, 1], [], []>} : vector<64x256xf32>, vector<256x128xf32>, vector<64x128xf32> -> vector<64x128xf32>
    %c0_3 = arith.constant 0 : index
    %c0_4 = arith.constant 0 : index
    %77 = vector.load %arg1[%c0_3, %c0_4] : memref<64x128xf32, #tpu.memory_space<vmem>>, vector<64x128xf32>
    %78 = arith.mulf %76, %77 : vector<64x128xf32>
    %79 = vector.extract_strided_slice %78 {offsets = [0, 0], sizes = [2, 128], strides = [1, 1]} : vector<64x128xf32> to vector<2x128xf32>
    %c0_5 = arith.constant 0 : index
    %c0_6 = arith.constant 0 : index
    %80 = vector.load %arg12[%c0_5, %c0_6] : memref<2x4096xf32, #tpu.memory_space<vmem>>, vector<2x128xf32>
    tpu.vector_store %arg12[%c0_5, %c0_6], %79 {strides = array<i32>} : memref<2x4096xf32, #tpu.memory_space<vmem>>, vector<2x128xf32>,
    %81 = vector.extract_strided_slice %78 {offsets = [2, 0], sizes = [2, 128], strides = [1, 1]} : vector<64x128xf32> to vector<2x128xf32>
    %c0_7 = arith.constant 0 : index
    %c128 = arith.constant 128 : index
    %82 = vector.load %arg12[%c0_7, %c128] : memref<2x4096xf32, #tpu.memory_space<vmem>>, vector<2x128xf32>
    tpu.vector_store %arg12[%c0_7, %c128], %81 {strides = array<i32>} : memref<2x4096xf32, #tpu.memory_space<vmem>>, vector<2x128xf32>,
    %83 = vector.extract_strided_slice %78 {offsets = [4, 0], sizes = [2, 128], strides = [1, 1]} : vector<64x128xf32> to vector<2x128xf32>
    %c0_8 = arith.constant 0 : index
    %c256 = arith.constant 256 : index
    %84 = vector.load %arg12[%c0_8, %c256] : memref<2x4096xf32, #tpu.memory_space<vmem>>, vector<2x128xf32>
    tpu.vector_store %arg12[%c0_8, %c256], %83 {strides = array<i32>} : memref<2x4096xf32, #tpu.memory_space<vmem>>, vector<2x128xf32>,
    %85 = vector.extract_strided_slice %78 {offsets = [6, 0], sizes = [2, 128], strides = [1, 1]} : vector<64x128xf32> to vector<2x128xf32>
    %c0_9 = arith.constant 0 : index
    %c384 = arith.constant 384 : index
    %86 = vector.load %arg12[%c0_9, %c384] : memref<2x4096xf32, #tpu.memory_space<vmem>>, vector<2x128xf32>
    tpu.vector_store %arg12[%c0_9, %c384], %85 {strides = array<i32>} : memref<2x4096xf32, #tpu.memory_space<vmem>>, vector<2x128xf32>,
    %87 = vector.extract_strided_slice %78 {offsets = [8, 0], sizes = [2, 128], strides = [1, 1]} : vector<64x128xf32> to vector<2x128xf32>
    %c0_10 = arith.constant 0 : index
    %c512 = arith.constant 512 : index
    %88 = vector.load %arg12[%c0_10, %c512] : memref<2x4096xf32, #tpu.memory_space<vmem>>, vector<2x128xf32>
    tpu.vector_store %arg12[%c0_10, %c512], %87 {strides = array<i32>} : memref<2x4096xf32, #tpu.memory_space<vmem>>, vector<2x128xf32>,
    %89 = vector.extract_strided_slice %78 {offsets = [10, 0], sizes = [2, 128], strides = [1, 1]} : vector<64x128xf32> to vector<2x128xf32>
    %c0_11 = arith.constant 0 : index
    %c640 = arith.constant 640 : index
    %90 = vector.load %arg12[%c0_11, %c640] : memref<2x4096xf32, #tpu.memory_space<vmem>>, vector<2x128xf32>
    tpu.vector_store %arg12[%c0_11, %c640], %89 {strides = array<i32>} : memref<2x4096xf32, #tpu.memory_space<vmem>>, vector<2x128xf32>,
    %91 = vector.extract_strided_slice %78 {offsets = [12, 0], sizes = [2, 128], strides = [1, 1]} : vector<64x128xf32> to vector<2x128xf32>
    %c0_12 = arith.constant 0 : index
    %c768 = arith.constant 768 : index
    %92 = vector.load %arg12[%c0_12, %c768] : memref<2x4096xf32, #tpu.memory_space<vmem>>, vector<2x128xf32>
    tpu.vector_store %arg12[%c0_12, %c768], %91 {strides = array<i32>} : memref<2x4096xf32, #tpu.memory_space<vmem>>, vector<2x128xf32>,
    %93 = vector.extract_strided_slice %78 {offsets = [14, 0], sizes = [2, 128], strides = [1, 1]} : vector<64x128xf32> to vector<2x128xf32>
    %c0_13 = arith.constant 0 : index
    %c896 = arith.constant 896 : index
    %94 = vector.load %arg12[%c0_13, %c896] : memref<2x4096xf32, #tpu.memory_space<vmem>>, vector<2x128xf32>
    tpu.vector_store %arg12[%c0_13, %c896], %93 {strides = array<i32>} : memref<2x4096xf32, #tpu.memory_space<vmem>>, vector<2x128xf32>,
    %95 = vector.extract_strided_slice %78 {offsets = [16, 0], sizes = [2, 128], strides = [1, 1]} : vector<64x128xf32> to vector<2x128xf32>
    %c0_14 = arith.constant 0 : index
    %c1024 = arith.constant 1024 : index
    %96 = vector.load %arg12[%c0_14, %c1024] : memref<2x4096xf32, #tpu.memory_space<vmem>>, vector<2x128xf32>
    tpu.vector_store %arg12[%c0_14, %c1024], %95 {strides = array<i32>} : memref<2x4096xf32, #tpu.memory_space<vmem>>, vector<2x128xf32>,
    %97 = vector.extract_strided_slice %78 {offsets = [18, 0], sizes = [2, 128], strides = [1, 1]} : vector<64x128xf32> to vector<2x128xf32>
    %c0_15 = arith.constant 0 : index
    %c1152 = arith.constant 1152 : index
    %98 = vector.load %arg12[%c0_15, %c1152] : memref<2x4096xf32, #tpu.memory_space<vmem>>, vector<2x128xf32>
    tpu.vector_store %arg12[%c0_15, %c1152], %97 {strides = array<i32>} : memref<2x4096xf32, #tpu.memory_space<vmem>>, vector<2x128xf32>,
    %99 = vector.extract_strided_slice %78 {offsets = [20, 0], sizes = [2, 128], strides = [1, 1]} : vector<64x128xf32> to vector<2x128xf32>
    %c0_16 = arith.constant 0 : index
    %c1280 = arith.constant 1280 : index
    %100 = vector.load %arg12[%c0_16, %c1280] : memref<2x4096xf32, #tpu.memory_space<vmem>>, vector<2x128xf32>
    tpu.vector_store %arg12[%c0_16, %c1280], %99 {strides = array<i32>} : memref<2x4096xf32, #tpu.memory_space<vmem>>, vector<2x128xf32>,
    %101 = vector.extract_strided_slice %78 {offsets = [22, 0], sizes = [2, 128], strides = [1, 1]} : vector<64x128xf32> to vector<2x128xf32>
    %c0_17 = arith.constant 0 : index
    %c1408 = arith.constant 1408 : index
    %102 = vector.load %arg12[%c0_17, %c1408] : memref<2x4096xf32, #tpu.memory_space<vmem>>, vector<2x128xf32>
    tpu.vector_store %arg12[%c0_17, %c1408], %101 {strides = array<i32>} : memref<2x4096xf32, #tpu.memory_space<vmem>>, vector<2x128xf32>,
    %103 = vector.extract_strided_slice %78 {offsets = [24, 0], sizes = [2, 128], strides = [1, 1]} : vector<64x128xf32> to vector<2x128xf32>
    %c0_18 = arith.constant 0 : index
    %c1536 = arith.constant 1536 : index
    %104 = vector.load %arg12[%c0_18, %c1536] : memref<2x4096xf32, #tpu.memory_space<vmem>>, vector<2x128xf32>
    tpu.vector_store %arg12[%c0_18, %c1536], %103 {strides = array<i32>} : memref<2x4096xf32, #tpu.memory_space<vmem>>, vector<2x128xf32>,
    %105 = vector.extract_strided_slice %78 {offsets = [26, 0], sizes = [2, 128], strides = [1, 1]} : vector<64x128xf32> to vector<2x128xf32>
    %c0_19 = arith.constant 0 : index
    %c1664 = arith.constant 1664 : index
    %106 = vector.load %arg12[%c0_19, %c1664] : memref<2x4096xf32, #tpu.memory_space<vmem>>, vector<2x128xf32>
    tpu.vector_store %arg12[%c0_19, %c1664], %105 {strides = array<i32>} : memref<2x4096xf32, #tpu.memory_space<vmem>>, vector<2x128xf32>,
    %107 = vector.extract_strided_slice %78 {offsets = [28, 0], sizes = [2, 128], strides = [1, 1]} : vector<64x128xf32> to vector<2x128xf32>
    %c0_20 = arith.constant 0 : index
    %c1792 = arith.constant 1792 : index
    %108 = vector.load %arg12[%c0_20, %c1792] : memref<2x4096xf32, #tpu.memory_space<vmem>>, vector<2x128xf32>
    tpu.vector_store %arg12[%c0_20, %c1792], %107 {strides = array<i32>} : memref<2x4096xf32, #tpu.memory_space<vmem>>, vector<2x128xf32>,
    %109 = vector.extract_strided_slice %78 {offsets = [30, 0], sizes = [2, 128], strides = [1, 1]} : vector<64x128xf32> to vector<2x128xf32>
    %c0_21 = arith.constant 0 : index
    %c1920 = arith.constant 1920 : index
    %110 = vector.load %arg12[%c0_21, %c1920] : memref<2x4096xf32, #tpu.memory_space<vmem>>, vector<2x128xf32>
    tpu.vector_store %arg12[%c0_21, %c1920], %109 {strides = array<i32>} : memref<2x4096xf32, #tpu.memory_space<vmem>>, vector<2x128xf32>,
    %111 = vector.extract_strided_slice %78 {offsets = [32, 0], sizes = [2, 128], strides = [1, 1]} : vector<64x128xf32> to vector<2x128xf32>
    %c0_22 = arith.constant 0 : index
    %c2048 = arith.constant 2048 : index
    %112 = vector.load %arg12[%c0_22, %c2048] : memref<2x4096xf32, #tpu.memory_space<vmem>>, vector<2x128xf32>
    tpu.vector_store %arg12[%c0_22, %c2048], %111 {strides = array<i32>} : memref<2x4096xf32, #tpu.memory_space<vmem>>, vector<2x128xf32>,
    %113 = vector.extract_strided_slice %78 {offsets = [34, 0], sizes = [2, 128], strides = [1, 1]} : vector<64x128xf32> to vector<2x128xf32>
    %c0_23 = arith.constant 0 : index
    %c2176 = arith.constant 2176 : index
    %114 = vector.load %arg12[%c0_23, %c2176] : memref<2x4096xf32, #tpu.memory_space<vmem>>, vector<2x128xf32>
    tpu.vector_store %arg12[%c0_23, %c2176], %113 {strides = array<i32>} : memref<2x4096xf32, #tpu.memory_space<vmem>>, vector<2x128xf32>,
    %115 = vector.extract_strided_slice %78 {offsets = [36, 0], sizes = [2, 128], strides = [1, 1]} : vector<64x128xf32> to vector<2x128xf32>
    %c0_24 = arith.constant 0 : index
    %c2304 = arith.constant 2304 : index
    %116 = vector.load %arg12[%c0_24, %c2304] : memref<2x4096xf32, #tpu.memory_space<vmem>>, vector<2x128xf32>
    tpu.vector_store %arg12[%c0_24, %c2304], %115 {strides = array<i32>} : memref<2x4096xf32, #tpu.memory_space<vmem>>, vector<2x128xf32>,
    %117 = vector.extract_strided_slice %78 {offsets = [38, 0], sizes = [2, 128], strides = [1, 1]} : vector<64x128xf32> to vector<2x128xf32>
    %c0_25 = arith.constant 0 : index
    %c2432 = arith.constant 2432 : index
    %118 = vector.load %arg12[%c0_25, %c2432] : memref<2x4096xf32, #tpu.memory_space<vmem>>, vector<2x128xf32>
    tpu.vector_store %arg12[%c0_25, %c2432], %117 {strides = array<i32>} : memref<2x4096xf32, #tpu.memory_space<vmem>>, vector<2x128xf32>,
    %119 = vector.extract_strided_slice %78 {offsets = [40, 0], sizes = [2, 128], strides = [1, 1]} : vector<64x128xf32> to vector<2x128xf32>
    %c0_26 = arith.constant 0 : index
    %c2560 = arith.constant 2560 : index
    %120 = vector.load %arg12[%c0_26, %c2560] : memref<2x4096xf32, #tpu.memory_space<vmem>>, vector<2x128xf32>
    tpu.vector_store %arg12[%c0_26, %c2560], %119 {strides = array<i32>} : memref<2x4096xf32, #tpu.memory_space<vmem>>, vector<2x128xf32>,
    %121 = vector.extract_strided_slice %78 {offsets = [42, 0], sizes = [2, 128], strides = [1, 1]} : vector<64x128xf32> to vector<2x128xf32>
    %c0_27 = arith.constant 0 : index
    %c2688 = arith.constant 2688 : index
    %122 = vector.load %arg12[%c0_27, %c2688] : memref<2x4096xf32, #tpu.memory_space<vmem>>, vector<2x128xf32>
    tpu.vector_store %arg12[%c0_27, %c2688], %121 {strides = array<i32>} : memref<2x4096xf32, #tpu.memory_space<vmem>>, vector<2x128xf32>,
    %123 = vector.extract_strided_slice %78 {offsets = [44, 0], sizes = [2, 128], strides = [1, 1]} : vector<64x128xf32> to vector<2x128xf32>
    %c0_28 = arith.constant 0 : index
    %c2816 = arith.constant 2816 : index
    %124 = vector.load %arg12[%c0_28, %c2816] : memref<2x4096xf32, #tpu.memory_space<vmem>>, vector<2x128xf32>
    tpu.vector_store %arg12[%c0_28, %c2816], %123 {strides = array<i32>} : memref<2x4096xf32, #tpu.memory_space<vmem>>, vector<2x128xf32>,
    %125 = vector.extract_strided_slice %78 {offsets = [46, 0], sizes = [2, 128], strides = [1, 1]} : vector<64x128xf32> to vector<2x128xf32>
    %c0_29 = arith.constant 0 : index
    %c2944 = arith.constant 2944 : index
    %126 = vector.load %arg12[%c0_29, %c2944] : memref<2x4096xf32, #tpu.memory_space<vmem>>, vector<2x128xf32>
    tpu.vector_store %arg12[%c0_29, %c2944], %125 {strides = array<i32>} : memref<2x4096xf32, #tpu.memory_space<vmem>>, vector<2x128xf32>,
    %127 = vector.extract_strided_slice %78 {offsets = [48, 0], sizes = [2, 128], strides = [1, 1]} : vector<64x128xf32> to vector<2x128xf32>
    %c0_30 = arith.constant 0 : index
    %c3072 = arith.constant 3072 : index
    %128 = vector.load %arg12[%c0_30, %c3072] : memref<2x4096xf32, #tpu.memory_space<vmem>>, vector<2x128xf32>
    tpu.vector_store %arg12[%c0_30, %c3072], %127 {strides = array<i32>} : memref<2x4096xf32, #tpu.memory_space<vmem>>, vector<2x128xf32>,
    %129 = vector.extract_strided_slice %78 {offsets = [50, 0], sizes = [2, 128], strides = [1, 1]} : vector<64x128xf32> to vector<2x128xf32>
    %c0_31 = arith.constant 0 : index
    %c3200 = arith.constant 3200 : index
    %130 = vector.load %arg12[%c0_31, %c3200] : memref<2x4096xf32, #tpu.memory_space<vmem>>, vector<2x128xf32>
    tpu.vector_store %arg12[%c0_31, %c3200], %129 {strides = array<i32>} : memref<2x4096xf32, #tpu.memory_space<vmem>>, vector<2x128xf32>,
    %131 = vector.extract_strided_slice %78 {offsets = [52, 0], sizes = [2, 128], strides = [1, 1]} : vector<64x128xf32> to vector<2x128xf32>
    %c0_32 = arith.constant 0 : index
    %c3328 = arith.constant 3328 : index
    %132 = vector.load %arg12[%c0_32, %c3328] : memref<2x4096xf32, #tpu.memory_space<vmem>>, vector<2x128xf32>
    tpu.vector_store %arg12[%c0_32, %c3328], %131 {strides = array<i32>} : memref<2x4096xf32, #tpu.memory_space<vmem>>, vector<2x128xf32>,
    %133 = vector.extract_strided_slice %78 {offsets = [54, 0], sizes = [2, 128], strides = [1, 1]} : vector<64x128xf32> to vector<2x128xf32>
    %c0_33 = arith.constant 0 : index
    %c3456 = arith.constant 3456 : index
    %134 = vector.load %arg12[%c0_33, %c3456] : memref<2x4096xf32, #tpu.memory_space<vmem>>, vector<2x128xf32>
    tpu.vector_store %arg12[%c0_33, %c3456], %133 {strides = array<i32>} : memref<2x4096xf32, #tpu.memory_space<vmem>>, vector<2x128xf32>,
    %135 = vector.extract_strided_slice %78 {offsets = [56, 0], sizes = [2, 128], strides = [1, 1]} : vector<64x128xf32> to vector<2x128xf32>
    %c0_34 = arith.constant 0 : index
    %c3584 = arith.constant 3584 : index
    %136 = vector.load %arg12[%c0_34, %c3584] : memref<2x4096xf32, #tpu.memory_space<vmem>>, vector<2x128xf32>
    tpu.vector_store %arg12[%c0_34, %c3584], %135 {strides = array<i32>} : memref<2x4096xf32, #tpu.memory_space<vmem>>, vector<2x128xf32>,
    %137 = vector.extract_strided_slice %78 {offsets = [58, 0], sizes = [2, 128], strides = [1, 1]} : vector<64x128xf32> to vector<2x128xf32>
    %c0_35 = arith.constant 0 : index
    %c3712 = arith.constant 3712 : index
    %138 = vector.load %arg12[%c0_35, %c3712] : memref<2x4096xf32, #tpu.memory_space<vmem>>, vector<2x128xf32>
    tpu.vector_store %arg12[%c0_35, %c3712], %137 {strides = array<i32>} : memref<2x4096xf32, #tpu.memory_space<vmem>>, vector<2x128xf32>,
    %139 = vector.extract_strided_slice %78 {offsets = [60, 0], sizes = [2, 128], strides = [1, 1]} : vector<64x128xf32> to vector<2x128xf32>
    %c0_36 = arith.constant 0 : index
    %c3840 = arith.constant 3840 : index
    %140 = vector.load %arg12[%c0_36, %c3840] : memref<2x4096xf32, #tpu.memory_space<vmem>>, vector<2x128xf32>
    tpu.vector_store %arg12[%c0_36, %c3840], %139 {strides = array<i32>} : memref<2x4096xf32, #tpu.memory_space<vmem>>, vector<2x128xf32>,
    %141 = vector.extract_strided_slice %78 {offsets = [62, 0], sizes = [2, 128], strides = [1, 1]} : vector<64x128xf32> to vector<2x128xf32>
    %c0_37 = arith.constant 0 : index
    %c3968 = arith.constant 3968 : index
    %142 = vector.load %arg12[%c0_37, %c3968] : memref<2x4096xf32, #tpu.memory_space<vmem>>, vector<2x128xf32>
    tpu.vector_store %arg12[%c0_37, %c3968], %141 {strides = array<i32>} : memref<2x4096xf32, #tpu.memory_space<vmem>>, vector<2x128xf32>,
    %c0_38 = arith.constant 0 : index
    %c0_39 = arith.constant 0 : index
    %143 = vector.load %arg12[%c0_38, %c0_39] : memref<2x4096xf32, #tpu.memory_space<vmem>>, vector<2x4096xf32>
    %c0_40 = arith.constant 0 : index
    %c0_41 = arith.constant 0 : index
    %144 = vector.load %arg3[%c0_40, %c0_41] : memref<4096x32xf32, #tpu.memory_space<vmem>>, vector<4096x32xf32>
    %cst_42 = arith.constant dense<0.000000e+00> : vector<2x32xf32>
    %145 = tpu.matmul %143, %144, %cst_42 {dimension_numbers = #tpu.dot_dimension_numbers<[1], [0], [0], [1], [0, 0, 1, 1], [], []>} : vector<2x4096xf32>, vector<4096x32xf32>, vector<2x32xf32> -> vector<2x32xf32>
    %c0_43 = arith.constant 0 : index
    %c0_44 = arith.constant 0 : index
    %146 = vector.load %arg4[%c0_43, %c0_44] : memref<1x32xf32, #tpu.memory_space<vmem>>, vector<1x32xf32>
    %147 = vector.broadcast %146 : vector<1x32xf32> to vector<2x32xf32>
    %148 = arith.addf %145, %147 : vector<2x32xf32>
    %149 = math.tanh %148 : vector<2x32xf32>
    %c0_45 = arith.constant 0 : index
    %c0_46 = arith.constant 0 : index
    %150 = vector.load %arg5[%c0_45, %c0_46] : memref<32x32xf32, #tpu.memory_space<vmem>>, vector<32x32xf32>
    %cst_47 = arith.constant dense<0.000000e+00> : vector<2x32xf32>
    %151 = tpu.matmul %149, %150, %cst_47 {dimension_numbers = #tpu.dot_dimension_numbers<[1], [0], [0], [1], [0, 0, 1, 1], [], []>} : vector<2x32xf32>, vector<32x32xf32>, vector<2x32xf32> -> vector<2x32xf32>
    %c0_48 = arith.constant 0 : index
    %c0_49 = arith.constant 0 : index
    %152 = vector.load %arg6[%c0_48, %c0_49] : memref<1x32xf32, #tpu.memory_space<vmem>>, vector<1x32xf32>
    %153 = vector.broadcast %152 : vector<1x32xf32> to vector<2x32xf32>
    %154 = arith.addf %151, %153 : vector<2x32xf32>
    %155 = math.tanh %154 : vector<2x32xf32>
    %c0_50 = arith.constant 0 : index
    %c0_51 = arith.constant 0 : index
    %156 = vector.load %arg7[%c0_50, %c0_51] : memref<32x4xf32, #tpu.memory_space<vmem>>, vector<32x4xf32>
    %cst_52 = arith.constant dense<0.000000e+00> : vector<2x4xf32>
    %157 = tpu.matmul %155, %156, %cst_52 {dimension_numbers = #tpu.dot_dimension_numbers<[1], [0], [0], [1], [0, 0, 1, 1], [], []>} : vector<2x32xf32>, vector<32x4xf32>, vector<2x4xf32> -> vector<2x4xf32>
    %c0_53 = arith.constant 0 : index
    %c0_54 = arith.constant 0 : index
    %158 = vector.load %arg8[%c0_53, %c0_54] : memref<1x4xf32, #tpu.memory_space<vmem>>, vector<1x4xf32>
    %159 = vector.broadcast %158 : vector<1x4xf32> to vector<2x4xf32>
    %160 = arith.addf %157, %159 : vector<2x4xf32>
    %c0_55 = arith.constant 0 : index
    %c0_56 = arith.constant 0 : index
    %161 = vector.load %arg10[%c0_55, %c0_56] : memref<2x4xf32, #tpu.memory_space<vmem>>, vector<2x4xf32>
    tpu.vector_store %arg10[%c0_55, %c0_56], %160 {strides = array<i32>} : memref<2x4xf32, #tpu.memory_space<vmem>>, vector<2x4xf32>,
    %c0_57 = arith.constant 0 : index
    %c0_58 = arith.constant 0 : index
    %162 = vector.load %arg9[%c0_57, %c0_58] : memref<1x4xf32, #tpu.memory_space<vmem>>, vector<1x4xf32>
    %cst_59 = arith.constant 0.000000e+00 : f32
    %163 = vector.broadcast %cst_59 : f32 to vector<1x4xf32>
    %164 = arith.maximumf %162, %163 : vector<1x4xf32>
    %165 = vector.broadcast %cst_59 : f32 to vector<1x4xf32>
    %166 = arith.subf %162, %165 : vector<1x4xf32>
    %167 = arith.cmpf one, %166, %166 : vector<1x4xf32>
    %168 = vector.broadcast %cst_59 : f32 to vector<1x4xf32>
    %169 = arith.addf %162, %168 : vector<1x4xf32>
    %170 = math.absf %166 : vector<1x4xf32>
    %cst_60 = arith.constant 0.000000e+00 : f32
    %171 = vector.broadcast %cst_60 : f32 to vector<1x4xf32>
    %172 = arith.subf %171, %170 : vector<1x4xf32>
    %173 = math.exp %172 : vector<1x4xf32>
    %174 = math.log1p %173 : vector<1x4xf32>
    %175 = arith.addf %164, %174 : vector<1x4xf32>
    %176 = arith.select %167, %169, %175 : vector<1x4xi1>, vector<1x4xf32>
    %cst_61 = arith.constant 0.00999999977 : f32
    %177 = vector.broadcast %cst_61 : f32 to vector<1x4xf32>
    %178 = arith.addf %176, %177 : vector<1x4xf32>
    %179 = vector.shape_cast %178 : vector<1x4xf32> to vector<1x4xf32>
    %180 = vector.broadcast %179 : vector<1x4xf32> to vector<2x4xf32>
    %c0_62 = arith.constant 0 : index
    %c0_63 = arith.constant 0 : index
    %181 = vector.load %arg11[%c0_62, %c0_63] : memref<2x4xf32, #tpu.memory_space<vmem>>, vector<2x4xf32>
    tpu.vector_store %arg11[%c0_62, %c0_63], %180 {strides = array<i32>} : memref<2x4xf32, #tpu.memory_space<vmem>>, vector<2x4xf32>,
    return
  }
}

</mosaic_0001>

<bundles_post_ra>
// kernel: policy_forward.1
= control target key start
LH: loop header
LB: loop body
LE: loop exit
PB: predicated region body
PF: predicated region fallthrough
CT: control target
= control target key end

     0   :  { %17 = vsyncpa [#allocation4], 0  ;;  %v4923_v1 = vmov 2   ;;  %v4924_v2 = vmov 0   ;;  %s7747_s0 = inlined_call_operand.vmem [shape: s32[64,18], index: 0, kind: input, shape index: {}]   ;;  %s7748_s1 = inlined_call_operand.vmem [shape: f32[64,128], index: 1, kind: input, shape index: {}]   ;;  %s7749_s2 = inlined_call_operand.vmem [shape: f32[256,128], index: 2, kind: input, shape index: {}]   ;;  %s7750_s3 = inlined_call_operand.vmem [shape: f32[4096,32], index: 3, kind: input, shape index: {}]   ;;  %s7751_s4 = inlined_call_operand.vmem [shape: f32[1,32], index: 4, kind: input, shape index: {}]   ;;  %s7752_s5 = inlined_call_operand.vmem [shape: f32[32,32], index: 5, kind: input, shape index: {}]   ;;  %s7753_s6 = inlined_call_operand.vmem [shape: f32[1,32], index: 6, kind: input, shape index: {}]   ;;  %s7754_s7 = inlined_call_operand.vmem [shape: f32[32,4], index: 7, kind: input, shape index: {}]   ;;  %s7755_s8 = inlined_call_operand.vmem [shape: f32[1,4], index: 8, kind: input, shape index: {}]   ;;  %s7756_s9 = inlined_call_operand.vmem [shape: f32[1,4], index: 9, kind: input, shape index: {}]   ;;  %s7757_s10 = inlined_call_operand.hbm [shape: f32[2,4], index: 10, kind: output, shape index: {0}]   ;;  %s7758_s11 = inlined_call_operand.hbm [shape: f32[2,4], index: 11, kind: output, shape index: {1}]  }
   0x1   :  { %v5010_v0 = vld [vmem:[%s7747_s0] sm:$0xff]  ;;  %4737 = vset.pattern.permute.xlu1 %v4923_v1  ;;  %4735 = vset.pattern.permute.xlu0 %v4924_v2 }
   0x2   :  { %147 = vperm.xlu1 %4737, %v5010_v0   ;;  %51 = vperm.xlu0 %4735, %v5010_v0  }
   0x3   :  { %18 = vsyncpa [#allocation6], 0  ;;  %v4925_v3 = vmov 3   ;;  %v4926_v4 = vmov 1   ;;  %v4927_v5 = vmov 4   ;;  %v4928_v6 = vmov 11  }
   0x4   :  { %v4929_v7 = vmov 6   ;;  %v4930_v8 = vmov 14   ;;  %v4931_v9 = vmov 7   ;;  %v4932_v10 = vmov 17   ;;  %v5035_v11 = vld [vmem:[%s7747_s0 + $0x8] sm:$0xff]  ;;  %v1090_v12 = vld [vmem:[%s7749_s2 + $0x80] sm:$0xff] }
   0x5   :  { %v1091_v13 = vld [vmem:[%s7749_s2 + $0x88] sm:$0xff]  ;;  %v4933_v15 = vmov 9   ;;  %v1074_v16 = vld [vmem:[%s7749_s2] sm:$0xff]  ;;  %v1092_v19 = vld [vmem:[%s7749_s2 + $0x90] sm:$0xff]  ;;  %v4934_v24 = vmov 10   ;;  %v4935_v25 = vmov 5  }
   0x6   :  { %4738 = vset.pattern.permute.xlu1 %v4925_v3  ;;  %4736 = vset.pattern.permute.xlu0 %v4926_v4  ;;  %v4155_v14 = vpack.c.bf16 %v1091_v13, %v1090_v12  ;;  %v1075_v17 = vld [vmem:[%s7749_s2 + $0x8] sm:$0xff]  ;;  %v1093_v20 = vld [vmem:[%s7749_s2 + $0x98] sm:$0xff]  ;;  %v1076_v21 = vld [vmem:[%s7749_s2 + $0x10] sm:$0xff]  ;;  %v4936_v32 = vmov 12   ;;  %v4937_v41 = vmov 13   ;;  %v4938_v47 = vmov 8  }
   0x7   :  { %203 = vperm.xlu1 %4738, %v5010_v0   ;;  %91 = vperm.xlu0 %4736, %v5010_v0   ;;  %v4157_v18 = vpack.c.bf16 %v1075_v17, %v1074_v16  ;;  %v4159_v22 = vpack.c.bf16 %v1093_v20, %v1092_v19  ;;  %v1077_v23 = vld [vmem:[%s7749_s2 + $0x18] sm:$0xff]  ;;  %v1094_v27 = vld [vmem:[%s7749_s2 + $0xa0] sm:$0xff]  ;;  %v1095_v28 = vld [vmem:[%s7749_s2 + $0xa8] sm:$0xff]  ;;  %v4939_v49 = vmov 15   ;;  %v4940_v56 = vmov 16  }
   0x8   :  { %4156 = vmatprep.subr.bf16.mxu0 %v4155_v14  ;;  %v4161_v26 = vpack.c.bf16 %v1077_v23, %v1076_v21  ;;  %v4163_v29 = vpack.c.bf16 %v1095_v28, %v1094_v27  ;;  %v1078_v30 = vld [vmem:[%s7749_s2 + $0x20] sm:$0xff]  ;;  %v1079_v31 = vld [vmem:[%s7749_s2 + $0x28] sm:$0xff]  ;;  %v5087_v34 = vld [vmem:[%s7747_s0 + $0x10] sm:$0xff] }
   0x9   :  { %4158 = vmatpush3.bf16.msra.mxu0 %v4157_v18  ;;  %v4165_v33 = vpack.c.bf16 %v1079_v31, %v1078_v30  ;;  %v1096_v35 = vld [vmem:[%s7749_s2 + $0xb0] sm:$0xff]  ;;  %v1097_v36 = vld [vmem:[%s7749_s2 + $0xb8] sm:$0xff]  ;;  %v1098_v42 = vld [vmem:[%s7749_s2 + $0xc0] sm:$0xff] }
   0xa   :  { %4160 = vmatprep.subr.bf16.mxu0 %v4159_v22  ;;  %v4167_v37 = vpack.c.bf16 %v1097_v36, %v1096_v35  ;;  %v1080_v38 = vld [vmem:[%s7749_s2 + $0x30] sm:$0xff]  ;;  %v1081_v39 = vld [vmem:[%s7749_s2 + $0x38] sm:$0xff]  ;;  %v1099_v43 = vld [vmem:[%s7749_s2 + $0xc8] sm:$0xff] }
   0xb   :  { %4739 = vset.pattern.permute.xlu1 %v4927_v5  ;;  %4744 = vset.pattern.permute.xlu0 %v4928_v6  ;;  %v4169_v40 = vpack.c.bf16 %v1081_v39, %v1080_v38  ;;  %v1082_v44 = vld [vmem:[%s7749_s2 + $0x40] sm:$0xff]  ;;  %v4171_v45 = vpack.c.bf16 %v1099_v43, %v1098_v42  ;;  %v1083_v46 = vld [vmem:[%s7749_s2 + $0x48] sm:$0xff]  ;;  %v1100_v50 = vld [vmem:[%s7749_s2 + $0xd0] sm:$0xff] }
   0xc   :  { %259 = vperm.xlu1 %4739, %v5010_v0   ;;  %651 = vperm.xlu0 %4744, %v5010_v0   ;;  %v4173_v48 = vpack.c.bf16 %v1083_v46, %v1082_v44  ;;  %v1101_v51 = vld [vmem:[%s7749_s2 + $0xd8] sm:$0xff]  ;;  %v1084_v53 = vld [vmem:[%s7749_s2 + $0x50] sm:$0xff]  ;;  %v1102_v57 = vld [vmem:[%s7749_s2 + $0xe0] sm:$0xff] }
   0xd   :  { %4162 = vmatpush3.bf16.msra.mxu0 %v4161_v26  ;;  %v4175_v52 = vpack.c.bf16 %v1101_v51, %v1100_v50  ;;  %v1085_v54 = vld [vmem:[%s7749_s2 + $0x58] sm:$0xff]  ;;  %v1103_v58 = vld [vmem:[%s7749_s2 + $0xe8] sm:$0xff]  ;;  %v1086_v60 = vld [vmem:[%s7749_s2 + $0x60] sm:$0xff]  ;;  %v39_v26 = vlaneseq }
   0xe   :  { %4164 = vmatprep.subr.bf16.mxu0 %v4163_v29  ;;  %v4177_v55 = vpack.c.bf16 %v1085_v54, %v1084_v53  ;;  %v4179_v59 = vpack.c.bf16 %v1103_v58, %v1102_v57  ;;  %v1087_v61 = vld [vmem:[%s7749_s2 + $0x68] sm:$0xff]  ;;  %v1104_v63 = vld [vmem:[%s7749_s2 + $0xf0] sm:$0xff]  ;;  %v1089_v14 = vld [vmem:[%s7749_s2 + $0x78] sm:$0xff]  ;;  %v4941_v54 = vmov 0.0  }
   0xf   :  { %v4181_v62 = vpack.c.bf16 %v1087_v61, %v1086_v60  ;;  %v1088_v13 = vld [vmem:[%s7749_s2 + $0x70] sm:$0xff]  ;;  %v5177_v17 = vld [vmem:[%s7747_s0 + $0x18] sm:$0xff]  ;;  %v5200_v18 = vld [vmem:[%s7747_s0 + $0x20] sm:$0xff]  ;;  %v5237_v29 = vand.u32 127, %v39_v26 }
  0x10   :  { %4740 = vset.pattern.permute.xlu1 %v4929_v7  ;;  %4747 = vset.pattern.permute.xlu0 %v4930_v8  ;;  %v4185_v16 = vpack.c.bf16 %v1089_v14, %v1088_v13  ;;  %v1435_v50 = vld [vmem:[%s7750_s3] sm:$0xff] }
  0x11   :  { %371 = vperm.xlu1 %4740, %v5010_v0   ;;  %819 = vperm.xlu0 %4747, %v5010_v0   ;;  %v5249_v35 = vadd.s32 128, %v5237_v29 }
  0x12   :  { %4166 = vmatpush3.bf16.msra.mxu0 %v4165_v33  ;;  %v5244_v33 = vld [vmem:[%s7747_s0 + $0x28] sm:$0xff] }
  0x13   :  { %4168 = vmatprep.subr.bf16.mxu0 %v4167_v37 }
  0x15   :  { %4741 = vset.pattern.permute.xlu1 %v4931_v9  ;;  %4750 = vset.pattern.permute.xlu0 %v4932_v10 }
  0x16   :  { %427 = vperm.xlu1 %4741, %v5010_v0   ;;  %987 = vperm.xlu0 %4750, %v5010_v0  }
  0x17   :  { %4170 = vmatpush3.bf16.msra.mxu0 %v4169_v40 }
  0x18   :  { %4172 = vmatprep.subr.bf16.mxu0 %v4171_v45 }
  0x1a   :  { %4742 = vset.pattern.permute.xlu1 %v4933_v15  ;;  %4753 = vset.pattern.permute.xlu0 %v4923_v1 }
  0x1b   :  { %539 = vperm.xlu1 %4742, %v5010_v0   ;;  %150 = vperm.xlu0 %4753, %v5035_v11  }
  0x1c   :  { %4174 = vmatpush3.bf16.msra.mxu0 %v4173_v48  ;;  %v5305_v48 = vld [vmem:[%s7747_s0 + $0x30] sm:$0xff] }
  0x1d   :  { %4176 = vmatprep.subr.bf16.mxu0 %v4175_v52  ;;  %v1453_v52 = vld [vmem:[%s7750_s3 + $0x90] sm:$0xff] }
  0x1f   :  { %4743 = vset.pattern.permute.xlu1 %v4934_v24  ;;  %4754 = vset.pattern.permute.xlu0 %v4935_v25 }
  0x20   :  { %595 = vperm.xlu1 %4743, %v5010_v0   ;;  %315 = vperm.xlu0 %4754, %v5010_v0  }
  0x21   :  { %4178 = vmatpush3.bf16.msra.mxu0 %v4177_v55 }
  0x22   :  { %4180 = vmatprep.subr.bf16.mxu0 %v4179_v59 }
  0x24   :  { %4745 = vset.pattern.permute.xlu1 %v4936_v32  ;;  %318 = vperm.xlu0 %4754, %v5035_v11  }
  0x25   :  { %707 = vperm.xlu1 %4745, %v5010_v0   ;;  %4182 = vmatpush3.bf16.msra.mxu0 %v4181_v62 }
  0x28   :  { %321 = vperm.xlu0 %4754, %v5087_v34  }
  0x29   :  { %4746 = vset.pattern.permute.xlu1 %v4937_v41 }
  0x2a   :  { %763 = vperm.xlu1 %4746, %v5010_v0  }
  0x2c   :  { %4769 = vset.pattern.permute.xlu0 %v4938_v47 }
  0x2d   :  { %483 = vperm.xlu0 %4769, %v5010_v0  }
  0x2e   :  { %4748 = vset.pattern.permute.xlu1 %v4939_v49 }
  0x2f   :  { %875 = vperm.xlu1 %4748, %v5010_v0  }
  0x31   :  { %486 = vperm.xlu0 %4769, %v5035_v11  }
  0x33   :  { %4749 = vset.pattern.permute.xlu1 %v4940_v56 }
  0x34   :  { %931 = vperm.xlu1 %4749, %v5010_v0   ;;  %v1105_v0 = vld [vmem:[%s7749_s2 + $0xf8] sm:$0xff] }
  0x35   :  { %489 = vperm.xlu0 %4769, %v5087_v34   ;;  %v4183_v12 = vpack.c.bf16 %v1105_v0, %v1104_v63 }
  0x37   :  { %4184 = vmatprep.subr.bf16.mxu0 %v4183_v12 }
  0x38   :  { %4751 = vset.pattern.permute.xlu1 %v4924_v2  ;;  %4186 = vmatpush3.bf16.msra.mxu0 %v4185_v16 }
  0x39   :  { %54 = vperm.xlu1 %4751, %v5035_v11   ;;  %4772 = vset.pattern.permute.xlu0 %v4928_v6 }
  0x3a   :  { %654 = vperm.xlu0 %4772, %v5035_v11  }
  0x3d   :  { %4752 = vset.pattern.permute.xlu1 %v4926_v4 }
  0x3e   :  { %94 = vperm.xlu1 %4752, %v5035_v11   ;;  %657 = vperm.xlu0 %4772, %v5087_v34  }
  0x42   :  { %4755 = vset.pattern.permute.xlu1 %v4925_v3  ;;  %4775 = vset.pattern.permute.xlu0 %v4930_v8 }
  0x43   :  { %206 = vperm.xlu1 %4755, %v5035_v11   ;;  %822 = vperm.xlu0 %4775, %v5035_v11  }
  0x47   :  { %4756 = vset.pattern.permute.xlu1 %v4927_v5  ;;  %825 = vperm.xlu0 %4775, %v5087_v34  }
  0x48   :  { %262 = vperm.xlu1 %4756, %v5035_v11  }
  0x4b   :  { %828 = vperm.xlu0 %4775, %v5177_v17  }
  0x4c   :  { %4757 = vset.pattern.permute.xlu1 %v4929_v7 }
  0x4d   :  { %374 = vperm.xlu1 %4757, %v5035_v11  }
  0x4f   :  { %4790 = vset.pattern.permute.xlu0 %v4932_v10 }
  0x50   :  { %990 = vperm.xlu0 %4790, %v5035_v11  }
  0x51   :  { %4758 = vset.pattern.permute.xlu1 %v4931_v9 }
  0x52   :  { %430 = vperm.xlu1 %4758, %v5035_v11  }
  0x54   :  { %993 = vperm.xlu0 %4790, %v5087_v34  }
  0x56   :  { %4759 = vset.pattern.permute.xlu1 %v4933_v15 }
  0x57   :  { %542 = vperm.xlu1 %4759, %v5035_v11  }
  0x58   :  { %996 = vperm.xlu0 %4790, %v5177_v17  }
  0x5b   :  { %4760 = vset.pattern.permute.xlu1 %v4934_v24 }
  0x5c   :  { %598 = vperm.xlu1 %4760, %v5035_v11   ;;  %4793 = vset.pattern.permute.xlu0 %v4923_v1 }
  0x5d   :  { %153 = vperm.xlu0 %4793, %v5087_v34  }
  0x60   :  { %4761 = vset.pattern.permute.xlu1 %v4936_v32 }
  0x61   :  { %710 = vperm.xlu1 %4761, %v5035_v11   ;;  %156 = vperm.xlu0 %4793, %v5177_v17  }
  0x65   :  { %4762 = vset.pattern.permute.xlu1 %v4937_v41  ;;  %159 = vperm.xlu0 %4793, %v5200_v18  }
  0x66   :  { %766 = vperm.xlu1 %4762, %v5035_v11  }
  0x69   :  { %4796 = vset.pattern.permute.xlu0 %v4935_v25 }
  0x6a   :  { %4763 = vset.pattern.permute.xlu1 %v4939_v49  ;;  %324 = vperm.xlu0 %4796, %v5177_v17  }
  0x6b   :  { %878 = vperm.xlu1 %4763, %v5035_v11  }
  0x6e   :  { %327 = vperm.xlu0 %4796, %v5200_v18  }
  0x6f   :  { %4764 = vset.pattern.permute.xlu1 %v4940_v56 }
  0x70   :  { %934 = vperm.xlu1 %4764, %v5035_v11  }
  0x72   :  { %4799 = vset.pattern.permute.xlu0 %v4938_v47 }
  0x73   :  { %492 = vperm.xlu0 %4799, %v5177_v17  }
  0x74   :  { %4765 = vset.pattern.permute.xlu1 %v4924_v2 }
  0x75   :  { %57 = vperm.xlu1 %4765, %v5087_v34  }
  0x77   :  { %495 = vperm.xlu0 %4799, %v5200_v18  }
  0x79   :  { %4766 = vset.pattern.permute.xlu1 %v4926_v4 }
  0x7a   :  { %97 = vperm.xlu1 %4766, %v5087_v34  }
  0x7b   :  { %4802 = vset.pattern.permute.xlu0 %v4928_v6 }
  0x7c   :  { %660 = vperm.xlu0 %4802, %v5177_v17  }
  0x7e   :  { %4767 = vset.pattern.permute.xlu1 %v4925_v3 }
  0x7f   :  { %209 = vperm.xlu1 %4767, %v5087_v34  }
  0x80   :  { %663 = vperm.xlu0 %4802, %v5200_v18  }
  0x81   :  { %v148_v11 = vpop.permute.xlu1 %147  ;;  %v52_v19 = vpop.permute.xlu0 %51 }
  0x82   :  { %vm74_vm0 = vcmp.eq.s32.totalorder %v5237_v29, %v52_v19  ;;  %vm75_vm2 = vcmp.eq.s32.totalorder %v5249_v35, %v52_v19  ;;  %vm170_vm6 = vcmp.eq.s32.totalorder %v5237_v29, %v148_v11  ;;  %vm171_vm7 = vcmp.eq.s32.totalorder %v5249_v35, %v148_v11 }
  0x83   :  { %4768 = vset.pattern.permute.xlu1 %v4927_v5 }
  0x84   :  { %265 = vperm.xlu1 %4768, %v5087_v34   ;;  %666 = vperm.xlu0 %4802, %v5244_v33  }
  0x86   :  { %v204_v20 = vpop.permute.xlu1 %203  ;;  %v92_v21 = vpop.permute.xlu0 %91 }
  0x87   :  { %vm114_vm1 = vcmp.eq.s32.totalorder %v5237_v29, %v92_v21  ;;  %vm115_vm3 = vcmp.eq.s32.totalorder %v5249_v35, %v92_v21  ;;  %vm226_vm10 = vcmp.eq.s32.totalorder %v5237_v29, %v204_v20  ;;  %vm227_vm12 = vcmp.eq.s32.totalorder %v5249_v35, %v204_v20 }
  0x88   :  { %4770 = vset.pattern.permute.xlu1 %v4929_v7  ;;  %4817 = vset.pattern.permute.xlu0 %v4930_v8  ;;  %vm130_vm4 = vmor %vm74_vm0, %vm114_vm1 }
  0x89   :  { %377 = vperm.xlu1 %4770, %v5087_v34   ;;  %831 = vperm.xlu0 %4817, %v5200_v18   ;;  %vm131_vm5 = vmor %vm75_vm2, %vm115_vm3 }
  0x8a   :  { %vm186_vm8 = vmor %vm130_vm4, %vm170_vm6 }
  0x8b   :  { %v260_v22 = vpop.permute.xlu1 %259  ;;  %v5228_v23 = vpop.permute.xlu0 %651  ;;  %vm187_vm9 = vmor %vm131_vm5, %vm171_vm7 }
  0x8c   :  { %vm282_vm11 = vcmp.eq.s32.totalorder %v5237_v29, %v260_v22  ;;  %vm283_vm13 = vcmp.eq.s32.totalorder %v5249_v35, %v260_v22  ;;  %vm242_vm14 = vmor %vm186_vm8, %vm226_vm10 }
  0x8d   :  { %4771 = vset.pattern.permute.xlu1 %v4931_v9  ;;  %834 = vperm.xlu0 %4817, %v5244_v33   ;;  %vm243_vm15 = vmor %vm187_vm9, %vm227_vm12 }
  0x8e   :  { %433 = vperm.xlu1 %4771, %v5087_v34   ;;  %vm298_vm1 = vmor %vm242_vm14, %vm282_vm11 }
  0x8f   :  { %vm299_vm3 = vmor %vm243_vm15, %vm283_vm13 }
  0x90   :  { %v372_v27 = vpop.permute.xlu1 %371  ;;  %v5232_v28 = vpop.permute.xlu0 %819 }
  0x91   :  { %4820 = vset.pattern.permute.xlu0 %v4932_v10  ;;  %vm394_vm6 = vcmp.eq.s32.totalorder %v5237_v29, %v372_v27  ;;  %vm395_vm7 = vcmp.eq.s32.totalorder %v5249_v35, %v372_v27 }
  0x92   :  { %4773 = vset.pattern.permute.xlu1 %v4933_v15  ;;  %999 = vperm.xlu0 %4820, %v5200_v18  }
  0x93   :  { %545 = vperm.xlu1 %4773, %v5087_v34  }
  0x95   :  { %v428_v30 = vpop.permute.xlu1 %427  ;;  %v5239_v31 = vpop.permute.xlu0 %987 }
  0x96   :  { %1002 = vperm.xlu0 %4820, %v5244_v33   ;;  %vm450_vm10 = vcmp.eq.s32.totalorder %v5237_v29, %v428_v30  ;;  %vm451_vm11 = vcmp.eq.s32.totalorder %v5249_v35, %v428_v30 }
  0x97   :  { %4774 = vset.pattern.permute.xlu1 %v4934_v24 }
  0x98   :  { %601 = vperm.xlu1 %4774, %v5087_v34  }
  0x9a   :  { %v540_v36 = vpop.permute.xlu1 %539  ;;  %v5256_v37 = vpop.permute.xlu0 %150  ;;  %4823 = vset.pattern.permute.xlu0 %v4923_v1 }
  0x9b   :  { %162 = vperm.xlu0 %4823, %v5244_v33  }
  0x9c   :  { %4776 = vset.pattern.permute.xlu1 %v4936_v32 }
  0x9d   :  { %713 = vperm.xlu1 %4776, %v5087_v34  }
  0x9f   :  { %v596_v38 = vpop.permute.xlu1 %595  ;;  %v316_v39 = vpop.permute.xlu0 %315  ;;  %165 = vperm.xlu0 %4823, %v5305_v48  }
  0xa0   :  { %vm338_vm0 = vcmp.eq.s32.totalorder %v5237_v29, %v316_v39  ;;  %vm339_vm2 = vcmp.eq.s32.totalorder %v5249_v35, %v316_v39 }
  0xa1   :  { %4777 = vset.pattern.permute.xlu1 %v4937_v41  ;;  %vm354_vm4 = vmor %vm298_vm1, %vm338_vm0  ;;  %vm562_vm1 = vcmp.eq.s32.totalorder %v5237_v29, %v540_v36 }
  0xa2   :  { %769 = vperm.xlu1 %4777, %v5087_v34   ;;  %vm355_vm5 = vmor %vm299_vm3, %vm339_vm2  ;;  %vm563_vm3 = vcmp.eq.s32.totalorder %v5249_v35, %v540_v36 }
  0xa3   :  { %v5272_v40 = vpop.permute.xlu0 %318  ;;  %vm410_vm8 = vmor %vm354_vm4, %vm394_vm6  ;;  %vm618_vm6 = vcmp.eq.s32.totalorder %v5237_v29, %v596_v38  ;;  %4826 = vset.pattern.permute.xlu0 %v4935_v25 }
  0xa4   :  { %v708_v42 = vpop.permute.xlu1 %707  ;;  %vm411_vm9 = vmor %vm355_vm5, %vm395_vm7  ;;  %vm674_vm5 = vcmp.eq.s32.totalorder %v5237_v29, %v5228_v23  ;;  %330 = vperm.xlu0 %4826, %v5244_v33  }
  0xa5   :  { %vm466_vm12 = vmor %vm410_vm8, %vm450_vm10  ;;  %vm675_vm8 = vcmp.eq.s32.totalorder %v5249_v35, %v5228_v23 }
  0xa6   :  { %4778 = vset.pattern.permute.xlu1 %v4939_v49  ;;  %vm467_vm13 = vmor %vm411_vm9, %vm451_vm11  ;;  %vm619_vm9 = vcmp.eq.s32.totalorder %v5249_v35, %v596_v38 }
  0xa7   :  { %881 = vperm.xlu1 %4778, %v5087_v34   ;;  %v5279_v43 = vpop.permute.xlu0 %321 }
  0xa8   :  { %333 = vperm.xlu0 %4826, %v5305_v48  }
  0xa9   :  { %v764_v44 = vpop.permute.xlu1 %763 }
  0xab   :  { %4779 = vset.pattern.permute.xlu1 %v4940_v56 }
  0xac   :  { %937 = vperm.xlu1 %4779, %v5087_v34   ;;  %v484_v45 = vpop.permute.xlu0 %483  ;;  %4829 = vset.pattern.permute.xlu0 %v4938_v47 }
  0xad   :  { %vm506_vm14 = vcmp.eq.s32.totalorder %v5237_v29, %v484_v45  ;;  %vm507_vm15 = vcmp.eq.s32.totalorder %v5249_v35, %v484_v45  ;;  %498 = vperm.xlu0 %4829, %v5244_v33   ;;  %v1451_v45 = vld [vmem:[%s7750_s3 + $0x80] sm:$0xff] }
  0xae   :  { %vm522_vm0 = vmor %vm466_vm12, %vm506_vm14  ;;  %v876_v46 = vpop.permute.xlu1 %875  ;;  %vm730_vm14 = vcmp.eq.s32.totalorder %v5237_v29, %v708_v42 }
  0xaf   :  { %vm523_vm2 = vmor %vm467_vm13, %vm507_vm15  ;;  %vm842_vm13 = vcmp.eq.s32.totalorder %v5237_v29, %v5232_v28 }
  0xb0   :  { %vm578_vm4 = vmor %vm522_vm0, %vm562_vm1  ;;  %4780 = vset.pattern.permute.xlu1 %v4924_v2  ;;  %vm786_vm0 = vcmp.eq.s32.totalorder %v5237_v29, %v764_v44  ;;  %v5346_v57 = vpop.permute.xlu0 %486 }
  0xb1   :  { %vm579_vm7 = vmor %vm523_vm2, %vm563_vm3  ;;  %60 = vperm.xlu1 %4780, %v5177_v17   ;;  %501 = vperm.xlu0 %4829, %v5305_v48  }
  0xb2   :  { %vm634_vm10 = vmor %vm578_vm4, %vm618_vm6  ;;  %vm898_vm4 = vcmp.eq.s32.totalorder %v5237_v29, %v876_v46  ;;  %vm731_vm6 = vcmp.eq.s32.totalorder %v5249_v35, %v708_v42  ;;  %v1444_v42 = vld [vmem:[%s7750_s3 + $0x48] sm:$0xff] }
  0xb3   :  { %vm635_vm11 = vmor %vm579_vm7, %vm619_vm9  ;;  %v932_v34 = vpop.permute.xlu1 %931 }
  0xb4   :  { %vm690_vm12 = vmor %vm634_vm10, %vm674_vm5  ;;  %vm843_vm5 = vcmp.eq.s32.totalorder %v5249_v35, %v5232_v28  ;;  %v5354_v61 = vpop.permute.xlu0 %489 }
  0xb5   :  { %vm5311_vm15 = vmor %vm635_vm11, %vm675_vm8  ;;  %4781 = vset.pattern.permute.xlu1 %v4926_v4  ;;  %vm787_vm8 = vcmp.eq.s32.totalorder %v5249_v35, %v764_v44  ;;  %vm955_vm11 = vcmp.eq.s32.totalorder %v5249_v35, %v932_v34  ;;  %4834 = vset.pattern.permute.xlu0 %v4928_v6 }
  0xb6   :  { %vm746_vm1 = vmor %vm690_vm12, %vm730_vm14  ;;  %100 = vperm.xlu1 %4781, %v5177_v17   ;;  %vm899_vm12 = vcmp.eq.s32.totalorder %v5249_v35, %v876_v46  ;;  %vm1011_vm14 = vcmp.eq.s32.totalorder %v5249_v35, %v5239_v31  ;;  %669 = vperm.xlu0 %4834, %v5305_v48   ;;  %v1452_v46 = vld [vmem:[%s7750_s3 + $0x88] sm:$0xff] }
  0xb7   :  { %vm802_vm2 = vmor %vm746_vm1, %vm786_vm0  ;;  %vm954_vm0 = vcmp.eq.s32.totalorder %v5237_v29, %v932_v34  ;;  %v4187_v34 = vpack.c.bf16 %v1452_v46, %v1451_v45 }
  0xb8   :  { %vm858_vm3 = vmor %vm802_vm2, %vm842_vm13  ;;  %v55_v51 = vpop.permute.xlu1 %54 }
  0xb9   :  { %vm5323_vm7 = vmor %vm858_vm3, %vm898_vm4  ;;  %v5363_v63 = vpop.permute.xlu0 %654  ;;  %4188 = vmatprep.subr.bf16.mxu1 %v4187_v34  ;;  %v1461_v34 = vld [vmem:[%s7750_s3 + $0xd0] sm:$0xff] }
  0xba   :  { %vm747_vm9 = vmor %vm5311_vm15, %vm731_vm6  ;;  %4782 = vset.pattern.permute.xlu1 %v4925_v3  ;;  %vm1010_vm15 = vcmp.eq.s32.totalorder %v5237_v29, %v5239_v31  ;;  %4837 = vset.pattern.permute.xlu0 %v4930_v8 }
  0xbb   :  { %vm803_vm10 = vmor %vm747_vm9, %vm787_vm8  ;;  %212 = vperm.xlu1 %4782, %v5177_v17   ;;  %vm76_vm8 = vcmp.eq.s32.totalorder %v5237_v29, %v55_v51  ;;  %vm172_vm9 = vcmp.eq.s32.totalorder %v5237_v29, %v5256_v37  ;;  %837 = vperm.xlu0 %4837, %v5305_v48  }
  0xbc   :  { %vm859_vm13 = vmor %vm803_vm10, %vm843_vm5  ;;  %vm77_vm10 = vcmp.eq.s32.totalorder %v5249_v35, %v55_v51  ;;  %v1436_v51 = vld [vmem:[%s7750_s3 + $0x8] sm:$0xff] }
  0xbd   :  { %vm915_vm1 = vmor %vm859_vm13, %vm899_vm12  ;;  %v95_v53 = vpop.permute.xlu1 %94  ;;  %vm173_vm12 = vcmp.eq.s32.totalorder %v5249_v35, %v5256_v37  ;;  %v5379_v12 = vpop.permute.xlu0 %657 }
  0xbe   :  { %vm971_vm2 = vmor %vm915_vm1, %vm955_vm11  ;;  %vm116_vm6 = vcmp.eq.s32.totalorder %v5237_v29, %v95_v53 }
  0xbf   :  { %vm1027_vm3 = vmor %vm971_vm2, %vm1011_vm14  ;;  %4783 = vset.pattern.permute.xlu1 %v4927_v5  ;;  %4840 = vset.pattern.permute.xlu0 %v4932_v10 }
  0xc0   :  { %v3479_v55 = vsel %vm1027_vm3, 1.0, %v4941_v54  ;;  %vm970_vm4 = vmor %vm5323_vm7, %vm954_vm0  ;;  %268 = vperm.xlu1 %4783, %v5177_v17   ;;  %vm117_vm7 = vcmp.eq.s32.totalorder %v5249_v35, %v95_v53  ;;  %1005 = vperm.xlu0 %4840, %v5305_v48   ;;  %v4189_v53 = vpack.c.bf16 %v1436_v51, %v1435_v50  ;;  %v1462_v50 = vld [vmem:[%s7750_s3 + $0xd8] sm:$0xff]  ;;  %v1445_v51 = vld [vmem:[%s7750_s3 + $0x50] sm:$0xff] }
  0xc1   :  { %1170 = vmatprep.mubr.f32.mxu0 %v3479_v55  ;;  %vm1026_vm5 = vmor %vm970_vm4, %vm1010_vm15 }
  0xc2   :  { %v3478_v58 = vsel %vm1026_vm5, 1.0, %v4941_v54  ;;  %v207_v59 = vpop.permute.xlu1 %206  ;;  %vm132_vm11 = vmor %vm76_vm8, %vm116_vm6  ;;  %vm340_vm6 = vcmp.eq.s32.totalorder %v5237_v29, %v5272_v40  ;;  %vm341_vm8 = vcmp.eq.s32.totalorder %v5249_v35, %v5272_v40  ;;  %v823_v14 = vpop.permute.xlu0 %822  ;;  %4190 = vmatpush3.bf16.msra.mxu1 %v4189_v53  ;;  %v1443_v40 = vld [vmem:[%s7750_s3 + $0x40] sm:$0xff] }
  0xc3   :  { %1171 = vmatmul.mubr.f32.vlgmr.msra.gmra.mrb[0].mxu0 %v3478_v58  ;;  %vm133_vm13 = vmor %vm77_vm10, %vm117_vm7  ;;  %vm228_vm14 = vcmp.eq.s32.totalorder %v5237_v29, %v207_v59  ;;  %vm229_vm1 = vcmp.eq.s32.totalorder %v5249_v35, %v207_v59  ;;  %v1437_v58 = vld [vmem:[%s7750_s3 + $0x10] sm:$0xff]  ;;  %v1438_v59 = vld [vmem:[%s7750_s3 + $0x18] sm:$0xff] }
  0xc4   :  { %4784 = vset.pattern.permute.xlu1 %v4929_v7  ;;  %vm188_vm0 = vmor %vm132_vm11, %vm172_vm9  ;;  %4843 = vset.pattern.permute.xlu0 %v4923_v1  ;;  %v1463_v53 = vld [vmem:[%s7750_s3 + $0xe0] sm:$0xff] }
  0xc5   :  { %380 = vperm.xlu1 %4784, %v5177_v17   ;;  %vm189_vm15 = vmor %vm133_vm13, %vm173_vm12 }
  0xc6   :  { %vm244_vm3 = vmor %vm188_vm0, %vm228_vm14  ;;  %v5403_v1 = vpop.permute.xlu0 %825 }
  0xc7   :  { %v263_v60 = vpop.permute.xlu1 %262  ;;  %vm245_vm5 = vmor %vm189_vm15, %vm229_vm1 }
  0xc8   :  { %vm284_vm2 = vcmp.eq.s32.totalorder %v5237_v29, %v263_v60  ;;  %vm285_vm4 = vcmp.eq.s32.totalorder %v5249_v35, %v263_v60  ;;  %v4193_v60 = vpack.c.bf16 %v1438_v59, %v1437_v58  ;;  %v1447_v58 = vld [vmem:[%s7750_s3 + $0x60] sm:$0xff] }
  0xc9   :  { %4785 = vset.pattern.permute.xlu1 %v4931_v9  ;;  %vm300_vm7 = vmor %vm244_vm3, %vm284_vm2  ;;  %vm508_vm3 = vcmp.eq.s32.totalorder %v5237_v29, %v5346_v57 }
  0xca   :  { %436 = vperm.xlu1 %4785, %v5177_v17   ;;  %vm301_vm9 = vmor %vm245_vm5, %vm285_vm4  ;;  %vm509_vm5 = vcmp.eq.s32.totalorder %v5249_v35, %v5346_v57  ;;  %v5414_v20 = vpop.permute.xlu0 %828 }
  0xcb   :  { %vm356_vm11 = vmor %vm300_vm7, %vm340_vm6 }
  0xcc   :  { %v375_v62 = vpop.permute.xlu1 %374  ;;  %vm357_vm13 = vmor %vm301_vm9, %vm341_vm8 }
  0xcd   :  { %vm396_vm10 = vcmp.eq.s32.totalorder %v5237_v29, %v375_v62  ;;  %vm397_vm12 = vcmp.eq.s32.totalorder %v5249_v35, %v375_v62 }
  0xce   :  { %4786 = vset.pattern.permute.xlu1 %v4933_v15  ;;  %vm412_vm0 = vmor %vm356_vm11, %vm396_vm10 }
  0xcf   :  { %548 = vperm.xlu1 %4786, %v5177_v17   ;;  %vm413_vm15 = vmor %vm357_vm13, %vm397_vm12  ;;  %v991_v22 = vpop.permute.xlu0 %990 }
  0xd1   :  { %v431_v0 = vpop.permute.xlu1 %430 }
  0xd2   :  { %vm452_vm14 = vcmp.eq.s32.totalorder %v5237_v29, %v431_v0  ;;  %vm453_vm1 = vcmp.eq.s32.totalorder %v5249_v35, %v431_v0 }
  0xd3   :  { %4787 = vset.pattern.permute.xlu1 %v4934_v24  ;;  %vm468_vm2 = vmor %vm412_vm0, %vm452_vm14  ;;  %vm676_vm14 = vcmp.eq.s32.totalorder %v5237_v29, %v5363_v63  ;;  %v5432_v23 = vpop.permute.xlu0 %993 }
  0xd4   :  { %604 = vperm.xlu1 %4787, %v5177_v17   ;;  %vm469_vm4 = vmor %vm413_vm15, %vm453_vm1  ;;  %vm677_vm1 = vcmp.eq.s32.totalorder %v5249_v35, %v5363_v63  ;;  %v1456_v63 = vld [vmem:[%s7750_s3 + $0xa8] sm:$0xff] }
  0xd5   :  { %vm524_vm7 = vmor %vm468_vm2, %vm508_vm3 }
  0xd6   :  { %v543_v13 = vpop.permute.xlu1 %542  ;;  %vm525_vm9 = vmor %vm469_vm4, %vm509_vm5 }
  0xd7   :  { %vm564_vm6 = vcmp.eq.s32.totalorder %v5237_v29, %v543_v13  ;;  %vm565_vm8 = vcmp.eq.s32.totalorder %v5249_v35, %v543_v13  ;;  %v5438_v31 = vpop.permute.xlu0 %996  ;;  %v1439_v13 = vld [vmem:[%s7750_s3 + $0x20] sm:$0xff] }
  0xd8   :  { %4788 = vset.pattern.permute.xlu1 %v4936_v32  ;;  %vm580_vm11 = vmor %vm524_vm7, %vm564_vm6 }
  0xd9   :  { %716 = vperm.xlu1 %4788, %v5177_v17   ;;  %vm581_vm13 = vmor %vm525_vm9, %vm565_vm8 }
  0xdb   :  { %v599_v16 = vpop.permute.xlu1 %598 }
  0xdc   :  { %vm620_vm10 = vcmp.eq.s32.totalorder %v5237_v29, %v599_v16  ;;  %vm621_vm12 = vcmp.eq.s32.totalorder %v5249_v35, %v599_v16  ;;  %v154_v37 = vpop.permute.xlu0 %153 }
  0xdd   :  { %4789 = vset.pattern.permute.xlu1 %v4937_v41  ;;  %vm636_vm0 = vmor %vm580_vm11, %vm620_vm10  ;;  %vm844_vm10 = vcmp.eq.s32.totalorder %v5237_v29, %v823_v14 }
  0xde   :  { %772 = vperm.xlu1 %4789, %v5177_v17   ;;  %vm637_vm15 = vmor %vm581_vm13, %vm621_vm12  ;;  %vm845_vm12 = vcmp.eq.s32.totalorder %v5249_v35, %v823_v14  ;;  %v1440_v14 = vld [vmem:[%s7750_s3 + $0x28] sm:$0xff] }
  0xdf   :  { %vm692_vm3 = vmor %vm636_vm0, %vm676_vm14 }
  0xe0   :  { %v711_v11 = vpop.permute.xlu1 %710  ;;  %vm693_vm5 = vmor %vm637_vm15, %vm677_vm1 }
  0xe1   :  { %vm732_vm2 = vcmp.eq.s32.totalorder %v5237_v29, %v711_v11  ;;  %vm733_vm4 = vcmp.eq.s32.totalorder %v5249_v35, %v711_v11  ;;  %v4197_v11 = vpack.c.bf16 %v1440_v14, %v1439_v13 }
  0xe2   :  { %4791 = vset.pattern.permute.xlu1 %v4939_v49  ;;  %vm748_vm7 = vmor %vm692_vm3, %vm732_vm2  ;;  %vm1013_vm3 = vcmp.eq.s32.totalorder %v5249_v35, %v991_v22 }
  0xe3   :  { %884 = vperm.xlu1 %4791, %v5177_v17   ;;  %vm749_vm9 = vmor %vm693_vm5, %vm733_vm4 }
  0xe5   :  { %v767_v19 = vpop.permute.xlu1 %766 }
  0xe6   :  { %vm788_vm6 = vcmp.eq.s32.totalorder %v5237_v29, %v767_v19  ;;  %vm789_vm8 = vcmp.eq.s32.totalorder %v5249_v35, %v767_v19  ;;  %v1457_v19 = vld [vmem:[%s7750_s3 + $0xb0] sm:$0xff] }
  0xe7   :  { %4792 = vset.pattern.permute.xlu1 %v4940_v56  ;;  %vm804_vm11 = vmor %vm748_vm7, %vm788_vm6  ;;  %vm1012_vm7 = vcmp.eq.s32.totalorder %v5237_v29, %v991_v22 }
  0xe8   :  { %940 = vperm.xlu1 %4792, %v5177_v17   ;;  %vm805_vm13 = vmor %vm749_vm9, %vm789_vm8 }
  0xe9   :  { %vm860_vm0 = vmor %vm804_vm11, %vm844_vm10 }
  0xea   :  { %v879_v21 = vpop.permute.xlu1 %878  ;;  %vm861_vm15 = vmor %vm805_vm13, %vm845_vm12 }
  0xeb   :  { %vm900_vm14 = vcmp.eq.s32.totalorder %v5237_v29, %v879_v21  ;;  %vm901_vm1 = vcmp.eq.s32.totalorder %v5249_v35, %v879_v21  ;;  %v1458_v21 = vld [vmem:[%s7750_s3 + $0xb8] sm:$0xff] }
  0xec   :  { %4794 = vset.pattern.permute.xlu1 %v4924_v2  ;;  %vm916_vm2 = vmor %vm860_vm0, %vm900_vm14  ;;  %v4199_v22 = vpack.c.bf16 %v1458_v21, %v1457_v19  ;;  %v1450_v19 = vld [vmem:[%s7750_s3 + $0x78] sm:$0xff] }
  0xed   :  { %63 = vperm.xlu1 %4794, %v5200_v18   ;;  %vm917_vm4 = vmor %vm861_vm15, %vm901_vm1  ;;  %vm174_vm15 = vcmp.eq.s32.totalorder %v5237_v29, %v154_v37 }
  0xef   :  { %v935_v17 = vpop.permute.xlu1 %934 }
  0xf0   :  { %vm956_vm5 = vcmp.eq.s32.totalorder %v5237_v29, %v935_v17  ;;  %vm957_vm6 = vcmp.eq.s32.totalorder %v5249_v35, %v935_v17  ;;  %v1441_v17 = vld [vmem:[%s7750_s3 + $0x30] sm:$0xff] }
  0xf1   :  { %4795 = vset.pattern.permute.xlu1 %v4926_v4  ;;  %vm973_vm8 = vmor %vm917_vm4, %vm957_vm6 }
  0xf2   :  { %103 = vperm.xlu1 %4795, %v5200_v18   ;;  %vm1029_vm9 = vmor %vm973_vm8, %vm1013_vm3  ;;  %vm175_vm3 = vcmp.eq.s32.totalorder %v5249_v35, %v154_v37 }
  0xf3   :  { %v3481_v27 = vsel %vm1029_vm9, 1.0, %v4941_v54  ;;  %vm972_vm10 = vmor %vm916_vm2, %vm956_vm5 }
  0xf4   :  { %v58_v28 = vpop.permute.xlu1 %57  ;;  %1175 = vmatprep.mubr.f32.mxu0 %v3481_v27  ;;  %vm1028_vm11 = vmor %vm972_vm10, %vm1012_vm7  ;;  %v1442_v27 = vld [vmem:[%s7750_s3 + $0x38] sm:$0xff] }
  0xf5   :  { %v3480_v30 = vsel %vm1028_vm11, 1.0, %v4941_v54  ;;  %vm78_vm14 = vcmp.eq.s32.totalorder %v5237_v29, %v58_v28  ;;  %vm79_vm0 = vcmp.eq.s32.totalorder %v5249_v35, %v58_v28 }
  0xf6   :  { %1176 = vmatmul.mubr.f32.gmra.mrb[2].mxu0 %v3480_v30  ;;  %4797 = vset.pattern.permute.xlu1 %v4925_v3  ;;  %v4201_v30 = vpack.c.bf16 %v1442_v27, %v1441_v17 }
  0xf7   :  { %215 = vperm.xlu1 %4797, %v5200_v18  }
  0xf9   :  { %v98_v36 = vpop.permute.xlu1 %97 }
  0xfa   :  { %vm118_vm12 = vcmp.eq.s32.totalorder %v5237_v29, %v98_v36  ;;  %vm119_vm13 = vcmp.eq.s32.totalorder %v5249_v35, %v98_v36 }
  0xfb   :  { %4798 = vset.pattern.permute.xlu1 %v4927_v5  ;;  %vm134_vm1 = vmor %vm78_vm14, %vm118_vm12 }
  0xfc   :  { %271 = vperm.xlu1 %4798, %v5200_v18   ;;  %vm135_vm2 = vmor %vm79_vm0, %vm119_vm13  ;;  %vm342_vm13 = vcmp.eq.s32.totalorder %v5237_v29, %v5279_v43  ;;  %vm343_vm0 = vcmp.eq.s32.totalorder %v5249_v35, %v5279_v43  ;;  %v1454_v43 = vld [vmem:[%s7750_s3 + $0x98] sm:$0xff] }
  0xfd   :  { %vm190_vm5 = vmor %vm134_vm1, %vm174_vm15  ;;  %v4191_v55 = vpack.c.bf16 %v1454_v43, %v1453_v52  ;;  %v1446_v52 = vld [vmem:[%s7750_s3 + $0x58] sm:$0xff]  ;;  %v4207_v43 = vpack.c.bf16 %v1462_v50, %v1461_v34 }
  0xfe   :  { %v210_v38 = vpop.permute.xlu1 %209  ;;  %vm191_vm7 = vmor %vm135_vm2, %vm175_vm3 }
  0xff   :  { %vm230_vm4 = vcmp.eq.s32.totalorder %v5237_v29, %v210_v38  ;;  %vm231_vm6 = vcmp.eq.s32.totalorder %v5249_v35, %v210_v38  ;;  %4192 = vmatprep.subr.bf16.mxu1 %v4191_v55  ;;  %v1459_v38 = vld [vmem:[%s7750_s3 + $0xc0] sm:$0xff]  ;;  %v4209_v55 = vpack.c.bf16 %v1446_v52, %v1445_v51 }
 0x100   :  { %4800 = vset.pattern.permute.xlu1 %v4929_v7  ;;  %vm246_vm9 = vmor %vm190_vm5, %vm230_vm4  ;;  %vm510_vm5 = vcmp.eq.s32.totalorder %v5237_v29, %v5354_v61  ;;  %4194 = vmatpush3.bf16.msra.mxu1 %v4193_v60  ;;  %v1448_v60 = vld [vmem:[%s7750_s3 + $0x68] sm:$0xff] }
 0x101   :  { %383 = vperm.xlu1 %4800, %v5200_v18   ;;  %vm247_vm11 = vmor %vm191_vm7, %vm231_vm6  ;;  %v4213_v14 = vpack.c.bf16 %v1448_v60, %v1447_v58  ;;  %v4872_v60 = vld [vmem:[%s7747_s0 + $0x30] sm:$0xff] }
 0x103   :  { %v266_v39 = vpop.permute.xlu1 %265 }
 0x104   :  { %vm286_vm8 = vcmp.eq.s32.totalorder %v5237_v29, %v266_v39  ;;  %vm287_vm10 = vcmp.eq.s32.totalorder %v5249_v35, %v266_v39 }
 0x105   :  { %4801 = vset.pattern.permute.xlu1 %v4931_v9  ;;  %vm5457_vm12 = vmor %vm246_vm9, %vm286_vm8  ;;  %vm511_vm9 = vcmp.eq.s32.totalorder %v5249_v35, %v5354_v61  ;;  %v1455_v61 = vld [vmem:[%s7750_s3 + $0xa0] sm:$0xff] }
 0x106   :  { %439 = vperm.xlu1 %4801, %v5200_v18   ;;  %vm5463_vm14 = vmor %vm247_vm11, %vm287_vm10  ;;  %v4195_v0 = vpack.c.bf16 %v1456_v63, %v1455_v61  ;;  %v1466_v63 = vld [vmem:[%s7750_s3 + $0xf8] sm:$0xff] }
 0x107   :  { %vm358_vm15 = vmor %vm5457_vm12, %vm342_vm13 }
 0x108   :  { %v378_v44 = vpop.permute.xlu1 %377  ;;  %vm359_vm3 = vmor %vm5463_vm14, %vm343_vm0  ;;  %4196 = vmatprep.subr.bf16.mxu1 %v4195_v0 }
 0x109   :  { %vm398_vm1 = vcmp.eq.s32.totalorder %v5237_v29, %v378_v44  ;;  %vm399_vm2 = vcmp.eq.s32.totalorder %v5249_v35, %v378_v44  ;;  %4198 = vmatpush3.bf16.msra.mxu1 %v4197_v11  ;;  %v4205_v44 = vpack.c.bf16 %v1444_v42, %v1443_v40  ;;  %v1449_v11 = vld [vmem:[%s7750_s3 + $0x70] sm:$0xff] }
 0x10a   :  { %4803 = vset.pattern.permute.xlu1 %v4933_v15  ;;  %vm414_vm4 = vmor %vm358_vm15, %vm398_vm1  ;;  %vm678_vm15 = vcmp.eq.s32.totalorder %v5237_v29, %v5379_v12  ;;  %4200 = vmatprep.subr.bf16.mxu1 %v4199_v22 }
 0x10b   :  { %551 = vperm.xlu1 %4803, %v5200_v18   ;;  %vm415_vm6 = vmor %vm359_vm3, %vm399_vm2 }
 0x10d   :  { %v434_v57 = vpop.permute.xlu1 %433  ;;  %4202 = vmatpush3.bf16.msra.mxu1 %v4201_v30  ;;  %v1515_v30 = vld [vmem:[%s7750_s3 + $0x280] sm:$0xff] }
 0x10e   :  { %vm454_vm7 = vcmp.eq.s32.totalorder %v5237_v29, %v434_v57  ;;  %vm455_vm8 = vcmp.eq.s32.totalorder %v5249_v35, %v434_v57  ;;  %v1464_v57 = vld [vmem:[%s7750_s3 + $0xe8] sm:$0xff] }
 0x10f   :  { %vm470_vm10 = vmor %vm414_vm4, %vm454_vm7  ;;  %4804 = vset.pattern.permute.xlu1 %v4934_v24  ;;  %v4211_v59 = vpack.c.bf16 %v1464_v57, %v1463_v53  ;;  %v1504_v57 = vld [vmem:[%s7750_s3 + $0x228] sm:$0xff] }
 0x110   :  { %vm471_vm11 = vmor %vm415_vm6, %vm455_vm8  ;;  %607 = vperm.xlu1 %4804, %v5200_v18  }
 0x111   :  { %vm526_vm12 = vmor %vm470_vm10, %vm510_vm5  ;;  %vm679_vm5 = vcmp.eq.s32.totalorder %v5249_v35, %v5379_v12  ;;  %v1460_v12 = vld [vmem:[%s7750_s3 + $0xc8] sm:$0xff] }
 0x112   :  { %v546_v62 = vpop.permute.xlu1 %545  ;;  %vm527_vm13 = vmor %vm471_vm11, %vm511_vm9  ;;  %v4203_v39 = vpack.c.bf16 %v1460_v12, %v1459_v38 }
 0x113   :  { %vm566_vm14 = vcmp.eq.s32.totalorder %v5237_v29, %v546_v62  ;;  %vm567_vm0 = vcmp.eq.s32.totalorder %v5249_v35, %v546_v62  ;;  %v5617_v62 = vld [vmem:[%s7747_s0 + $0x38] sm:$0xff] }
 0x114   :  { %4805 = vset.pattern.permute.xlu1 %v4936_v32  ;;  %vm582_vm1 = vmor %vm526_vm12, %vm566_vm14  ;;  %4204 = vmatprep.subr.bf16.mxu1 %v4203_v39  ;;  %vm846_vm14 = vcmp.eq.s32.totalorder %v5237_v29, %v5403_v1 }
 0x115   :  { %719 = vperm.xlu1 %4805, %v5200_v18   ;;  %vm583_vm2 = vmor %vm527_vm13, %vm567_vm0  ;;  %4206 = vmatpush3.bf16.msra.mxu1 %v4205_v44 }
 0x116   :  { %4208 = vmatprep.subr.bf16.mxu1 %v4207_v43  ;;  %168 = vperm.xlu0 %4843, %v5617_v62  }
 0x117   :  { %v602_v16 = vpop.permute.xlu1 %601 }
 0x118   :  { %vm622_vm3 = vcmp.eq.s32.totalorder %v5237_v29, %v602_v16  ;;  %vm623_vm4 = vcmp.eq.s32.totalorder %v5249_v35, %v602_v16 }
 0x119   :  { %vm638_vm6 = vmor %vm582_vm1, %vm622_vm3  ;;  %4806 = vset.pattern.permute.xlu1 %v4937_v41  ;;  %4210 = vmatpush3.bf16.msra.mxu1 %v4209_v55 }
 0x11a   :  { %vm639_vm7 = vmor %vm583_vm2, %vm623_vm4  ;;  %775 = vperm.xlu1 %4806, %v5200_v18   ;;  %4212 = vmatprep.subr.bf16.mxu1 %v4211_v59  ;;  %v1522_v59 = vld [vmem:[%s7750_s3 + $0x2b8] sm:$0xff] }
 0x11b   :  { %vm5548_vm8 = vmor %vm638_vm6, %vm678_vm15  ;;  %vm847_vm15 = vcmp.eq.s32.totalorder %v5249_v35, %v5403_v1  ;;  %4846 = vset.pattern.permute.xlu0 %v4935_v25  ;;  %v4217_v1 = vpack.c.bf16 %v1450_v19, %v1449_v11  ;;  %v5809_v11 = vshrl.u32 %v39_v26, 7 }
 0x11c   :  { %v714_v36 = vpop.permute.xlu1 %713  ;;  %vm5552_vm9 = vmor %vm639_vm7, %vm679_vm5  ;;  %336 = vperm.xlu0 %4846, %v5617_v62  }
 0x11d   :  { %vm734_vm10 = vcmp.eq.s32.totalorder %v5237_v29, %v714_v36  ;;  %vm735_vm11 = vcmp.eq.s32.totalorder %v5249_v35, %v714_v36  ;;  %4214 = vmatpush3.bf16.msra.mxu1 %v4213_v14 }
 0x11e   :  { %4807 = vset.pattern.permute.xlu1 %v4939_v49  ;;  %vm750_vm12 = vmor %vm5548_vm8, %vm734_vm10  ;;  %vm1015_vm8 = vcmp.eq.s32.totalorder %v5249_v35, %v5432_v23 }
 0x11f   :  { %887 = vperm.xlu1 %4807, %v5200_v18   ;;  %vm5576_vm13 = vmor %vm5552_vm9, %vm735_vm11 }
 0x120   :  { %4849 = vset.pattern.permute.xlu0 %v4938_v47  ;;  %v157_v47 = vpop.permute.xlu0 %156 }
 0x121   :  { %v770_v46 = vpop.permute.xlu1 %769  ;;  %504 = vperm.xlu0 %4849, %v5617_v62  }
 0x122   :  { %vm790_vm0 = vcmp.eq.s32.totalorder %v5237_v29, %v770_v46  ;;  %vm791_vm1 = vcmp.eq.s32.totalorder %v5249_v35, %v770_v46 }
 0x123   :  { %vm806_vm2 = vmor %vm750_vm12, %vm790_vm0  ;;  %4808 = vset.pattern.permute.xlu1 %v4940_v56 }
 0x124   :  { %vm807_vm3 = vmor %vm5576_vm13, %vm791_vm1  ;;  %943 = vperm.xlu1 %4808, %v5200_v18   ;;  %v1465_v18 = vld [vmem:[%s7750_s3 + $0xf0] sm:$0xff]  ;;  %vm1014_vm13 = vcmp.eq.s32.totalorder %v5237_v29, %v5432_v23  ;;  %v5678_v28 = vpop.permute.xlu0 %159 }
 0x125   :  { %vm5622_vm4 = vmor %vm806_vm2, %vm846_vm14  ;;  %v4215_v16 = vpack.c.bf16 %v1466_v63, %v1465_v18  ;;  %4852 = vset.pattern.permute.xlu0 %v4928_v6 }
 0x126   :  { %v882_v0 = vpop.permute.xlu1 %881  ;;  %vm5636_vm5 = vmor %vm807_vm3, %vm847_vm15  ;;  %672 = vperm.xlu0 %4852, %v5617_v62  }
 0x127   :  { %vm902_vm6 = vcmp.eq.s32.totalorder %v5237_v29, %v882_v0  ;;  %vm903_vm7 = vcmp.eq.s32.totalorder %v5249_v35, %v882_v0  ;;  %4216 = vmatprep.subr.bf16.mxu1 %v4215_v16  ;;  %v4942_v0 = vmov 1983009808  }
 0x128   :  { %4809 = vset.pattern.permute.xlu1 %v4924_v2  ;;  %vm918_vm9 = vmor %vm5622_vm4, %vm902_vm6  ;;  %4218 = vmatpush3.bf16.msra.mxu1 %v4217_v1  ;;  %v1230_v13 = vunpack.c.l.s4 %v4942_v0  ;;  %v1523_v0 = vld [vmem:[%s7750_s3 + $0x2c0] sm:$0xff] }
 0x129   :  { %66 = vperm.xlu1 %4809, %v5244_v33   ;;  %vm919_vm10 = vmor %vm5636_vm5, %vm903_vm7  ;;  %vm176_vm7 = vcmp.eq.s32.totalorder %v5237_v29, %v157_v47 }
 0x12a   :  { %4855 = vset.pattern.permute.xlu0 %v4930_v8  ;;  %v1516_v8 = vld [vmem:[%s7750_s3 + $0x288] sm:$0xff]  ;;  %v1231_v16 = vunpack.c.0.s8 %v1230_v13 }
 0x12b   :  { %v938_v21 = vpop.permute.xlu1 %937  ;;  %840 = vperm.xlu0 %4855, %v5617_v62   ;;  %v4251_v36 = vpack.c.bf16 %v1516_v8, %v1515_v30 }
 0x12c   :  { %vm958_vm11 = vcmp.eq.s32.totalorder %v5237_v29, %v938_v21  ;;  %vm959_vm12 = vcmp.eq.s32.totalorder %v5249_v35, %v938_v21 }
 0x12d   :  { %4810 = vset.pattern.permute.xlu1 %v4926_v4  ;;  %vm975_vm14 = vmor %vm919_vm10, %vm959_vm12  ;;  %4252 = vmatprep.subr.bf16.mxu1 %v4251_v36 }
 0x12e   :  { %106 = vperm.xlu1 %4810, %v5244_v33   ;;  %vm1031_vm0 = vmor %vm975_vm14, %vm1015_vm8 }
 0x12f   :  { %v3483_v25 = vsel %vm1031_vm0, 1.0, %v4941_v54  ;;  %vm974_vm1 = vmor %vm918_vm9, %vm958_vm11  ;;  %4858 = vset.pattern.permute.xlu0 %v4932_v10  ;;  %v325_v10 = vpop.permute.xlu0 %324  ;;  %vm177_vm9 = vcmp.eq.s32.totalorder %v5249_v35, %v157_v47 }
 0x130   :  { %v61_v22 = vpop.permute.xlu1 %60  ;;  %1180 = vmatprep.mubr.f32.mxu0 %v3483_v25  ;;  %vm1030_vm15 = vmor %vm974_vm1, %vm1014_vm13  ;;  %1008 = vperm.xlu0 %4858, %v5617_v62   ;;  %v1211_v25 = vld [vmem:[%s7748_s1] sm:$0xff] }
 0x131   :  { %v3482_v17 = vsel %vm1030_vm15, 1.0, %v4941_v54  ;;  %vm80_vm4 = vcmp.eq.s32.totalorder %v5237_v29, %v61_v22  ;;  %vm81_vm5 = vcmp.eq.s32.totalorder %v5249_v35, %v61_v22 }
 0x132   :  { %1181 = vmatmul.mubr.f32.gmra.mrb[4].mxu0 %v3482_v17  ;;  %4811 = vset.pattern.permute.xlu1 %v4925_v3  ;;  %v5819_v17 = vsub.s32 %v1231_v16, %v5809_v11 }
 0x133   :  { %218 = vperm.xlu1 %4811, %v5244_v33   ;;  %v5699_v38 = vpop.permute.xlu0 %327 }
 0x135   :  { %v101_v23 = vpop.permute.xlu1 %100 }
 0x136   :  { %vm120_vm2 = vcmp.eq.s32.totalorder %v5237_v29, %v101_v23  ;;  %vm121_vm3 = vcmp.eq.s32.totalorder %v5249_v35, %v101_v23 }
 0x137   :  { %4812 = vset.pattern.permute.xlu1 %v4927_v5  ;;  %vm136_vm6 = vmor %vm80_vm4, %vm120_vm2  ;;  %v493_v39 = vpop.permute.xlu0 %492 }
 0x138   :  { %274 = vperm.xlu1 %4812, %v5244_v33   ;;  %vm137_vm8 = vmor %vm81_vm5, %vm121_vm3  ;;  %vm344_vm3 = vcmp.eq.s32.totalorder %v5237_v29, %v325_v10  ;;  %vm345_vm5 = vcmp.eq.s32.totalorder %v5249_v35, %v325_v10 }
 0x139   :  { %vm192_vm11 = vmor %vm136_vm6, %vm176_vm7 }
 0x13a   :  { %v213_v27 = vpop.permute.xlu1 %212  ;;  %vm193_vm13 = vmor %vm137_vm8, %vm177_vm9 }
 0x13b   :  { %vm232_vm10 = vcmp.eq.s32.totalorder %v5237_v29, %v213_v27  ;;  %vm233_vm12 = vcmp.eq.s32.totalorder %v5249_v35, %v213_v27  ;;  %v5714_v42 = vpop.permute.xlu0 %495 }
 0x13c   :  { %4813 = vset.pattern.permute.xlu1 %v4929_v7  ;;  %vm248_vm0 = vmor %vm192_vm11, %vm232_vm10 }
 0x13d   :  { %386 = vperm.xlu1 %4813, %v5244_v33   ;;  %vm249_vm15 = vmor %vm193_vm13, %vm233_vm12 }
 0x13f   :  { %v269_v6 = vpop.permute.xlu1 %268  ;;  %v661_v45 = vpop.permute.xlu0 %660 }
 0x140   :  { %vm288_vm14 = vcmp.eq.s32.totalorder %v5237_v29, %v269_v6  ;;  %vm289_vm1 = vcmp.eq.s32.totalorder %v5249_v35, %v269_v6 }
 0x141   :  { %4814 = vset.pattern.permute.xlu1 %v4931_v9  ;;  %vm304_vm2 = vmor %vm248_vm0, %vm288_vm14  ;;  %vm512_vm0 = vcmp.eq.s32.totalorder %v5237_v29, %v493_v39 }
 0x142   :  { %442 = vperm.xlu1 %4814, %v5244_v33   ;;  %vm305_vm4 = vmor %vm249_vm15, %vm289_vm1  ;;  %vm513_vm15 = vcmp.eq.s32.totalorder %v5249_v35, %v493_v39 }
 0x143   :  { %vm360_vm7 = vmor %vm304_vm2, %vm344_vm3  ;;  %v664_v18 = vpop.permute.xlu0 %663 }
 0x144   :  { %v381_v37 = vpop.permute.xlu1 %380  ;;  %vm361_vm9 = vmor %vm305_vm4, %vm345_vm5 }
 0x145   :  { %vm400_vm6 = vcmp.eq.s32.totalorder %v5237_v29, %v381_v37  ;;  %vm401_vm8 = vcmp.eq.s32.totalorder %v5249_v35, %v381_v37 }
 0x146   :  { %4815 = vset.pattern.permute.xlu1 %v4933_v15  ;;  %vm416_vm11 = vmor %vm360_vm7, %vm400_vm6 }
 0x147   :  { %554 = vperm.xlu1 %4815, %v5244_v33   ;;  %vm417_vm13 = vmor %vm361_vm9, %vm401_vm8  ;;  %v5804_v14 = vpop.permute.xlu0 %666 }
 0x149   :  { %v437_v12 = vpop.permute.xlu1 %436 }
 0x14a   :  { %vm456_vm10 = vcmp.eq.s32.totalorder %v5237_v29, %v437_v12  ;;  %vm457_vm12 = vcmp.eq.s32.totalorder %v5249_v35, %v437_v12 }
 0x14b   :  { %4816 = vset.pattern.permute.xlu1 %v4934_v24  ;;  %vm472_vm14 = vmor %vm416_vm11, %vm456_vm10  ;;  %vm680_vm11 = vcmp.eq.s32.totalorder %v5237_v29, %v661_v45  ;;  %v832_v26 = vpop.permute.xlu0 %831 }
 0x14c   :  { %610 = vperm.xlu1 %4816, %v5244_v33   ;;  %vm473_vm1 = vmor %vm417_vm13, %vm457_vm12  ;;  %vm681_vm13 = vcmp.eq.s32.totalorder %v5249_v35, %v661_v45  ;;  %v1518_v45 = vld [vmem:[%s7750_s3 + $0x298] sm:$0xff] }
 0x14d   :  { %vm528_vm3 = vmor %vm472_vm14, %vm512_vm0 }
 0x14e   :  { %v549_v40 = vpop.permute.xlu1 %548  ;;  %vm529_vm5 = vmor %vm473_vm1, %vm513_vm15 }
 0x14f   :  { %vm568_vm2 = vcmp.eq.s32.totalorder %v5237_v29, %v549_v40  ;;  %vm569_vm4 = vcmp.eq.s32.totalorder %v5249_v35, %v549_v40  ;;  %v5826_v27 = vpop.permute.xlu0 %834 }
 0x150   :  { %4818 = vset.pattern.permute.xlu1 %v4936_v32  ;;  %vm584_vm7 = vmor %vm528_vm3, %vm568_vm2 }
 0x151   :  { %722 = vperm.xlu1 %4818, %v5244_v33   ;;  %vm585_vm9 = vmor %vm529_vm5, %vm569_vm4 }
 0x153   :  { %v605_v44 = vpop.permute.xlu1 %604  ;;  %v1000_v37 = vpop.permute.xlu0 %999 }
 0x154   :  { %vm624_vm6 = vcmp.eq.s32.totalorder %v5237_v29, %v605_v44  ;;  %vm625_vm8 = vcmp.eq.s32.totalorder %v5249_v35, %v605_v44  ;;  %v1517_v44 = vld [vmem:[%s7750_s3 + $0x290] sm:$0xff] }
 0x155   :  { %4819 = vset.pattern.permute.xlu1 %v4937_v41  ;;  %vm640_vm10 = vmor %vm584_vm7, %vm624_vm6  ;;  %vm848_vm6 = vcmp.eq.s32.totalorder %v5237_v29, %v5414_v20 }
 0x156   :  { %778 = vperm.xlu1 %4819, %v5244_v33   ;;  %v4871_v33 = vld [vmem:[%s7747_s0 + $0x28] sm:$0xff]  ;;  %vm641_vm12 = vmor %vm585_vm9, %vm625_vm8  ;;  %vm849_vm8 = vcmp.eq.s32.totalorder %v5249_v35, %v5414_v20 }
 0x157   :  { %vm696_vm0 = vmor %vm640_vm10, %vm680_vm11 }
 0x158   :  { %v717_v46 = vpop.permute.xlu1 %716  ;;  %vm697_vm15 = vmor %vm641_vm12, %vm681_vm13 }
 0x159   :  { %vm736_vm14 = vcmp.eq.s32.totalorder %v5237_v29, %v717_v46  ;;  %vm737_vm1 = vcmp.eq.s32.totalorder %v5249_v35, %v717_v46 }
 0x15a   :  { %4821 = vset.pattern.permute.xlu1 %v4939_v49  ;;  %vm752_vm3 = vmor %vm696_vm0, %vm736_vm14  ;;  %vm1017_vm0 = vcmp.eq.s32.totalorder %v5249_v35, %v5438_v31 }
 0x15b   :  { %890 = vperm.xlu1 %4821, %v4871_v33   ;;  %vm753_vm5 = vmor %vm697_vm15, %vm737_vm1 }
 0x15d   :  { %v773_v34 = vpop.permute.xlu1 %772 }
 0x15e   :  { %vm792_vm2 = vcmp.eq.s32.totalorder %v5237_v29, %v773_v34  ;;  %vm793_vm4 = vcmp.eq.s32.totalorder %v5249_v35, %v773_v34 }
 0x15f   :  { %4822 = vset.pattern.permute.xlu1 %v4940_v56  ;;  %vm808_vm7 = vmor %vm752_vm3, %vm792_vm2  ;;  %vm1016_vm3 = vcmp.eq.s32.totalorder %v5237_v29, %v5438_v31 }
 0x160   :  { %946 = vperm.xlu1 %4822, %v4871_v33   ;;  %vm809_vm9 = vmor %vm753_vm5, %vm793_vm4 }
 0x161   :  { %vm864_vm12 = vmor %vm808_vm7, %vm848_vm6 }
 0x162   :  { %v885_v50 = vpop.permute.xlu1 %884  ;;  %vm865_vm13 = vmor %vm809_vm9, %vm849_vm8 }
 0x163   :  { %vm904_vm10 = vcmp.eq.s32.totalorder %v5237_v29, %v885_v50  ;;  %vm905_vm11 = vcmp.eq.s32.totalorder %v5249_v35, %v885_v50  ;;  %v4255_v50 = vpack.c.bf16 %v1518_v45, %v1517_v44 }
 0x164   :  { %4824 = vset.pattern.permute.xlu1 %v4924_v2  ;;  %vm920_vm14 = vmor %vm864_vm12, %vm904_vm10 }
 0x165   :  { %69 = vperm.xlu1 %4824, %v5305_v48   ;;  %vm921_vm1 = vmor %vm865_vm13, %vm905_vm11  ;;  %vm178_vm11 = vcmp.eq.s32.totalorder %v5237_v29, %v5678_v28 }
 0x167   :  { %v941_v51 = vpop.permute.xlu1 %940 }
 0x168   :  { %vm960_vm15 = vcmp.eq.s32.totalorder %v5237_v29, %v941_v51  ;;  %vm961_vm2 = vcmp.eq.s32.totalorder %v5249_v35, %v941_v51  ;;  %v1501_v51 = vld [vmem:[%s7750_s3 + $0x210] sm:$0xff] }
 0x169   :  { %vm976_vm4 = vmor %vm920_vm14, %vm960_vm15  ;;  %4825 = vset.pattern.permute.xlu1 %v4926_v4  ;;  %vm179_vm14 = vcmp.eq.s32.totalorder %v5249_v35, %v5678_v28 }
 0x16a   :  { %vm977_vm5 = vmor %vm921_vm1, %vm961_vm2  ;;  %109 = vperm.xlu1 %4825, %v5305_v48  }
 0x16b   :  { %vm1033_vm6 = vmor %vm977_vm5, %vm1017_vm0  ;;  %vm346_vm5 = vcmp.eq.s32.totalorder %v5237_v29, %v5699_v38 }
 0x16c   :  { %v64_v20 = vpop.permute.xlu1 %63  ;;  %v3485_v52 = vsel %vm1033_vm6, 1.0, %v4941_v54  ;;  %vm1032_vm7 = vmor %vm976_vm4, %vm1016_vm3 }
 0x16d   :  { %1185 = vmatprep.mubr.f32.mxu0 %v3485_v52  ;;  %v3484_v53 = vsel %vm1032_vm7, 1.0, %v4941_v54  ;;  %vm82_vm10 = vcmp.eq.s32.totalorder %v5237_v29, %v64_v20  ;;  %vm83_vm12 = vcmp.eq.s32.totalorder %v5249_v35, %v64_v20  ;;  %v5867_v20 = vpop.permute.xlu0 %1002  ;;  %v1519_v52 = vld [vmem:[%s7750_s3 + $0x2a0] sm:$0xff] }
 0x16e   :  { %1186 = vmatmul.mubr.f32.gmra.mrb[6].mxu0 %v3484_v53  ;;  %4827 = vset.pattern.permute.xlu1 %v4925_v3  ;;  %v1520_v53 = vld [vmem:[%s7750_s3 + $0x2a8] sm:$0xff] }
 0x16f   :  { %221 = vperm.xlu1 %4827, %v5305_v48  }
 0x171   :  { %v104_v31 = vpop.permute.xlu1 %103 }
 0x172   :  { %vm122_vm8 = vcmp.eq.s32.totalorder %v5237_v29, %v104_v31  ;;  %vm123_vm9 = vcmp.eq.s32.totalorder %v5249_v35, %v104_v31 }
 0x173   :  { %4828 = vset.pattern.permute.xlu1 %v4927_v5  ;;  %vm138_vm13 = vmor %vm82_vm10, %vm122_vm8 }
 0x174   :  { %277 = vperm.xlu1 %4828, %v5305_v48   ;;  %vm139_vm0 = vmor %vm83_vm12, %vm123_vm9  ;;  %vm347_vm9 = vcmp.eq.s32.totalorder %v5249_v35, %v5699_v38 }
 0x175   :  { %vm194_vm15 = vmor %vm138_vm13, %vm178_vm11 }
 0x176   :  { %v216_v43 = vpop.permute.xlu1 %215  ;;  %vm195_vm3 = vmor %vm139_vm0, %vm179_vm14 }
 0x177   :  { %vm234_vm1 = vcmp.eq.s32.totalorder %v5237_v29, %v216_v43  ;;  %vm235_vm2 = vcmp.eq.s32.totalorder %v5249_v35, %v216_v43  ;;  %v4259_v43 = vpack.c.bf16 %v1520_v53, %v1519_v52  ;;  %v1564_v52 = vld [vmem:[%s7750_s3 + $0x408] sm:$0xff] }
 0x178   :  { %4830 = vset.pattern.permute.xlu1 %v4929_v7  ;;  %vm250_vm4 = vmor %vm194_vm15, %vm234_vm1 }
 0x179   :  { %389 = vperm.xlu1 %4830, %v5305_v48   ;;  %vm251_vm6 = vmor %vm195_vm3, %vm235_vm2 }
 0x17b   :  { %v272_v55 = vpop.permute.xlu1 %271 }
 0x17c   :  { %vm290_vm7 = vcmp.eq.s32.totalorder %v5237_v29, %v272_v55  ;;  %vm291_vm8 = vcmp.eq.s32.totalorder %v5249_v35, %v272_v55  ;;  %v1503_v55 = vld [vmem:[%s7750_s3 + $0x220] sm:$0xff] }
 0x17d   :  { %vm306_vm10 = vmor %vm250_vm4, %vm290_vm7  ;;  %4831 = vset.pattern.permute.xlu1 %v4931_v9  ;;  %vm514_vm4 = vcmp.eq.s32.totalorder %v5237_v29, %v5714_v42 }
 0x17e   :  { %vm307_vm11 = vmor %vm251_vm6, %vm291_vm8  ;;  %445 = vperm.xlu1 %4831, %v5305_v48   ;;  %vm515_vm6 = vcmp.eq.s32.totalorder %v5249_v35, %v5714_v42  ;;  %v1499_v42 = vld [vmem:[%s7750_s3 + $0x200] sm:$0xff] }
 0x17f   :  { %vm5777_vm12 = vmor %vm306_vm10, %vm346_vm5 }
 0x180   :  { %v384_v58 = vpop.permute.xlu1 %383  ;;  %vm5781_vm13 = vmor %vm307_vm11, %vm347_vm9 }
 0x181   :  { %vm402_vm14 = vcmp.eq.s32.totalorder %v5237_v29, %v384_v58  ;;  %vm403_vm0 = vcmp.eq.s32.totalorder %v5249_v35, %v384_v58 }
 0x182   :  { %4832 = vset.pattern.permute.xlu1 %v4933_v15  ;;  %vm418_vm15 = vmor %vm5777_vm12, %vm402_vm14 }
 0x183   :  { %557 = vperm.xlu1 %4832, %v4872_v60   ;;  %vm419_vm3 = vmor %vm5781_vm13, %vm403_vm0 }
 0x185   :  { %v440_v61 = vpop.permute.xlu1 %439 }
 0x186   :  { %vm458_vm1 = vcmp.eq.s32.totalorder %v5237_v29, %v440_v61  ;;  %vm459_vm2 = vcmp.eq.s32.totalorder %v5249_v35, %v440_v61  ;;  %v4261_v61 = vpack.c.bf16 %v1504_v57, %v1503_v55  ;;  %v1468_v55 = vld [vmem:[%s7750_s3 + $0x108] sm:$0xff] }
 0x187   :  { %4833 = vset.pattern.permute.xlu1 %v4934_v24  ;;  %vm474_vm5 = vmor %vm418_vm15, %vm458_vm1  ;;  %vm682_vm15 = vcmp.eq.s32.totalorder %v5237_v29, %v664_v18 }
 0x188   :  { %613 = vperm.xlu1 %4833, %v4872_v60   ;;  %vm475_vm7 = vmor %vm419_vm3, %vm459_vm2  ;;  %vm683_vm3 = vcmp.eq.s32.totalorder %v5249_v35, %v664_v18  ;;  %v1505_v18 = vld [vmem:[%s7750_s3 + $0x230] sm:$0xff] }
 0x189   :  { %vm530_vm9 = vmor %vm474_vm5, %vm514_vm4 }
 0x18a   :  { %v552_v48 = vpop.permute.xlu1 %551  ;;  %vm531_vm11 = vmor %vm475_vm7, %vm515_vm6 }
 0x18b   :  { %vm570_vm8 = vcmp.eq.s32.totalorder %v5237_v29, %v552_v48  ;;  %vm571_vm10 = vcmp.eq.s32.totalorder %v5249_v35, %v552_v48 }
 0x18c   :  { %4835 = vset.pattern.permute.xlu1 %v4936_v32  ;;  %vm586_vm13 = vmor %vm530_vm9, %vm570_vm8 }
 0x18d   :  { %725 = vperm.xlu1 %4835, %v4872_v60   ;;  %vm587_vm0 = vmor %vm531_vm11, %vm571_vm10 }
 0x18f   :  { %v608_v63 = vpop.permute.xlu1 %607 }
 0x190   :  { %vm626_vm12 = vcmp.eq.s32.totalorder %v5237_v29, %v608_v63  ;;  %vm627_vm14 = vcmp.eq.s32.totalorder %v5249_v35, %v608_v63  ;;  %v1506_v63 = vld [vmem:[%s7750_s3 + $0x238] sm:$0xff] }
 0x191   :  { %4836 = vset.pattern.permute.xlu1 %v4937_v41  ;;  %vm642_vm1 = vmor %vm586_vm13, %vm626_vm12  ;;  %vm850_vm13 = vcmp.eq.s32.totalorder %v5237_v29, %v832_v26 }
 0x192   :  { %781 = vperm.xlu1 %4836, %v4872_v60   ;;  %vm643_vm2 = vmor %vm587_vm0, %vm627_vm14  ;;  %vm851_vm0 = vcmp.eq.s32.totalorder %v5249_v35, %v832_v26  ;;  %v1525_v26 = vld [vmem:[%s7750_s3 + $0x2d0] sm:$0xff] }
 0x193   :  { %vm698_vm5 = vmor %vm642_vm1, %vm682_vm15 }
 0x194   :  { %v720_v19 = vpop.permute.xlu1 %719  ;;  %vm699_vm7 = vmor %vm643_vm2, %vm683_vm3 }
 0x195   :  { %vm738_vm4 = vcmp.eq.s32.totalorder %v5237_v29, %v720_v19  ;;  %vm739_vm6 = vcmp.eq.s32.totalorder %v5249_v35, %v720_v19  ;;  %v4265_v19 = vpack.c.bf16 %v1506_v63, %v1505_v18  ;;  %v1485_v18 = vld [vmem:[%s7750_s3 + $0x190] sm:$0xff]  ;;  %v1486_v63 = vld [vmem:[%s7750_s3 + $0x198] sm:$0xff] }
 0x196   :  { %v3539_v1 = vpop.f32.mrb[0].mxu0  ;;  %4838 = vset.pattern.permute.xlu1 %v4939_v49  ;;  %vm754_vm9 = vmor %vm698_vm5, %vm738_vm4 }
 0x197   :  { %v3540_v21 = vpop.f32.mrb[1].mxu0  ;;  %893 = vperm.xlu1 %4838, %v4872_v60   ;;  %vm755_vm11 = vmor %vm699_vm7, %vm739_vm6 }
 0x198   :  { %v3541_v22 = vadd.f32 %v3540_v21, %v3539_v1  ;;  %v1507_v21 = vld [vmem:[%s7750_s3 + $0x240] sm:$0xff] }
 0x199   :  { %v776_v23 = vpop.permute.xlu1 %775 }
 0x19a   :  { %v1219_v47 = vmul.f32 %v3541_v22, %v1211_v25  ;;  %vm794_vm8 = vcmp.eq.s32.totalorder %v5237_v29, %v776_v23  ;;  %vm795_vm10 = vcmp.eq.s32.totalorder %v5249_v35, %v776_v23  ;;  %v1508_v25 = vld [vmem:[%s7750_s3 + $0x248] sm:$0xff] }
 0x19b   :  { %4839 = vset.pattern.permute.xlu1 %v4940_v56  ;;  %vm810_vm12 = vmor %vm754_vm9, %vm794_vm8  ;;  %vm1019_vm8 = vcmp.eq.s32.totalorder %v5249_v35, %v1000_v37  ;;  %v4269_v23 = vpack.c.bf16 %v1508_v25, %v1507_v21  ;;  %v1487_v25 = vld [vmem:[%s7750_s3 + $0x1a0] sm:$0xff] }
 0x19c   :  { %1227 = vst [vmem:[#allocation2] sm:$0x3] %v1219_v47  ;;  %v1235_v28 = vrot.slane %v1219_v47, %v5819_v17  ;;  %v1239_v6 = vcombine.high %v1219_v47, %v1219_v47  ;;  %949 = vperm.xlu1 %4839, %v4872_v60   ;;  %vm811_vm14 = vmor %vm755_vm11, %vm795_vm10  ;;  %vm1018_vm10 = vcmp.eq.s32.totalorder %v5237_v29, %v1000_v37  ;;  %v163_v60 = vpop.permute.xlu0 %162  ;;  %v1512_v37 = vld [vmem:[%s7750_s3 + $0x268] sm:$0xff] }
 0x19d   :  { %vm866_vm15 = vmor %vm810_vm12, %vm850_vm13 }
 0x19e   :  { %v1236_v30 = vcombine.high %v1235_v28, %v1235_v28  ;;  %v1246_v8 = vrot.slane %v1239_v6, %v5819_v17  ;;  %3494 = vst.sshfl [vmem:[#allocation2 + $0x4] sm:$0x3 pattern:$0x76325410] %v1239_v6  ;;  %v888_v36 = vpop.permute.xlu1 %887  ;;  %vm867_vm3 = vmor %vm811_vm14, %vm851_vm0  ;;  %v1509_v28 = vld [vmem:[%s7750_s3 + $0x250] sm:$0xff]  ;;  %v1510_v6 = vld [vmem:[%s7750_s3 + $0x258] sm:$0xff] }
 0x19f   :  { %vm906_vm1 = vcmp.eq.s32.totalorder %v5237_v29, %v888_v36  ;;  %vm907_vm2 = vcmp.eq.s32.totalorder %v5249_v35, %v888_v36  ;;  %v1528_v36 = vld [vmem:[%s7750_s3 + $0x2e8] sm:$0xff] }
 0x1a0   :  { %1238 = vst [vmem:[#allocation2 + $0x2] sm:$0x3] %v1236_v30  ;;  %v1249_v10 = vcombine.high %v1246_v8, %v1246_v8  ;;  %4841 = vset.pattern.permute.xlu1 %v4924_v2  ;;  %vm922_vm4 = vmor %vm866_vm15, %vm906_vm1  ;;  %v5905_v16 = vpop.permute.xlu0 %165  ;;  %v1527_v8 = vld [vmem:[%s7750_s3 + $0x2e0] sm:$0xff] }
 0x1a1   :  { %72 = vperm.xlu1 %4841, %v5617_v62   ;;  %vm923_vm5 = vmor %vm867_vm3, %vm907_vm2  ;;  %vm180_vm3 = vcmp.eq.s32.totalorder %v5237_v29, %v163_v60 }
 0x1a2   :  { %1251 = vst [vmem:[#allocation2 + $0x6] sm:$0x3] %v1249_v10  ;;  %v4273_v10 = vpack.c.bf16 %v1510_v6, %v1509_v28  ;;  %v1472_v28 = vld [vmem:[%s7750_s3 + $0x128] sm:$0xff] }
 0x1a3   :  { %v944_v38 = vpop.permute.xlu1 %943 }
 0x1a4   :  { %vm962_vm6 = vcmp.eq.s32.totalorder %v5237_v29, %v944_v38  ;;  %vm963_vm7 = vcmp.eq.s32.totalorder %v5249_v35, %v944_v38  ;;  %v331_v30 = vpop.permute.xlu0 %330 }
 0x1a5   :  { %vm978_vm9 = vmor %vm922_vm4, %vm962_vm6  ;;  %4842 = vset.pattern.permute.xlu1 %v4926_v4  ;;  %v1500_v4 = vld [vmem:[%s7750_s3 + $0x208] sm:$0xff] }
 0x1a6   :  { %vm979_vm11 = vmor %vm923_vm5, %vm963_vm7  ;;  %112 = vperm.xlu1 %4842, %v5617_v62   ;;  %v4253_v33 = vpack.c.bf16 %v1500_v4, %v1499_v42  ;;  %vm181_vm5 = vcmp.eq.s32.totalorder %v5249_v35, %v163_v60  ;;  %v1530_v42 = vld [vmem:[%s7750_s3 + $0x2f8] sm:$0xff]  ;;  %v1484_v4 = vld [vmem:[%s7750_s3 + $0x188] sm:$0xff] }
 0x1a7   :  { %vm1035_vm12 = vmor %vm979_vm11, %vm1019_vm8  ;;  %v1479_v60 = vld [vmem:[%s7750_s3 + $0x160] sm:$0xff] }
 0x1a8   :  { %v5843_v2 = vpop.permute.xlu1 %66  ;;  %v3487_v12 = vsel %vm1035_vm12, 1.0, %v4941_v54  ;;  %vm1034_vm13 = vmor %vm978_vm9, %vm1018_vm10 }
 0x1a9   :  { %v4874_v39 = vld.sshfl [vmem:[#allocation2] sm:$0xff pattern:$0x76325410]  ;;  %1190 = vmatprep.mubr.f32.mxu0 %v3487_v12  ;;  %v3486_v40 = vsel %vm1034_vm13, 1.0, %v4941_v54  ;;  %vm84_vm1 = vcmp.eq.s32.totalorder %v5237_v29, %v5843_v2  ;;  %vm85_vm15 = vcmp.eq.s32.totalorder %v5249_v35, %v5843_v2  ;;  %v4275_v2 = vpack.c.bf16 %v1528_v36, %v1527_v8  ;;  %v1529_v12 = vld [vmem:[%s7750_s3 + $0x2f0] sm:$0xff] }
 0x1aa   :  { %1191 = vmatmul.mubr.f32.gmra.mrb[8].mxu0 %v3486_v40  ;;  %4844 = vset.pattern.permute.xlu1 %v4925_v3  ;;  %v1977_v46 = vcombine.high %v4874_v39, %v4874_v39  ;;  %v1502_v3 = vld [vmem:[%s7750_s3 + $0x218] sm:$0xff]  ;;  %v5966_v40 = vpop.permute.xlu0 %333 }
 0x1ab   :  { %224 = vperm.xlu1 %4844, %v5617_v62   ;;  %v4257_v31 = vpack.c.bf16 %v1502_v3, %v1501_v51  ;;  %v1579_v51 = vld [vmem:[%s7750_s3 + $0x480] sm:$0xff]  ;;  %v1580_v3 = vld [vmem:[%s7750_s3 + $0x488] sm:$0xff] }
 0x1ac   :  { %2194 = vmatprep.mubr.f32.mxu1 %v1977_v46 }
 0x1ad   :  { %v107_v34 = vpop.permute.xlu1 %106  ;;  %2195 = vmatmul.mubr.f32.vlgmr.msra.gmra.mrb[0].mxu1 %v4874_v39  ;;  %v1483_v39 = vld [vmem:[%s7750_s3 + $0x180] sm:$0xff] }
 0x1ae   :  { %4254 = vmatpush3.bf16.msra.mxu1 %v4253_v33  ;;  %vm124_vm14 = vcmp.eq.s32.totalorder %v5237_v29, %v107_v34  ;;  %vm125_vm0 = vcmp.eq.s32.totalorder %v5249_v35, %v107_v34  ;;  %v4219_v44 = vpack.c.bf16 %v1484_v4, %v1483_v39  ;;  %v4279_v33 = vpack.c.bf16 %v1530_v42, %v1529_v12  ;;  %v1514_v34 = vld [vmem:[%s7750_s3 + $0x278] sm:$0xff]  ;;  %v499_v53 = vpop.permute.xlu0 %498  ;;  %v1491_v4 = vld [vmem:[%s7750_s3 + $0x1c0] sm:$0xff] }
 0x1af   :  { %4845 = vset.pattern.permute.xlu1 %v4927_v5  ;;  %4256 = vmatprep.subr.bf16.mxu1 %v4255_v50  ;;  %v1521_v5 = vld [vmem:[%s7750_s3 + $0x2b0] sm:$0xff]  ;;  %vm140_vm2 = vmor %vm84_vm1, %vm124_vm14  ;;  %v1474_v12 = vld [vmem:[%s7750_s3 + $0x138] sm:$0xff] }
 0x1b0   :  { %280 = vperm.xlu1 %4845, %v5617_v62   ;;  %v4263_v48 = vpack.c.bf16 %v1522_v59, %v1521_v5  ;;  %vm141_vm4 = vmor %vm85_vm15, %vm125_vm0  ;;  %vm348_vm0 = vcmp.eq.s32.totalorder %v5237_v29, %v331_v30  ;;  %vm349_vm15 = vcmp.eq.s32.totalorder %v5249_v35, %v331_v30  ;;  %4220 = vmatprep.subr.bf16.mxu0 %v4219_v44  ;;  %v1212_v59 = vld [vmem:[%s7748_s1 + $0x8] sm:$0xff] }
 0x1b1   :  { %vm196_vm7 = vmor %vm140_vm2, %vm180_vm3  ;;  %v1492_v44 = vld [vmem:[%s7750_s3 + $0x1c8] sm:$0xff] }
 0x1b2   :  { %v5883_v58 = vpop.permute.xlu1 %218  ;;  %4258 = vmatpush3.bf16.msra.mxu1 %v4257_v31  ;;  %vm197_vm9 = vmor %vm141_vm4, %vm181_vm5  ;;  %v4235_v45 = vpack.c.bf16 %v1492_v44, %v1491_v4  ;;  %v1569_v44 = vld [vmem:[%s7750_s3 + $0x430] sm:$0xff] }
 0x1b3   :  { %4260 = vmatprep.subr.bf16.mxu1 %v4259_v43  ;;  %vm236_vm6 = vcmp.eq.s32.totalorder %v5237_v29, %v5883_v58  ;;  %vm237_vm8 = vcmp.eq.s32.totalorder %v5249_v35, %v5883_v58  ;;  %v1467_v43 = vld [vmem:[%s7750_s3 + $0x100] sm:$0xff]  ;;  %v4315_v58 = vpack.c.bf16 %v1580_v3, %v1579_v51  ;;  %v1478_v3 = vld [vmem:[%s7750_s3 + $0x158] sm:$0xff] }
 0x1b4   :  { %4847 = vset.pattern.permute.xlu1 %v4929_v7  ;;  %v1524_v7 = vld [vmem:[%s7750_s3 + $0x2c8] sm:$0xff]  ;;  %vm252_vm11 = vmor %vm196_vm7, %vm236_vm6  ;;  %v4221_v5 = vpack.c.bf16 %v1468_v55, %v1467_v43  ;;  %v1574_v43 = vld [vmem:[%s7750_s3 + $0x458] sm:$0xff] }
 0x1b5   :  { %392 = vperm.xlu1 %4847, %v5617_v62   ;;  %v4267_v1 = vpack.c.bf16 %v1524_v7, %v1523_v0  ;;  %vm253_vm13 = vmor %vm197_vm9, %vm237_vm8  ;;  %v4223_v7 = vpack.c.bf16 %v1486_v63, %v1485_v18  ;;  %v1498_v18 = vld [vmem:[%s7750_s3 + $0x1f8] sm:$0xff] }
 0x1b6   :  { %4262 = vmatpush3.bf16.msra.mxu1 %v4261_v61  ;;  %4222 = vmatpush3.bf16.msra.mxu0 %v4221_v5 }
 0x1b7   :  { %v275_v13 = vpop.permute.xlu1 %274  ;;  %4264 = vmatprep.subr.bf16.mxu1 %v4263_v48  ;;  %4224 = vmatprep.subr.bf16.mxu0 %v4223_v7 }
 0x1b8   :  { %vm292_vm10 = vcmp.eq.s32.totalorder %v5237_v29, %v275_v13  ;;  %vm293_vm12 = vcmp.eq.s32.totalorder %v5249_v35, %v275_v13  ;;  %v1469_v13 = vld [vmem:[%s7750_s3 + $0x110] sm:$0xff] }
 0x1b9   :  { %4848 = vset.pattern.permute.xlu1 %v4931_v9  ;;  %v1526_v9 = vld [vmem:[%s7750_s3 + $0x2d8] sm:$0xff]  ;;  %vm5978_vm14 = vmor %vm252_vm11, %vm292_vm10  ;;  %vm516_vm11 = vcmp.eq.s32.totalorder %v5237_v29, %v499_v53 }
 0x1ba   :  { %448 = vperm.xlu1 %4848, %v5617_v62   ;;  %4266 = vmatpush3.bf16.msra.mxu1 %v4265_v19  ;;  %v4271_v47 = vpack.c.bf16 %v1526_v9, %v1525_v26  ;;  %vm309_vm1 = vmor %vm253_vm13, %vm293_vm12  ;;  %vm517_vm13 = vcmp.eq.s32.totalorder %v5249_v35, %v499_v53  ;;  %v1470_v19 = vld [vmem:[%s7750_s3 + $0x118] sm:$0xff]  ;;  %v1488_v9 = vld [vmem:[%s7750_s3 + $0x1a8] sm:$0xff] }
 0x1bb   :  { %4268 = vmatprep.subr.bf16.mxu1 %v4267_v1  ;;  %vm364_vm3 = vmor %vm5978_vm14, %vm348_vm0  ;;  %v4225_v21 = vpack.c.bf16 %v1470_v19, %v1469_v13  ;;  %v1581_v53 = vld [vmem:[%s7750_s3 + $0x490] sm:$0xff] }
 0x1bc   :  { %v5925_v22 = vpop.permute.xlu1 %386  ;;  %vm6005_vm5 = vmor %vm309_vm1, %vm349_vm15  ;;  %v1565_v19 = vld [vmem:[%s7750_s3 + $0x410] sm:$0xff] }
 0x1bd   :  { %vm404_vm2 = vcmp.eq.s32.totalorder %v5237_v29, %v5925_v22  ;;  %vm405_vm4 = vcmp.eq.s32.totalorder %v5249_v35, %v5925_v22  ;;  %4226 = vmatpush3.bf16.msra.mxu0 %v4225_v21  ;;  %v1471_v22 = vld [vmem:[%s7750_s3 + $0x120] sm:$0xff] }
 0x1be   :  { %4850 = vset.pattern.permute.xlu1 %v4933_v15  ;;  %4270 = vmatpush3.bf16.msra.mxu1 %v4269_v23  ;;  %v1511_v15 = vld [vmem:[%s7750_s3 + $0x260] sm:$0xff]  ;;  %vm420_vm7 = vmor %vm364_vm3, %vm404_vm2  ;;  %v4229_v36 = vpack.c.bf16 %v1472_v28, %v1471_v22  ;;  %v1482_v28 = vld [vmem:[%s7750_s3 + $0x178] sm:$0xff] }
 0x1bf   :  { %560 = vperm.xlu1 %4850, %v5617_v62   ;;  %4272 = vmatprep.subr.bf16.mxu1 %v4271_v47  ;;  %v4277_v46 = vpack.c.bf16 %v1512_v37, %v1511_v15  ;;  %vm421_vm9 = vmor %vm6005_vm5, %vm405_vm4  ;;  %v4227_v47 = vpack.c.bf16 %v1488_v9, %v1487_v25  ;;  %v1490_v15 = vld [vmem:[%s7750_s3 + $0x1b8] sm:$0xff] }
 0x1c1   :  { %v443_v38 = vpop.permute.xlu1 %442  ;;  %4228 = vmatprep.subr.bf16.mxu0 %v4227_v47  ;;  %v1481_v47 = vld [vmem:[%s7750_s3 + $0x170] sm:$0xff] }
 0x1c2   :  { %4274 = vmatpush3.bf16.msra.mxu1 %v4273_v10  ;;  %vm460_vm6 = vcmp.eq.s32.totalorder %v5237_v29, %v443_v38  ;;  %vm461_vm8 = vcmp.eq.s32.totalorder %v5249_v35, %v443_v38  ;;  %v1489_v10 = vld [vmem:[%s7750_s3 + $0x1b0] sm:$0xff]  ;;  %4230 = vmatpush3.bf16.msra.mxu0 %v4229_v36  ;;  %v1568_v38 = vld [vmem:[%s7750_s3 + $0x428] sm:$0xff] }
 0x1c3   :  { %4851 = vset.pattern.permute.xlu1 %v4934_v24  ;;  %4276 = vmatprep.subr.bf16.mxu1 %v4275_v2  ;;  %v1513_v24 = vld [vmem:[%s7750_s3 + $0x270] sm:$0xff]  ;;  %vm6029_vm10 = vmor %vm420_vm7, %vm460_vm6  ;;  %vm684_vm6 = vcmp.eq.s32.totalorder %v5237_v29, %v5804_v14 }
 0x1c4   :  { %616 = vperm.xlu1 %4851, %v5617_v62   ;;  %v4281_v31 = vpack.c.bf16 %v1514_v34, %v1513_v24  ;;  %vm6042_vm12 = vmor %vm421_vm9, %vm461_vm8  ;;  %vm685_vm8 = vcmp.eq.s32.totalorder %v5249_v35, %v5804_v14  ;;  %v1473_v2 = vld [vmem:[%s7750_s3 + $0x130] sm:$0xff]  ;;  %v1494_v34 = vld [vmem:[%s7750_s3 + $0x1d8] sm:$0xff] }
 0x1c5   :  { %vm532_vm0 = vmor %vm6029_vm10, %vm516_vm11  ;;  %v4233_v39 = vpack.c.bf16 %v1474_v12, %v1473_v2  ;;  %v1493_v24 = vld [vmem:[%s7750_s3 + $0x1d0] sm:$0xff]  ;;  %v1586_v12 = vld [vmem:[%s7750_s3 + $0x4b8] sm:$0xff] }
 0x1c6   :  { %v555_v50 = vpop.permute.xlu1 %554  ;;  %4278 = vmatpush3.bf16.msra.mxu1 %v4277_v46  ;;  %vm533_vm15 = vmor %vm6042_vm12, %vm517_vm13  ;;  %v1475_v46 = vld [vmem:[%s7750_s3 + $0x140] sm:$0xff]  ;;  %v4239_v51 = vpack.c.bf16 %v1494_v34, %v1493_v24 }
 0x1c7   :  { %4280 = vmatprep.subr.bf16.mxu1 %v4279_v33  ;;  %vm572_vm14 = vcmp.eq.s32.totalorder %v5237_v29, %v555_v50  ;;  %vm573_vm1 = vcmp.eq.s32.totalorder %v5249_v35, %v555_v50  ;;  %v1476_v33 = vld [vmem:[%s7750_s3 + $0x148] sm:$0xff]  ;;  %v1563_v50 = vld [vmem:[%s7750_s3 + $0x400] sm:$0xff] }
 0x1c8   :  { %4853 = vset.pattern.permute.xlu1 %v4936_v32  ;;  %vm588_vm3 = vmor %vm532_vm0, %vm572_vm14  ;;  %v4237_v14 = vpack.c.bf16 %v1476_v33, %v1475_v46  ;;  %v4317_v13 = vpack.c.bf16 %v1564_v52, %v1563_v50  ;;  %v1587_v33 = vld [vmem:[%s7750_s3 + $0x4c0] sm:$0xff]  ;;  %v1589_v50 = vld [vmem:[%s7750_s3 + $0x4d0] sm:$0xff] }
 0x1c9   :  { %v3542_v57 = vpop.f32.mrb[2].mxu0  ;;  %728 = vperm.xlu1 %4853, %v5617_v62   ;;  %vm589_vm5 = vmor %vm533_vm15, %vm573_vm1 }
 0x1ca   :  { %v3543_v32 = vpop.f32.mrb[3].mxu0  ;;  %4282 = vmatpush3.bf16.msra.mxu1 %v4281_v31  ;;  %v1582_v31 = vld [vmem:[%s7750_s3 + $0x498] sm:$0xff] }
 0x1cb   :  { %v3544_v61 = vadd.f32 %v3543_v32, %v3542_v57  ;;  %v611_v48 = vpop.permute.xlu1 %610  ;;  %4316 = vmatprep.subr.bf16.mxu1 %v4315_v58  ;;  %v1495_v58 = vld [vmem:[%s7750_s3 + $0x1e0] sm:$0xff]  ;;  %v4319_v25 = vpack.c.bf16 %v1582_v31, %v1581_v53  ;;  %v1573_v31 = vld [vmem:[%s7750_s3 + $0x450] sm:$0xff] }
 0x1cc   :  { %vm628_vm2 = vcmp.eq.s32.totalorder %v5237_v29, %v611_v48  ;;  %vm629_vm4 = vcmp.eq.s32.totalorder %v5249_v35, %v611_v48  ;;  %v1497_v48 = vld [vmem:[%s7750_s3 + $0x1f0] sm:$0xff] }
 0x1cd   :  { %v1220_v1 = vmul.f32 %v3544_v61, %v1212_v59  ;;  %4854 = vset.pattern.permute.xlu1 %v4937_v41  ;;  %vm6087_vm7 = vmor %vm588_vm3, %vm628_vm2  ;;  %vm852_vm2 = vcmp.eq.s32.totalorder %v5237_v29, %v5826_v27  ;;  %v1496_v59 = vld [vmem:[%s7750_s3 + $0x1e8] sm:$0xff] }
 0x1ce   :  { %784 = vperm.xlu1 %4854, %v5617_v62   ;;  %vm6102_vm9 = vmor %vm589_vm5, %vm629_vm4  ;;  %vm853_vm4 = vcmp.eq.s32.totalorder %v5249_v35, %v5826_v27  ;;  %v4243_v61 = vpack.c.bf16 %v1496_v59, %v1495_v58  ;;  %v1480_v27 = vld [vmem:[%s7750_s3 + $0x168] sm:$0xff] }
 0x1cf   :  { %1252 = vst [vmem:[#allocation2 + $0x8] sm:$0x3] %v1220_v1  ;;  %v1260_v41 = vrot.slane %v1220_v1, %v5819_v17  ;;  %v1264_v26 = vcombine.high %v1220_v1, %v1220_v1  ;;  %vm700_vm11 = vmor %vm6087_vm7, %vm684_vm6  ;;  %v1566_v1 = vld [vmem:[%s7750_s3 + $0x418] sm:$0xff]  ;;  %v4245_v9 = vpack.c.bf16 %v1480_v27, %v1479_v60  ;;  %v1592_v58 = vld [vmem:[%s7750_s3 + $0x4e8] sm:$0xff] }
 0x1d0   :  { %v723_v23 = vpop.permute.xlu1 %722  ;;  %vm701_vm13 = vmor %vm6102_vm9, %vm685_vm8  ;;  %v4321_v8 = vpack.c.bf16 %v1566_v1, %v1565_v19  ;;  %v1575_v60 = vld [vmem:[%s7750_s3 + $0x460] sm:$0xff]  ;;  %v1593_v27 = vld [vmem:[%s7750_s3 + $0x4f0] sm:$0xff] }
 0x1d1   :  { %v1261_v6 = vcombine.high %v1260_v41, %v1260_v41  ;;  %v1271_v30 = vrot.slane %v1264_v26, %v5819_v17  ;;  %3495 = vst.sshfl [vmem:[#allocation2 + $0xc] sm:$0x3 pattern:$0x76325410] %v1264_v26  ;;  %vm740_vm10 = vcmp.eq.s32.totalorder %v5237_v29, %v723_v23  ;;  %vm741_vm12 = vcmp.eq.s32.totalorder %v5249_v35, %v723_v23  ;;  %v1583_v41 = vld [vmem:[%s7750_s3 + $0x4a0] sm:$0xff]  ;;  %v1584_v26 = vld [vmem:[%s7750_s3 + $0x4a8] sm:$0xff] }
 0x1d2   :  { %4856 = vset.pattern.permute.xlu1 %v4939_v49  ;;  %v4231_v49 = vpack.c.bf16 %v1490_v15, %v1489_v10  ;;  %vm756_vm0 = vmor %vm700_vm11, %vm740_vm10  ;;  %vm1021_vm10 = vcmp.eq.s32.totalorder %v5249_v35, %v5867_v20  ;;  %v4247_v23 = vpack.c.bf16 %v1498_v18, %v1497_v48  ;;  %v4323_v15 = vpack.c.bf16 %v1584_v26, %v1583_v41  ;;  %v1594_v48 = vld [vmem:[%s7750_s3 + $0x4f8] sm:$0xff]  ;;  %v1643_v19 = vld [vmem:[%s7750_s3 + $0x680] sm:$0xff]  ;;  %v502_v26 = vpop.permute.xlu0 %501 }
 0x1d3   :  { %1263 = vst [vmem:[#allocation2 + $0xa] sm:$0x3] %v1261_v6  ;;  %v1274_v37 = vcombine.high %v1271_v30, %v1271_v30  ;;  %896 = vperm.xlu1 %4856, %v5617_v62   ;;  %vm757_vm15 = vmor %vm701_vm13, %vm741_vm12  ;;  %v1547_v6 = vld [vmem:[%s7750_s3 + $0x380] sm:$0xff]  ;;  %v1548_v30 = vld [vmem:[%s7750_s3 + $0x388] sm:$0xff] }
 0x1d4   :  { %4232 = vmatprep.subr.bf16.mxu0 %v4231_v49  ;;  %v4249_v49 = vpack.c.bf16 %v1482_v28, %v1481_v47  ;;  %v1644_v1 = vld [vmem:[%s7750_s3 + $0x688] sm:$0xff] }
 0x1d5   :  { %1276 = vst [vmem:[#allocation2 + $0xe] sm:$0x3] %v1274_v37  ;;  %v779_v42 = vpop.permute.xlu1 %778  ;;  %4234 = vmatpush3.bf16.msra.mxu0 %v4233_v39  ;;  %v1567_v37 = vld [vmem:[%s7750_s3 + $0x420] sm:$0xff]  ;;  %v4283_v39 = vpack.c.bf16 %v1548_v30, %v1547_v6 }
 0x1d6   :  { %vm796_vm14 = vcmp.eq.s32.totalorder %v5237_v29, %v779_v42  ;;  %vm797_vm1 = vcmp.eq.s32.totalorder %v5249_v35, %v779_v42  ;;  %4236 = vmatprep.subr.bf16.mxu0 %v4235_v45  ;;  %v4325_v42 = vpack.c.bf16 %v1568_v38, %v1567_v37  ;;  %v1570_v45 = vld [vmem:[%s7750_s3 + $0x438] sm:$0xff] }
 0x1d7   :  { %4857 = vset.pattern.permute.xlu1 %v4940_v56  ;;  %vm812_vm3 = vmor %vm756_vm0, %vm796_vm14  ;;  %v1477_v56 = vld [vmem:[%s7750_s3 + $0x150] sm:$0xff]  ;;  %vm1020_vm0 = vcmp.eq.s32.totalorder %v5237_v29, %v5867_v20  ;;  %v4329_v24 = vpack.c.bf16 %v1570_v45, %v1569_v44  ;;  %v1646_v45 = vld [vmem:[%s7750_s3 + $0x698] sm:$0xff] }
 0x1d8   :  { %952 = vperm.xlu1 %4857, %v5617_v62   ;;  %vm813_vm5 = vmor %vm757_vm15, %vm797_vm1  ;;  %v4241_v57 = vpack.c.bf16 %v1478_v3, %v1477_v56  ;;  %v1585_v20 = vld [vmem:[%s7750_s3 + $0x4b0] sm:$0xff]  ;;  %v1571_v56 = vld [vmem:[%s7750_s3 + $0x440] sm:$0xff] }
 0x1d9   :  { %vm6171_vm6 = vmor %vm812_vm3, %vm852_vm2  ;;  %4238 = vmatpush3.bf16.msra.mxu0 %v4237_v14  ;;  %v4327_v4 = vpack.c.bf16 %v1586_v12, %v1585_v20  ;;  %v1588_v14 = vld [vmem:[%s7750_s3 + $0x4c8] sm:$0xff]  ;;  %v1627_v12 = vld [vmem:[%s7750_s3 + $0x600] sm:$0xff] }
 0x1da   :  { %v891_v62 = vpop.permute.xlu1 %890  ;;  %vm6184_vm8 = vmor %vm813_vm5, %vm853_vm4  ;;  %4240 = vmatprep.subr.bf16.mxu0 %v4239_v51  ;;  %v4331_v34 = vpack.c.bf16 %v1588_v14, %v1587_v33  ;;  %v1590_v51 = vld [vmem:[%s7750_s3 + $0x4d8] sm:$0xff]  ;;  %v1645_v44 = vld [vmem:[%s7750_s3 + $0x690] sm:$0xff] }
 0x1db   :  { %vm908_vm7 = vcmp.eq.s32.totalorder %v5237_v29, %v891_v62  ;;  %vm909_vm9 = vcmp.eq.s32.totalorder %v5249_v35, %v891_v62  ;;  %v1572_v62 = vld [vmem:[%s7750_s3 + $0x448] sm:$0xff]  ;;  %v4335_v53 = vpack.c.bf16 %v1590_v51, %v1589_v50 }
 0x1dc   :  { %v6176_v55 = vld [vmem:[#allocation2 + $0x8] sm:$0xff]  ;;  %vm6212_vm11 = vmor %vm6171_vm6, %vm908_vm7  ;;  %v4333_v52 = vpack.c.bf16 %v1572_v62, %v1571_v56  ;;  %vm182_vm7 = vcmp.eq.s32.totalorder %v5237_v29, %v5905_v16  ;;  %v1630_v56 = vld [vmem:[%s7750_s3 + $0x618] sm:$0xff] }
 0x1dd   :  { %v1986_v32 = vrot.slane %v6176_v55, %v5819_v17  ;;  %vm6226_vm12 = vmor %vm6184_vm8, %vm909_vm9  ;;  %4242 = vmatpush3.bf16.msra.mxu0 %v4241_v57  ;;  %v1591_v57 = vld [vmem:[%s7750_s3 + $0x4e0] sm:$0xff]  ;;  %v1648_v50 = vld [vmem:[%s7750_s3 + $0x6a8] sm:$0xff] }
 0x1de   :  { %4244 = vmatprep.subr.bf16.mxu0 %v4243_v61  ;;  %v4339_v59 = vpack.c.bf16 %v1592_v58, %v1591_v57  ;;  %v1576_v61 = vld [vmem:[%s7750_s3 + $0x468] sm:$0xff]  ;;  %v1647_v62 = vld [vmem:[%s7750_s3 + $0x6a0] sm:$0xff]  ;;  %v1649_v58 = vld [vmem:[%s7750_s3 + $0x6b0] sm:$0xff] }
 0x1df   :  { %v947_v0 = vpop.permute.xlu1 %946  ;;  %v1994_v7 = vcombine.high %v1986_v32, %v1986_v32  ;;  %v4341_v18 = vpack.c.bf16 %v1576_v61, %v1575_v60  ;;  %v1633_v60 = vld [vmem:[%s7750_s3 + $0x630] sm:$0xff]  ;;  %v1634_v61 = vld [vmem:[%s7750_s3 + $0x638] sm:$0xff] }
 0x1e0   :  { %vm964_vm13 = vcmp.eq.s32.totalorder %v5237_v29, %v947_v0  ;;  %vm965_vm14 = vcmp.eq.s32.totalorder %v5249_v35, %v947_v0  ;;  %v4343_v0 = vpack.c.bf16 %v1594_v48, %v1593_v27  ;;  %v1651_v48 = vld [vmem:[%s7750_s3 + $0x6c0] sm:$0xff] }
 0x1e1   :  { %vm6242_vm1 = vmor %vm6212_vm11, %vm964_vm13  ;;  %2334 = vmatprep.mubr.f32.mxu1 %v1994_v7  ;;  %4246 = vmatpush3.bf16.msra.mxu0 %v4245_v9  ;;  %v1577_v7 = vld [vmem:[%s7750_s3 + $0x470] sm:$0xff] }
 0x1e2   :  { %vm981_vm15 = vmor %vm6226_vm12, %vm965_vm14  ;;  %2335 = vmatmul.mubr.f32.vlgmr.msra.gmra.mrb[2].mxu1 %v1986_v32  ;;  %4248 = vmatprep.subr.bf16.mxu0 %v4247_v23  ;;  %v4337_v32 = vpack.c.bf16 %v1574_v43, %v1573_v31  ;;  %v1631_v31 = vld [vmem:[%s7750_s3 + $0x620] sm:$0xff]  ;;  %v1632_v43 = vld [vmem:[%s7750_s3 + $0x628] sm:$0xff] }
 0x1e3   :  { %vm1037_vm2 = vmor %vm981_vm15, %vm1021_vm10  ;;  %4318 = vmatpush3.bf16.msra.mxu1 %v4317_v13  ;;  %v1578_v13 = vld [vmem:[%s7750_s3 + $0x478] sm:$0xff]  ;;  %vm183_vm10 = vcmp.eq.s32.totalorder %v5249_v35, %v5905_v16 }
 0x1e4   :  { %v6263_v36 = vpop.permute.xlu1 %69  ;;  %v3489_v10 = vsel %vm1037_vm2, 1.0, %v4941_v54  ;;  %vm1036_vm3 = vmor %vm6242_vm1, %vm1020_vm0  ;;  %4320 = vmatprep.subr.bf16.mxu1 %v4319_v25  ;;  %v4345_v21 = vpack.c.bf16 %v1578_v13, %v1577_v7  ;;  %v4379_v25 = vpack.c.bf16 %v1644_v1, %v1643_v19  ;;  %v1635_v7 = vld [vmem:[%s7750_s3 + $0x640] sm:$0xff]  ;;  %v1636_v13 = vld [vmem:[%s7750_s3 + $0x648] sm:$0xff] }
 0x1e5   :  { %1195 = vmatprep.mubr.f32.mxu0 %v3489_v10  ;;  %v3488_v2 = vsel %vm1036_vm3, 1.0, %v4941_v54  ;;  %4250 = vmatpush3.bf16.msra.mxu0 %v4249_v49  ;;  %vm86_vm6 = vcmp.eq.s32.totalorder %v5237_v29, %v6263_v36  ;;  %vm87_vm8 = vcmp.eq.s32.totalorder %v5249_v35, %v6263_v36  ;;  %v1653_v19 = vld [vmem:[%s7750_s3 + $0x6d0] sm:$0xff]  ;;  %v1654_v1 = vld [vmem:[%s7750_s3 + $0x6d8] sm:$0xff] }
 0x1e6   :  { %1196 = vmatmul.mubr.f32.gmra.mrb[10].mxu0 %v3488_v2  ;;  %4284 = vmatprep.subr.bf16.mxu0 %v4283_v39  ;;  %v1628_v39 = vld [vmem:[%s7750_s3 + $0x608] sm:$0xff] }
 0x1e7   :  { %4322 = vmatpush3.bf16.msra.mxu1 %v4321_v8  ;;  %v670_v8 = vpop.permute.xlu0 %669  ;;  %v4381_v14 = vpack.c.bf16 %v1628_v39, %v1627_v12  ;;  %v1708_v12 = vld [vmem:[%s7750_s3 + $0x888] sm:$0xff] }
 0x1e8   :  { %4324 = vmatprep.subr.bf16.mxu1 %v4323_v15 }
 0x1e9   :  { %v110_v46 = vpop.permute.xlu1 %109 }
 0x1ea   :  { %vm126_vm4 = vcmp.eq.s32.totalorder %v5237_v29, %v110_v46  ;;  %vm127_vm5 = vcmp.eq.s32.totalorder %v5249_v35, %v110_v46 }
 0x1eb   :  { %4326 = vmatpush3.bf16.msra.mxu1 %v4325_v42  ;;  %vm142_vm9 = vmor %vm86_vm6, %vm126_vm4  ;;  %vm350_vm4 = vcmp.eq.s32.totalorder %v5237_v29, %v5966_v40  ;;  %vm351_vm6 = vcmp.eq.s32.totalorder %v5249_v35, %v5966_v40  ;;  %v1213_v40 = vld [vmem:[%s7748_s1 + $0x10] sm:$0xff]  ;;  %v838_v49 = vpop.permute.xlu0 %837 }
 0x1ec   :  { %4328 = vmatprep.subr.bf16.mxu1 %v4327_v4  ;;  %vm143_vm11 = vmor %vm87_vm8, %vm127_vm5 }
 0x1ed   :  { %vm198_vm13 = vmor %vm142_vm9, %vm182_vm7 }
 0x1ee   :  { %v222_v3 = vpop.permute.xlu1 %221  ;;  %vm199_vm0 = vmor %vm143_vm11, %vm183_vm10 }
 0x1ef   :  { %4330 = vmatpush3.bf16.msra.mxu1 %v4329_v24  ;;  %vm238_vm12 = vcmp.eq.s32.totalorder %v5237_v29, %v222_v3  ;;  %vm239_vm14 = vcmp.eq.s32.totalorder %v5249_v35, %v222_v3  ;;  %v1006_v42 = vpop.permute.xlu0 %1005  ;;  %v4383_v24 = vpack.c.bf16 %v1646_v45, %v1645_v44 }
 0x1f0   :  { %4332 = vmatprep.subr.bf16.mxu1 %v4331_v34  ;;  %vm254_vm15 = vmor %vm198_vm13, %vm238_vm12  ;;  %v1629_v34 = vld [vmem:[%s7750_s3 + $0x610] sm:$0xff] }
 0x1f1   :  { %vm255_vm3 = vmor %vm199_vm0, %vm239_vm14  ;;  %v4385_v51 = vpack.c.bf16 %v1630_v56, %v1629_v34 }
 0x1f3   :  { %v278_v5 = vpop.permute.xlu1 %277  ;;  %4334 = vmatpush3.bf16.msra.mxu1 %v4333_v52 }
 0x1f4   :  { %4336 = vmatprep.subr.bf16.mxu1 %v4335_v53  ;;  %vm294_vm1 = vcmp.eq.s32.totalorder %v5237_v29, %v278_v5  ;;  %vm295_vm2 = vcmp.eq.s32.totalorder %v5249_v35, %v278_v5  ;;  %v4387_v53 = vpack.c.bf16 %v1648_v50, %v1647_v62  ;;  %v1650_v5 = vld [vmem:[%s7750_s3 + $0x6b8] sm:$0xff] }
 0x1f5   :  { %vm310_vm5 = vmor %vm254_vm15, %vm294_vm1  ;;  %vm518_vm15 = vcmp.eq.s32.totalorder %v5237_v29, %v502_v26 }
 0x1f6   :  { %vm311_vm7 = vmor %vm255_vm3, %vm295_vm2  ;;  %vm519_vm3 = vcmp.eq.s32.totalorder %v5249_v35, %v502_v26  ;;  %v1638_v26 = vld [vmem:[%s7750_s3 + $0x658] sm:$0xff] }
 0x1f7   :  { %4338 = vmatpush3.bf16.msra.mxu1 %v4337_v32  ;;  %vm366_vm9 = vmor %vm310_vm5, %vm350_vm4  ;;  %v4389_v32 = vpack.c.bf16 %v1632_v43, %v1631_v31 }
 0x1f8   :  { %v390_v63 = vpop.permute.xlu1 %389  ;;  %4340 = vmatprep.subr.bf16.mxu1 %v4339_v59  ;;  %vm367_vm11 = vmor %vm311_vm7, %vm351_vm6  ;;  %v4391_v59 = vpack.c.bf16 %v1650_v5, %v1649_v58 }
 0x1f9   :  { %vm406_vm8 = vcmp.eq.s32.totalorder %v5237_v29, %v390_v63  ;;  %vm407_vm10 = vcmp.eq.s32.totalorder %v5249_v35, %v390_v63  ;;  %v4393_v63 = vpack.c.bf16 %v1634_v61, %v1633_v60  ;;  %v1692_v60 = vld [vmem:[%s7750_s3 + $0x808] sm:$0xff] }
 0x1fa   :  { %vm422_vm13 = vmor %vm366_vm9, %vm406_vm8 }
 0x1fb   :  { %4342 = vmatpush3.bf16.msra.mxu1 %v4341_v18  ;;  %vm423_vm0 = vmor %vm367_vm11, %vm407_vm10  ;;  %v1652_v18 = vld [vmem:[%s7750_s3 + $0x6c8] sm:$0xff] }
 0x1fc   :  { %4344 = vmatprep.subr.bf16.mxu1 %v4343_v0  ;;  %v4395_v0 = vpack.c.bf16 %v1652_v18, %v1651_v48  ;;  %v1709_v48 = vld [vmem:[%s7750_s3 + $0x890] sm:$0xff]  ;;  %v1710_v18 = vld [vmem:[%s7750_s3 + $0x898] sm:$0xff] }
 0x1fd   :  { %v446_v41 = vpop.permute.xlu1 %445 }
 0x1fe   :  { %vm462_vm12 = vcmp.eq.s32.totalorder %v5237_v29, %v446_v41  ;;  %vm463_vm14 = vcmp.eq.s32.totalorder %v5249_v35, %v446_v41  ;;  %v4399_v41 = vpack.c.bf16 %v1654_v1, %v1653_v19  ;;  %v4447_v1 = vpack.c.bf16 %v1710_v18, %v1709_v48  ;;  %v1538_v18 = vld [vmem:[%s7750_s3 + $0x338] sm:$0xff] }
 0x1ff   :  { %4346 = vmatpush3.bf16.msra.mxu1 %v4345_v21  ;;  %vm478_vm1 = vmor %vm422_vm13, %vm462_vm12  ;;  %vm686_vm13 = vcmp.eq.s32.totalorder %v5237_v29, %v670_v8 }
 0x200   :  { %4380 = vmatprep.subr.bf16.mxu1 %v4379_v25  ;;  %vm479_vm2 = vmor %vm423_vm0, %vm463_vm14  ;;  %vm687_vm0 = vcmp.eq.s32.totalorder %v5249_v35, %v670_v8  ;;  %v4397_v25 = vpack.c.bf16 %v1636_v13, %v1635_v7  ;;  %v1658_v8 = vld [vmem:[%s7750_s3 + $0x6f8] sm:$0xff] }
 0x201   :  { %vm534_vm5 = vmor %vm478_vm1, %vm518_vm15 }
 0x202   :  { %v558_v16 = vpop.permute.xlu1 %557  ;;  %vm535_vm7 = vmor %vm479_vm2, %vm519_vm3 }
 0x203   :  { %vm574_vm4 = vcmp.eq.s32.totalorder %v5237_v29, %v558_v16  ;;  %vm575_vm6 = vcmp.eq.s32.totalorder %v5249_v35, %v558_v16  ;;  %v1637_v16 = vld [vmem:[%s7750_s3 + $0x650] sm:$0xff] }
 0x204   :  { %vm590_vm9 = vmor %vm534_vm5, %vm574_vm4 }
 0x205   :  { %v3545_v9 = vpop.f32.mrb[4].mxu0  ;;  %vm591_vm11 = vmor %vm535_vm7, %vm575_vm6 }
 0x206   :  { %v3546_v22 = vpop.f32.mrb[5].mxu0 }
 0x207   :  { %v3547_v23 = vadd.f32 %v3546_v22, %v3545_v9  ;;  %v614_v47 = vpop.permute.xlu1 %613  ;;  %v1655_v9 = vld [vmem:[%s7750_s3 + $0x6e0] sm:$0xff]  ;;  %v1656_v22 = vld [vmem:[%s7750_s3 + $0x6e8] sm:$0xff] }
 0x208   :  { %vm630_vm8 = vcmp.eq.s32.totalorder %v5237_v29, %v614_v47  ;;  %vm631_vm10 = vcmp.eq.s32.totalorder %v5249_v35, %v614_v47  ;;  %v4403_v47 = vpack.c.bf16 %v1656_v22, %v1655_v9 }
 0x209   :  { %v1221_v28 = vmul.f32 %v3547_v23, %v1213_v40  ;;  %vm646_vm12 = vmor %vm590_vm9, %vm630_vm8  ;;  %vm854_vm9 = vcmp.eq.s32.totalorder %v5237_v29, %v838_v49  ;;  %v4401_v23 = vpack.c.bf16 %v1638_v26, %v1637_v16  ;;  %v1979_v26 = vcombine.high %v6176_v55, %v6176_v55  ;;  %v1531_v55 = vld [vmem:[%s7750_s3 + $0x300] sm:$0xff] }
 0x20a   :  { %vm647_vm14 = vmor %vm591_vm11, %vm631_vm10  ;;  %vm855_vm11 = vcmp.eq.s32.totalorder %v5249_v35, %v838_v49  ;;  %v1642_v49 = vld [vmem:[%s7750_s3 + $0x678] sm:$0xff] }
 0x20b   :  { %1277 = vst [vmem:[#allocation2 + $0x10] sm:$0x3] %v1221_v28  ;;  %v1285_v6 = vrot.slane %v1221_v28, %v5819_v17  ;;  %v1289_v30 = vcombine.high %v1221_v28, %v1221_v28  ;;  %vm702_vm15 = vmor %vm646_vm12, %vm686_vm13  ;;  %v1639_v28 = vld [vmem:[%s7750_s3 + $0x660] sm:$0xff] }
 0x20c   :  { %v726_v36 = vpop.permute.xlu1 %725  ;;  %vm703_vm3 = vmor %vm647_vm14, %vm687_vm0 }
 0x20d   :  { %v1286_v10 = vcombine.high %v1285_v6, %v1285_v6  ;;  %v1296_v15 = vrot.slane %v1289_v30, %v5819_v17  ;;  %3496 = vst.sshfl [vmem:[#allocation2 + $0x14] sm:$0x3 pattern:$0x76325410] %v1289_v30  ;;  %vm742_vm1 = vcmp.eq.s32.totalorder %v5237_v29, %v726_v36  ;;  %vm743_vm2 = vcmp.eq.s32.totalorder %v5249_v35, %v726_v36  ;;  %v1640_v6 = vld [vmem:[%s7750_s3 + $0x668] sm:$0xff]  ;;  %v1657_v30 = vld [vmem:[%s7750_s3 + $0x6f0] sm:$0xff]  ;;  %v169_v36 = vpop.permute.xlu0 %168 }
 0x20e   :  { %vm758_vm5 = vmor %vm702_vm15, %vm742_vm1 }
 0x20f   :  { %1288 = vst [vmem:[#allocation2 + $0x12] sm:$0x3] %v1286_v10  ;;  %v1299_v37 = vcombine.high %v1296_v15, %v1296_v15  ;;  %vm759_vm7 = vmor %vm703_vm3, %vm743_vm2  ;;  %v4405_v10 = vpack.c.bf16 %v1640_v6, %v1639_v28  ;;  %v1532_v28 = vld [vmem:[%s7750_s3 + $0x308] sm:$0xff]  ;;  %v1549_v6 = vld [vmem:[%s7750_s3 + $0x390] sm:$0xff] }
 0x211   :  { %1301 = vst [vmem:[#allocation2 + $0x16] sm:$0x3] %v1299_v37  ;;  %v782_v38 = vpop.permute.xlu1 %781  ;;  %v4407_v37 = vpack.c.bf16 %v1658_v8, %v1657_v30  ;;  %v337_v44 = vpop.permute.xlu0 %336  ;;  %v6587_v8 = vrot.slane %v1979_v26, %v5819_v17  ;;  %v1540_v26 = vld [vmem:[%s7750_s3 + $0x348] sm:$0xff] }
 0x212   :  { %vm798_vm4 = vcmp.eq.s32.totalorder %v5237_v29, %v782_v38  ;;  %vm799_vm6 = vcmp.eq.s32.totalorder %v5249_v35, %v782_v38  ;;  %v1641_v38 = vld [vmem:[%s7750_s3 + $0x670] sm:$0xff] }
 0x213   :  { %vm814_vm8 = vmor %vm758_vm5, %vm798_vm4  ;;  %vm1023_vm4 = vcmp.eq.s32.totalorder %v5249_v35, %v1006_v42  ;;  %v4409_v39 = vpack.c.bf16 %v1642_v49, %v1641_v38  ;;  %v4285_v38 = vpack.c.bf16 %v1532_v28, %v1531_v55  ;;  %v1533_v49 = vld [vmem:[%s7750_s3 + $0x310] sm:$0xff] }
 0x214   :  { %vm815_vm10 = vmor %vm759_vm7, %vm799_vm6  ;;  %vm1022_vm6 = vcmp.eq.s32.totalorder %v5237_v29, %v1006_v42  ;;  %v1541_v55 = vld [vmem:[%s7750_s3 + $0x350] sm:$0xff] }
 0x215   :  { %vm870_vm13 = vmor %vm814_vm8, %vm854_vm9 }
 0x216   :  { %v894_v2 = vpop.permute.xlu1 %893  ;;  %vm871_vm0 = vmor %vm815_vm10, %vm855_vm11 }
 0x217   :  { %vm910_vm12 = vcmp.eq.s32.totalorder %v5237_v29, %v894_v2  ;;  %vm911_vm14 = vcmp.eq.s32.totalorder %v5249_v35, %v894_v2  ;;  %v1707_v2 = vld [vmem:[%s7750_s3 + $0x880] sm:$0xff] }
 0x218   :  { %v6386_v20 = vld [vmem:[#allocation2 + $0x10] sm:$0xff]  ;;  %vm926_vm1 = vmor %vm870_vm13, %vm910_vm12  ;;  %v4443_v42 = vpack.c.bf16 %v1708_v12, %v1707_v2  ;;  %v1698_v12 = vld [vmem:[%s7750_s3 + $0x838] sm:$0xff] }
 0x219   :  { %v2003_v4 = vrot.slane %v6386_v20, %v5819_v17  ;;  %vm927_vm15 = vmor %vm871_vm0, %vm911_vm14  ;;  %vm184_vm0 = vcmp.eq.s32.totalorder %v5237_v29, %v169_v36  ;;  %v1697_v2 = vld [vmem:[%s7750_s3 + $0x830] sm:$0xff] }
 0x21b   :  { %v950_v46 = vpop.permute.xlu1 %949  ;;  %v2011_v33 = vcombine.high %v2003_v4, %v2003_v4 }
 0x21c   :  { %vm966_vm2 = vcmp.eq.s32.totalorder %v5237_v29, %v950_v46  ;;  %vm967_vm3 = vcmp.eq.s32.totalorder %v5249_v35, %v950_v46  ;;  %v505_v46 = vpop.permute.xlu0 %504 }
 0x21d   :  { %vm982_vm5 = vmor %vm926_vm1, %vm966_vm2  ;;  %2474 = vmatprep.mubr.f32.mxu1 %v2011_v33 }
 0x21e   :  { %vm983_vm7 = vmor %vm927_vm15, %vm967_vm3  ;;  %2475 = vmatmul.mubr.f32.vlgmr.msra.gmra.mrb[4].mxu1 %v2003_v4  ;;  %vm185_vm15 = vcmp.eq.s32.totalorder %v5249_v35, %v169_v36  ;;  %v1550_v36 = vld [vmem:[%s7750_s3 + $0x398] sm:$0xff] }
 0x21f   :  { %vm1039_vm8 = vmor %vm983_vm7, %vm1023_vm4  ;;  %4382 = vmatpush3.bf16.msra.mxu1 %v4381_v14 }
 0x220   :  { %v6419_v3 = vpop.permute.xlu1 %72  ;;  %v3491_v52 = vsel %vm1039_vm8, 1.0, %v4941_v54  ;;  %vm1038_vm9 = vmor %vm982_vm5, %vm1022_vm6  ;;  %4384 = vmatprep.subr.bf16.mxu1 %v4383_v24  ;;  %v1214_v24 = vld [vmem:[%s7748_s1 + $0x18] sm:$0xff] }
 0x221   :  { %1200 = vmatprep.mubr.f32.mxu0 %v3491_v52  ;;  %v3490_v57 = vsel %vm1038_vm9, 1.0, %v4941_v54  ;;  %vm88_vm12 = vcmp.eq.s32.totalorder %v5237_v29, %v6419_v3  ;;  %vm89_vm13 = vcmp.eq.s32.totalorder %v5249_v35, %v6419_v3  ;;  %v673_v3 = vpop.permute.xlu0 %672 }
 0x222   :  { %1201 = vmatmul.mubr.f32.gmra.mrb[12].mxu0 %v3490_v57 }
 0x223   :  { %4386 = vmatpush3.bf16.msra.mxu1 %v4385_v51 }
 0x224   :  { %4388 = vmatprep.subr.bf16.mxu1 %v4387_v53 }
 0x225   :  { %v113_v27 = vpop.permute.xlu1 %112  ;;  %v841_v58 = vpop.permute.xlu0 %840 }
 0x226   :  { %vm128_vm10 = vcmp.eq.s32.totalorder %v5237_v29, %v113_v27  ;;  %vm129_vm11 = vcmp.eq.s32.totalorder %v5249_v35, %v113_v27 }
 0x227   :  { %4390 = vmatpush3.bf16.msra.mxu1 %v4389_v32  ;;  %vm144_vm14 = vmor %vm88_vm12, %vm128_vm10 }
 0x228   :  { %4392 = vmatprep.subr.bf16.mxu1 %v4391_v59  ;;  %vm145_vm1 = vmor %vm89_vm13, %vm129_vm11  ;;  %vm352_vm11 = vcmp.eq.s32.totalorder %v5237_v29, %v337_v44  ;;  %vm353_vm13 = vcmp.eq.s32.totalorder %v5249_v35, %v337_v44  ;;  %v1691_v59 = vld [vmem:[%s7750_s3 + $0x800] sm:$0xff] }
 0x229   :  { %vm200_vm3 = vmor %vm144_vm14, %vm184_vm0  ;;  %v1009_v61 = vpop.permute.xlu0 %1008  ;;  %v4445_v19 = vpack.c.bf16 %v1692_v60, %v1691_v59  ;;  %v1715_v44 = vld [vmem:[%s7750_s3 + $0x8c0] sm:$0xff]  ;;  %v1537_v59 = vld [vmem:[%s7750_s3 + $0x330] sm:$0xff] }
 0x22a   :  { %v225_v21 = vpop.permute.xlu1 %224  ;;  %vm201_vm5 = vmor %vm145_vm1, %vm185_vm15 }
 0x22b   :  { %4394 = vmatpush3.bf16.msra.mxu1 %v4393_v63  ;;  %vm240_vm2 = vcmp.eq.s32.totalorder %v5237_v29, %v225_v21  ;;  %vm241_vm4 = vcmp.eq.s32.totalorder %v5249_v35, %v225_v21  ;;  %v4873_v63 = vld [vmem:[#allocation2] sm:$0xff]  ;;  %v1693_v21 = vld [vmem:[%s7750_s3 + $0x810] sm:$0xff] }
 0x22c   :  { %4396 = vmatprep.subr.bf16.mxu1 %v4395_v0  ;;  %vm256_vm7 = vmor %vm200_vm3, %vm240_vm2  ;;  %v1962_v0 = vcombine.high %v4873_v63, %v4873_v63  ;;  %v1719_v63 = vld [vmem:[%s7750_s3 + $0x8e0] sm:$0xff] }
 0x22d   :  { %vm257_vm9 = vmor %vm201_vm5, %vm241_vm4 }
 0x22e   :  { %v1976_v16 = vrot.slane %v1962_v0, %v5819_v17  ;;  %v1720_v0 = vld [vmem:[%s7750_s3 + $0x8e8] sm:$0xff] }
 0x22f   :  { %v281_v40 = vpop.permute.xlu1 %280  ;;  %4398 = vmatpush3.bf16.msra.mxu1 %v4397_v25  ;;  %v1694_v25 = vld [vmem:[%s7750_s3 + $0x818] sm:$0xff] }
 0x230   :  { %4400 = vmatprep.subr.bf16.mxu1 %v4399_v41  ;;  %vm296_vm6 = vcmp.eq.s32.totalorder %v5237_v29, %v281_v40  ;;  %vm297_vm8 = vcmp.eq.s32.totalorder %v5249_v35, %v281_v40  ;;  %v1711_v41 = vld [vmem:[%s7750_s3 + $0x8a0] sm:$0xff]  ;;  %v4449_v9 = vpack.c.bf16 %v1694_v25, %v1693_v21  ;;  %v1978_v30 = vcombine.high %v1976_v16, %v1976_v16 }
 0x231   :  { %vm312_vm10 = vmor %vm256_vm7, %vm296_vm6  ;;  %vm520_vm7 = vcmp.eq.s32.totalorder %v5237_v29, %v505_v46  ;;  %v1695_v40 = vld [vmem:[%s7750_s3 + $0x820] sm:$0xff]  ;;  %v4467_v25 = vpack.c.bf16 %v1720_v0, %v1719_v63 }
 0x232   :  { %vm313_vm12 = vmor %vm257_vm9, %vm297_vm8  ;;  %vm521_vm9 = vcmp.eq.s32.totalorder %v5249_v35, %v505_v46  ;;  %v1995_v46 = vcombine.high %v6587_v8, %v6587_v8  ;;  %v1539_v21 = vld [vmem:[%s7750_s3 + $0x340] sm:$0xff] }
 0x233   :  { %4402 = vmatpush3.bf16.msra.mxu1 %v4401_v23  ;;  %vm368_vm0 = vmor %vm312_vm10, %vm352_vm11  ;;  %v1696_v23 = vld [vmem:[%s7750_s3 + $0x828] sm:$0xff] }
 0x234   :  { %v393_v15 = vpop.permute.xlu1 %392  ;;  %4404 = vmatprep.subr.bf16.mxu1 %v4403_v47  ;;  %vm369_vm15 = vmor %vm313_vm12, %vm353_vm13 }
 0x235   :  { %vm408_vm14 = vcmp.eq.s32.totalorder %v5237_v29, %v393_v15  ;;  %vm409_vm1 = vcmp.eq.s32.totalorder %v5249_v35, %v393_v15  ;;  %v1714_v15 = vld [vmem:[%s7750_s3 + $0x8b8] sm:$0xff] }
 0x236   :  { %vm424_vm3 = vmor %vm368_vm0, %vm408_vm14 }
 0x237   :  { %4406 = vmatpush3.bf16.msra.mxu1 %v4405_v10  ;;  %vm425_vm5 = vmor %vm369_vm15, %vm409_vm1  ;;  %v1713_v10 = vld [vmem:[%s7750_s3 + $0x8b0] sm:$0xff] }
 0x238   :  { %4408 = vmatprep.subr.bf16.mxu1 %v4407_v37  ;;  %v4453_v37 = vpack.c.bf16 %v1696_v23, %v1695_v40  ;;  %v1558_v40 = vld [vmem:[%s7750_s3 + $0x3d8] sm:$0xff] }
 0x239   :  { %v449_v4 = vpop.permute.xlu1 %448 }
 0x23a   :  { %vm464_vm2 = vcmp.eq.s32.totalorder %v5237_v29, %v449_v4  ;;  %vm465_vm4 = vcmp.eq.s32.totalorder %v5249_v35, %v449_v4  ;;  %v4455_v4 = vpack.c.bf16 %v1714_v15, %v1713_v10  ;;  %v1542_v10 = vld [vmem:[%s7750_s3 + $0x358] sm:$0xff]  ;;  %v1771_v15 = vld [vmem:[%s7750_s3 + $0xa80] sm:$0xff] }
 0x23b   :  { %4410 = vmatpush3.bf16.msra.mxu1 %v4409_v39  ;;  %vm480_vm6 = vmor %vm424_vm3, %vm464_vm2  ;;  %vm688_vm3 = vcmp.eq.s32.totalorder %v5237_v29, %v673_v3  ;;  %v4287_v39 = vpack.c.bf16 %v1550_v36, %v1549_v6  ;;  %v1705_v6 = vld [vmem:[%s7750_s3 + $0x870] sm:$0xff] }
 0x23c   :  { %4444 = vmatprep.subr.bf16.mxu1 %v4443_v42  ;;  %vm481_vm8 = vmor %vm425_vm5, %vm465_vm4  ;;  %vm689_vm5 = vcmp.eq.s32.totalorder %v5249_v35, %v673_v3  ;;  %v1534_v42 = vld [vmem:[%s7750_s3 + $0x318] sm:$0xff] }
 0x23d   :  { %vm536_vm11 = vmor %vm480_vm6, %vm520_vm7 }
 0x23e   :  { %v561_v45 = vpop.permute.xlu1 %560  ;;  %vm537_vm13 = vmor %vm481_vm8, %vm521_vm9 }
 0x23f   :  { %vm576_vm10 = vcmp.eq.s32.totalorder %v5237_v29, %v561_v45  ;;  %vm577_vm12 = vcmp.eq.s32.totalorder %v5249_v35, %v561_v45  ;;  %v1716_v45 = vld [vmem:[%s7750_s3 + $0x8c8] sm:$0xff] }
 0x240   :  { %vm592_vm0 = vmor %vm536_vm11, %vm576_vm10 }
 0x241   :  { %v3548_v33 = vpop.f32.mrb[6].mxu0  ;;  %vm593_vm15 = vmor %vm537_vm13, %vm577_vm12 }
 0x242   :  { %v3549_v14 = vpop.f32.mrb[7].mxu0 }
 0x243   :  { %v3550_v34 = vadd.f32 %v3549_v14, %v3548_v33  ;;  %v617_v56 = vpop.permute.xlu1 %616  ;;  %v1551_v33 = vld [vmem:[%s7750_s3 + $0x3a0] sm:$0xff]  ;;  %v1552_v14 = vld [vmem:[%s7750_s3 + $0x3a8] sm:$0xff] }
 0x244   :  { %vm632_vm14 = vcmp.eq.s32.totalorder %v5237_v29, %v617_v56  ;;  %vm633_vm1 = vcmp.eq.s32.totalorder %v5249_v35, %v617_v56  ;;  %v1535_v56 = vld [vmem:[%s7750_s3 + $0x320] sm:$0xff]  ;;  %v4291_v3 = vpack.c.bf16 %v1552_v14, %v1551_v33 }
 0x245   :  { %v1222_v62 = vmul.f32 %v3550_v34, %v1214_v24  ;;  %vm648_vm2 = vmor %vm592_vm0, %vm632_vm14  ;;  %vm856_vm0 = vcmp.eq.s32.totalorder %v5237_v29, %v841_v58  ;;  %v4457_v24 = vpack.c.bf16 %v1698_v12, %v1697_v2  ;;  %v4289_v34 = vpack.c.bf16 %v1534_v42, %v1533_v49  ;;  %v1560_v49 = vld [vmem:[%s7750_s3 + $0x3e8] sm:$0xff] }
 0x246   :  { %vm649_vm4 = vmor %vm593_vm15, %vm633_vm1  ;;  %vm857_vm15 = vcmp.eq.s32.totalorder %v5249_v35, %v841_v58  ;;  %v4305_v12 = vpack.c.bf16 %v1542_v10, %v1541_v55  ;;  %v1601_v55 = vld [vmem:[%s7750_s3 + $0x530] sm:$0xff] }
 0x247   :  { %1302 = vst [vmem:[#allocation2 + $0x18] sm:$0x3] %v1222_v62  ;;  %v1310_v50 = vrot.slane %v1222_v62, %v5819_v17  ;;  %v1314_v51 = vcombine.high %v1222_v62, %v1222_v62  ;;  %vm704_vm7 = vmor %vm648_vm2, %vm688_vm3  ;;  %v4459_v62 = vpack.c.bf16 %v1716_v45, %v1715_v44  ;;  %v1544_v44 = vld [vmem:[%s7750_s3 + $0x368] sm:$0xff]  ;;  %v1561_v45 = vld [vmem:[%s7750_s3 + $0x3f0] sm:$0xff] }
 0x248   :  { %v729_v52 = vpop.permute.xlu1 %728  ;;  %vm705_vm9 = vmor %vm649_vm4, %vm689_vm5 }
 0x249   :  { %v1311_v53 = vcombine.high %v1310_v50, %v1310_v50  ;;  %v1321_v31 = vrot.slane %v1314_v51, %v5819_v17  ;;  %3497 = vst.sshfl [vmem:[#allocation2 + $0x1c] sm:$0x3 pattern:$0x76325410] %v1314_v51  ;;  %vm744_vm6 = vcmp.eq.s32.totalorder %v5237_v29, %v729_v52  ;;  %vm745_vm8 = vcmp.eq.s32.totalorder %v5249_v35, %v729_v52  ;;  %v1699_v50 = vld [vmem:[%s7750_s3 + $0x840] sm:$0xff]  ;;  %v1700_v51 = vld [vmem:[%s7750_s3 + $0x848] sm:$0xff] }
 0x24a   :  { %vm760_vm11 = vmor %vm704_vm7, %vm744_vm6  ;;  %v1536_v52 = vld [vmem:[%s7750_s3 + $0x328] sm:$0xff]  ;;  %v4461_v58 = vpack.c.bf16 %v1700_v51, %v1699_v50  ;;  %v1996_v50 = vcombine.high %v6386_v20, %v6386_v20 }
 0x24b   :  { %1313 = vst [vmem:[#allocation2 + $0x1a] sm:$0x3] %v1311_v53  ;;  %v1324_v43 = vcombine.high %v1321_v31, %v1321_v31  ;;  %vm761_vm13 = vmor %vm705_vm9, %vm745_vm8  ;;  %v1717_v53 = vld [vmem:[%s7750_s3 + $0x8d0] sm:$0xff]  ;;  %v1718_v31 = vld [vmem:[%s7750_s3 + $0x8d8] sm:$0xff] }
 0x24c   :  { %v4463_v60 = vpack.c.bf16 %v1718_v31, %v1717_v53  ;;  %v1595_v53 = vld [vmem:[%s7750_s3 + $0x500] sm:$0xff]  ;;  %v1596_v31 = vld [vmem:[%s7750_s3 + $0x508] sm:$0xff]  ;;  %v6756_v20 = vrot.slane %v1996_v50, %v5819_v17 }
 0x24d   :  { %1326 = vst [vmem:[#allocation2 + $0x1e] sm:$0x3] %v1324_v43  ;;  %v785_v57 = vpop.permute.xlu1 %784  ;;  %v1553_v43 = vld [vmem:[%s7750_s3 + $0x3b0] sm:$0xff] }
 0x24e   :  { %vm800_vm10 = vcmp.eq.s32.totalorder %v5237_v29, %v785_v57  ;;  %vm801_vm12 = vcmp.eq.s32.totalorder %v5249_v35, %v785_v57  ;;  %v1554_v57 = vld [vmem:[%s7750_s3 + $0x3b8] sm:$0xff]  ;;  %v2012_v0 = vcombine.high %v6756_v20, %v6756_v20 }
 0x24f   :  { %vm816_vm14 = vmor %vm760_vm11, %vm800_vm10  ;;  %vm1024_vm10 = vcmp.eq.s32.totalorder %v5237_v29, %v1009_v61  ;;  %v4295_v48 = vpack.c.bf16 %v1554_v57, %v1553_v43  ;;  %v1215_v57 = vld [vmem:[%s7748_s1 + $0x20] sm:$0xff] }
 0x250   :  { %vm817_vm1 = vmor %vm761_vm13, %vm801_vm12  ;;  %vm1025_vm12 = vcmp.eq.s32.totalorder %v5249_v35, %v1009_v61  ;;  %v1701_v61 = vld [vmem:[%s7750_s3 + $0x850] sm:$0xff] }
 0x251   :  { %vm872_vm3 = vmor %vm816_vm14, %vm856_vm0 }
 0x252   :  { %v897_v5 = vpop.permute.xlu1 %896  ;;  %vm873_vm5 = vmor %vm817_vm1, %vm857_vm15  ;;  %vm4944_vm1 = vmmov 0   ;;  %vm3262_vm15 = vcmask 261120  }
 0x253   :  { %vm912_vm2 = vcmp.eq.s32.totalorder %v5237_v29, %v897_v5  ;;  %vm913_vm4 = vcmp.eq.s32.totalorder %v5249_v35, %v897_v5  ;;  %v4293_v5 = vpack.c.bf16 %v1536_v52, %v1535_v56  ;;  %v1611_v56 = vld [vmem:[%s7750_s3 + $0x580] sm:$0xff] }
 0x254   :  { %v6533_v32 = vld [vmem:[#allocation2 + $0x18] sm:$0xff]  ;;  %vm928_vm6 = vmor %vm872_vm3, %vm912_vm2 }
 0x255   :  { %v2020_v27 = vrot.slane %v6533_v32, %v5819_v17  ;;  %vm929_vm7 = vmor %vm873_vm5, %vm913_vm4  ;;  %vm3421_vm4 = vcmask 25600  }
 0x257   :  { %v953_v7 = vpop.permute.xlu1 %952  ;;  %v2028_v13 = vcombine.high %v2020_v27, %v2020_v27 }
 0x258   :  { %vm968_vm8 = vcmp.eq.s32.totalorder %v5237_v29, %v953_v7  ;;  %vm969_vm9 = vcmp.eq.s32.totalorder %v5249_v35, %v953_v7  ;;  %v1712_v29 = vld [vmem:[%s7750_s3 + $0x8a8] sm:$0xff]  ;;  %v1555_v7 = vld [vmem:[%s7750_s3 + $0x3c0] sm:$0xff] }
 0x259   :  { %vm984_vm11 = vmor %vm928_vm6, %vm968_vm8  ;;  %2614 = vmatprep.mubr.f32.mxu1 %v2028_v13  ;;  %v4451_v22 = vpack.c.bf16 %v1712_v29, %v1711_v41  ;;  %v1556_v13 = vld [vmem:[%s7750_s3 + $0x3c8] sm:$0xff]  ;;  %v1703_v41 = vld [vmem:[%s7750_s3 + $0x860] sm:$0xff] }
 0x25a   :  { %vm985_vm13 = vmor %vm929_vm7, %vm969_vm9  ;;  %2615 = vmatmul.mubr.f32.vlgmr.msra.gmra.mrb[6].mxu1 %v2020_v27  ;;  %v1702_v27 = vld [vmem:[%s7750_s3 + $0x858] sm:$0xff]  ;;  %v1704_v29 = vld [vmem:[%s7750_s3 + $0x868] sm:$0xff] }
 0x25b   :  { %vm1040_vm14 = vmor %vm984_vm11, %vm1024_vm10  ;;  %4446 = vmatpush3.bf16.msra.mxu1 %v4445_v19  ;;  %v4465_v19 = vpack.c.bf16 %v1702_v27, %v1701_v61  ;;  %v4469_v23 = vpack.c.bf16 %v1704_v29, %v1703_v41 }
 0x25c   :  { %vm1041_vm0 = vmor %vm985_vm13, %vm1025_vm12  ;;  %v3492_v35 = vsel %vm1040_vm14, 1.0, %v4941_v54  ;;  %4448 = vmatprep.subr.bf16.mxu1 %v4447_v1  ;;  %v4297_v1 = vpack.c.bf16 %v1538_v18, %v1537_v59  ;;  %v1598_v18 = vld [vmem:[%s7750_s3 + $0x518] sm:$0xff] }
 0x25d   :  { %v3493_v47 = vsel %vm1041_vm0, 1.0, %v4941_v54 }
 0x25e   :  { %1205 = vmatprep.mubr.f32.mxu0 %v3493_v47  ;;  %v4301_v47 = vpack.c.bf16 %v1540_v26, %v1539_v21 }
 0x25f   :  { %1206 = vmatmul.mubr.f32.gmra.mrb[14].mxu0 %v3492_v35  ;;  %4450 = vmatpush3.bf16.msra.mxu1 %v4449_v9  ;;  %v1721_v9 = vld [vmem:[%s7750_s3 + $0x8f0] sm:$0xff]  ;;  %v1722_v35 = vld [vmem:[%s7750_s3 + $0x8f8] sm:$0xff] }
 0x260   :  { %2264 = vmatprep.mubr.f32.mxu0 %v1978_v30  ;;  %4452 = vmatprep.subr.bf16.mxu1 %v4451_v22  ;;  %v1557_v22 = vld [vmem:[%s7750_s3 + $0x3d0] sm:$0xff]  ;;  %v4471_v28 = vpack.c.bf16 %v1722_v35, %v1721_v9  ;;  %v1706_v30 = vld [vmem:[%s7750_s3 + $0x878] sm:$0xff]  ;;  %v1599_v9 = vld [vmem:[%s7750_s3 + $0x520] sm:$0xff] }
 0x261   :  { %v4303_v36 = vpack.c.bf16 %v1558_v40, %v1557_v22  ;;  %v4473_v2 = vpack.c.bf16 %v1706_v30, %v1705_v6  ;;  %v1600_v35 = vld [vmem:[%s7750_s3 + $0x528] sm:$0xff]  ;;  %v1618_v22 = vld [vmem:[%s7750_s3 + $0x5b8] sm:$0xff]  ;;  %v1619_v6 = vld [vmem:[%s7750_s3 + $0x5c0] sm:$0xff] }
 0x262   :  { %v1620_v30 = vld [vmem:[%s7750_s3 + $0x5c8] sm:$0xff] }
 0x263   :  { %2265 = vmatmul.mubr.f32.vlgmr.msra.gmra.mrb[16].mxu0 %v1976_v16  ;;  %4454 = vmatpush3.bf16.msra.mxu1 %v4453_v37  ;;  %v4299_v16 = vpack.c.bf16 %v1556_v13, %v1555_v7  ;;  %v1772_v37 = vld [vmem:[%s7750_s3 + $0xa88] sm:$0xff]  ;;  %v1615_v7 = vld [vmem:[%s7750_s3 + $0x5a0] sm:$0xff]  ;;  %v4363_v10 = vpack.c.bf16 %v1620_v30, %v1619_v6 }
 0x264   :  { %4286 = vmatpush3.bf16.msra.mxu0 %v4285_v38  ;;  %2404 = vmatprep.mubr.f32.mxu0 %v1995_v46  ;;  %v1559_v38 = vld [vmem:[%s7750_s3 + $0x3e0] sm:$0xff]  ;;  %v1562_v46 = vld [vmem:[%s7750_s3 + $0x3f8] sm:$0xff]  ;;  %v1616_v13 = vld [vmem:[%s7750_s3 + $0x5a8] sm:$0xff] }
 0x265   :  { %4288 = vmatprep.subr.bf16.mxu0 %v4287_v39  ;;  %4456 = vmatprep.subr.bf16.mxu1 %v4455_v4  ;;  %v4507_v39 = vpack.c.bf16 %v1772_v37, %v1771_v15  ;;  %v4307_v42 = vpack.c.bf16 %v1560_v49, %v1559_v38  ;;  %v1543_v4 = vld [vmem:[%s7750_s3 + $0x360] sm:$0xff]  ;;  %v4311_v14 = vpack.c.bf16 %v1562_v46, %v1561_v45  ;;  %v1604_v37 = vld [vmem:[%s7750_s3 + $0x548] sm:$0xff]  ;;  %v1621_v38 = vld [vmem:[%s7750_s3 + $0x5d0] sm:$0xff] }
 0x266   :  { %v4309_v33 = vpack.c.bf16 %v1544_v44, %v1543_v4  ;;  %v4355_v26 = vpack.c.bf16 %v1616_v13, %v1615_v7  ;;  %v1603_v15 = vld [vmem:[%s7750_s3 + $0x540] sm:$0xff]  ;;  %v1622_v49 = vld [vmem:[%s7750_s3 + $0x5d8] sm:$0xff]  ;;  %v1756_v4 = vld [vmem:[%s7750_s3 + $0xa08] sm:$0xff] }
 0x267   :  { %4458 = vmatpush3.bf16.msra.mxu1 %v4457_v24  ;;  %v1545_v24 = vld [vmem:[%s7750_s3 + $0x370] sm:$0xff]  ;;  %v4367_v44 = vpack.c.bf16 %v1622_v49, %v1621_v38  ;;  %v1606_v46 = vld [vmem:[%s7750_s3 + $0x558] sm:$0xff] }
 0x268   :  { %4290 = vmatpush3.bf16.msra.mxu0 %v4289_v34  ;;  %4460 = vmatprep.subr.bf16.mxu1 %v4459_v62  ;;  %v1546_v34 = vld [vmem:[%s7750_s3 + $0x378] sm:$0xff]  ;;  %v1612_v62 = vld [vmem:[%s7750_s3 + $0x588] sm:$0xff]  ;;  %v1777_v13 = vld [vmem:[%s7750_s3 + $0xab0] sm:$0xff] }
 0x269   :  { %4292 = vmatprep.subr.bf16.mxu0 %v4291_v3  ;;  %v4313_v51 = vpack.c.bf16 %v1546_v34, %v1545_v24  ;;  %v4347_v52 = vpack.c.bf16 %v1612_v62, %v1611_v56  ;;  %v1623_v24 = vld [vmem:[%s7750_s3 + $0x5e0] sm:$0xff]  ;;  %v1624_v34 = vld [vmem:[%s7750_s3 + $0x5e8] sm:$0xff]  ;;  %v1610_v7 = vld [vmem:[%s7750_s3 + $0x578] sm:$0xff] }
 0x26a   :  { %v1662_v38 = vld [vmem:[%s7750_s3 + $0x718] sm:$0xff] }
 0x26b   :  { %4462 = vmatpush3.bf16.msra.mxu1 %v4461_v58  ;;  %v1613_v58 = vld [vmem:[%s7750_s3 + $0x590] sm:$0xff] }
 0x26c   :  { %4294 = vmatpush3.bf16.msra.mxu0 %v4293_v5  ;;  %4464 = vmatprep.subr.bf16.mxu1 %v4463_v60  ;;  %v1614_v5 = vld [vmem:[%s7750_s3 + $0x598] sm:$0xff]  ;;  %v4349_v60 = vpack.c.bf16 %v1596_v31, %v1595_v53  ;;  %v4371_v31 = vpack.c.bf16 %v1624_v34, %v1623_v24  ;;  %v1765_v24 = vld [vmem:[%s7750_s3 + $0xa50] sm:$0xff] }
 0x26d   :  { %4296 = vmatprep.subr.bf16.mxu0 %v4295_v48  ;;  %v4351_v27 = vpack.c.bf16 %v1614_v5, %v1613_v58  ;;  %v1597_v48 = vld [vmem:[%s7750_s3 + $0x510] sm:$0xff]  ;;  %v1758_v53 = vld [vmem:[%s7750_s3 + $0xa18] sm:$0xff]  ;;  %v1776_v58 = vld [vmem:[%s7750_s3 + $0xaa8] sm:$0xff] }
 0x26e   :  { %v4353_v41 = vpack.c.bf16 %v1598_v18, %v1597_v48  ;;  %v1625_v5 = vld [vmem:[%s7750_s3 + $0x5f0] sm:$0xff]  ;;  %v1759_v18 = vld [vmem:[%s7750_s3 + $0xa20] sm:$0xff]  ;;  %v1766_v34 = vld [vmem:[%s7750_s3 + $0xa58] sm:$0xff] }
 0x26f   :  { %4466 = vmatpush3.bf16.msra.mxu1 %v4465_v19 }
 0x270   :  { %4298 = vmatpush3.bf16.msra.mxu0 %v4297_v1  ;;  %4468 = vmatprep.subr.bf16.mxu1 %v4467_v25 }
 0x271   :  { %4300 = vmatprep.subr.bf16.mxu0 %v4299_v16 }
 0x273   :  { %4470 = vmatpush3.bf16.msra.mxu1 %v4469_v23  ;;  %v4357_v23 = vpack.c.bf16 %v1600_v35, %v1599_v9  ;;  %v1761_v9 = vld [vmem:[%s7750_s3 + $0xa30] sm:$0xff]  ;;  %v1762_v35 = vld [vmem:[%s7750_s3 + $0xa38] sm:$0xff] }
 0x274   :  { %4302 = vmatpush3.bf16.msra.mxu0 %v4301_v47  ;;  %4472 = vmatprep.subr.bf16.mxu1 %v4471_v28  ;;  %v1602_v28 = vld [vmem:[%s7750_s3 + $0x538] sm:$0xff]  ;;  %v4521_v6 = vpack.c.bf16 %v1762_v35, %v1761_v9 }
 0x275   :  { %4304 = vmatprep.subr.bf16.mxu0 %v4303_v36  ;;  %v4361_v36 = vpack.c.bf16 %v1602_v28, %v1601_v55  ;;  %v1779_v55 = vld [vmem:[%s7750_s3 + $0xac0] sm:$0xff]  ;;  %v1780_v28 = vld [vmem:[%s7750_s3 + $0xac8] sm:$0xff] }
 0x276   :  { %v4523_v49 = vpack.c.bf16 %v1780_v28, %v1779_v55  ;;  %v1688_v55 = vld [vmem:[%s7750_s3 + $0x7e8] sm:$0xff] }
 0x277   :  { %4474 = vmatpush3.bf16.msra.mxu1 %v4473_v2  ;;  %v1605_v2 = vld [vmem:[%s7750_s3 + $0x550] sm:$0xff] }
 0x278   :  { %4306 = vmatpush3.bf16.msra.mxu0 %v4305_v12  ;;  %4508 = vmatprep.subr.bf16.mxu1 %v4507_v39  ;;  %v4365_v12 = vpack.c.bf16 %v1604_v37, %v1603_v15  ;;  %v4369_v50 = vpack.c.bf16 %v1606_v46, %v1605_v2  ;;  %v1764_v15 = vld [vmem:[%s7750_s3 + $0xa48] sm:$0xff]  ;;  %v1781_v2 = vld [vmem:[%s7750_s3 + $0xad0] sm:$0xff] }
 0x279   :  { %4308 = vmatprep.subr.bf16.mxu0 %v4307_v42  ;;  %v1755_v42 = vld [vmem:[%s7750_s3 + $0xa00] sm:$0xff] }
 0x27a   :  { %v4509_v62 = vpack.c.bf16 %v1756_v4, %v1755_v42  ;;  %v1679_v4 = vld [vmem:[%s7750_s3 + $0x7a0] sm:$0xff] }
 0x27c   :  { %4310 = vmatpush3.bf16.msra.mxu0 %v4309_v33  ;;  %v1773_v33 = vld [vmem:[%s7750_s3 + $0xa90] sm:$0xff] }
 0x27d   :  { %v3551_v3 = vpop.f32.mrb[8].mxu0  ;;  %4312 = vmatprep.subr.bf16.mxu0 %v4311_v14  ;;  %v1774_v14 = vld [vmem:[%s7750_s3 + $0xa98] sm:$0xff] }
 0x27e   :  { %v3552_v43 = vpop.f32.mrb[9].mxu0 }
 0x27f   :  { %v3553_v59 = vadd.f32 %v3552_v43, %v3551_v3  ;;  %v4511_v3 = vpack.c.bf16 %v1774_v14, %v1773_v33  ;;  %v1608_v43 = vld [vmem:[%s7750_s3 + $0x568] sm:$0xff]  ;;  %v1663_v33 = vld [vmem:[%s7750_s3 + $0x720] sm:$0xff] }
 0x280   :  { %4314 = vmatpush3.bf16.msra.mxu0 %v4313_v51  ;;  %v3595_v63 = vpop.f32.mrb[0].mxu1  ;;  %v1607_v51 = vld [vmem:[%s7750_s3 + $0x560] sm:$0xff] }
 0x281   :  { %v1223_v61 = vmul.f32 %v3553_v59, %v1215_v57  ;;  %4348 = vmatprep.subr.bf16.mxu0 %v4347_v52  ;;  %v3596_v19 = vpop.f32.mrb[1].mxu1  ;;  %v1757_v52 = vld [vmem:[%s7750_s3 + $0xa10] sm:$0xff]  ;;  %v1775_v57 = vld [vmem:[%s7750_s3 + $0xaa0] sm:$0xff]  ;;  %v1626_v59 = vld [vmem:[%s7750_s3 + $0x5f8] sm:$0xff] }
 0x282   :  { %v6780_v25 = vadd.f32 %v3596_v19, %v3595_v63  ;;  %v4515_v48 = vpack.c.bf16 %v1776_v58, %v1775_v57  ;;  %v1760_v63 = vld [vmem:[%s7750_s3 + $0xa28] sm:$0xff]  ;;  %v1778_v19 = vld [vmem:[%s7750_s3 + $0xab8] sm:$0xff]  ;;  %v1767_v57 = vld [vmem:[%s7750_s3 + $0xa60] sm:$0xff] }
 0x283   :  { %1327 = vst [vmem:[#allocation2 + $0x20] sm:$0x3] %v1223_v61  ;;  %v1335_v1 = vrot.slane %v1223_v61, %v5819_v17  ;;  %v1339_v21 = vcombine.high %v1223_v61, %v1223_v61  ;;  %2405 = vmatmul.mubr.f32.vlgmr.msra.gmra.mrb[18].mxu0 %v6587_v8  ;;  %v1617_v8 = vld [vmem:[%s7750_s3 + $0x5b0] sm:$0xff]  ;;  %v4373_v61 = vpack.c.bf16 %v1608_v43, %v1607_v51  ;;  %v1768_v58 = vld [vmem:[%s7750_s3 + $0xa68] sm:$0xff] }
 0x284   :  { %4350 = vmatpush3.bf16.msra.mxu0 %v4349_v60  ;;  %2544 = vmatprep.mubr.f32.mxu0 %v2012_v0  ;;  %v4359_v47 = vpack.c.bf16 %v1618_v22, %v1617_v8  ;;  %v4513_v60 = vpack.c.bf16 %v1758_v53, %v1757_v52  ;;  %v4375_v0 = vpack.c.bf16 %v1626_v59, %v1625_v5  ;;  %v1660_v22 = vld [vmem:[%s7750_s3 + $0x708] sm:$0xff]  ;;  %v1681_v51 = vld [vmem:[%s7750_s3 + $0x7b0] sm:$0xff]  ;;  %v1666_v59 = vld [vmem:[%s7750_s3 + $0x738] sm:$0xff] }
 0x285   :  { %v1336_v29 = vcombine.high %v1335_v1, %v1335_v1  ;;  %v1346_v16 = vrot.slane %v1339_v21, %v5819_v17  ;;  %3498 = vst.sshfl [vmem:[#allocation2 + $0x24] sm:$0x3 pattern:$0x76325410] %v1339_v21  ;;  %4352 = vmatprep.subr.bf16.mxu0 %v4351_v27  ;;  %v1609_v27 = vld [vmem:[%s7750_s3 + $0x570] sm:$0xff]  ;;  %v1675_v1 = vld [vmem:[%s7750_s3 + $0x780] sm:$0xff]  ;;  %v4529_v52 = vpack.c.bf16 %v1766_v34, %v1765_v24 }
 0x286   :  { %v1676_v21 = vld [vmem:[%s7750_s3 + $0x788] sm:$0xff] }
 0x287   :  { %1338 = vst [vmem:[#allocation2 + $0x22] sm:$0x3] %v1336_v29  ;;  %v1349_v40 = vcombine.high %v1346_v16, %v1346_v16  ;;  %v4517_v29 = vpack.c.bf16 %v1760_v63, %v1759_v18  ;;  %v4377_v16 = vpack.c.bf16 %v1610_v7, %v1609_v27  ;;  %v4411_v8 = vpack.c.bf16 %v1676_v21, %v1675_v1  ;;  %v1683_v27 = vld [vmem:[%s7750_s3 + $0x7c0] sm:$0xff]  ;;  %v1668_v21 = vld [vmem:[%s7750_s3 + $0x748] sm:$0xff] }
 0x288   :  { %4354 = vmatpush3.bf16.msra.mxu0 %v4353_v41  ;;  %v2013_v41 = vcombine.high %v6533_v32, %v6533_v32  ;;  %v1659_v32 = vld [vmem:[%s7750_s3 + $0x700] sm:$0xff]  ;;  %v4533_v18 = vpack.c.bf16 %v1768_v58, %v1767_v57 }
 0x289   :  { %1351 = vst [vmem:[#allocation2 + $0x26] sm:$0x3] %v1349_v40  ;;  %4356 = vmatprep.subr.bf16.mxu0 %v4355_v26  ;;  %v4519_v26 = vpack.c.bf16 %v1778_v19, %v1777_v13  ;;  %v1677_v40 = vld [vmem:[%s7750_s3 + $0x790] sm:$0xff]  ;;  %v4413_v30 = vpack.c.bf16 %v1660_v22, %v1659_v32  ;;  %v1770_v19 = vld [vmem:[%s7750_s3 + $0xa78] sm:$0xff] }
 0x28a   :  { %v1769_v13 = vld [vmem:[%s7750_s3 + $0xa70] sm:$0xff] }
 0x28b   :  { %v4537_v9 = vpack.c.bf16 %v1770_v19, %v1769_v13  ;;  %v1669_v22 = vld [vmem:[%s7750_s3 + $0x750] sm:$0xff]  ;;  %v1728_v13 = vld [vmem:[%s7750_s3 + $0x928] sm:$0xff] }
 0x28c   :  { %4358 = vmatpush3.bf16.msra.mxu0 %v4357_v23  ;;  %v6913_v23 = vrot.slane %v2013_v41, %v5819_v17  ;;  %v1835_v41 = vld [vmem:[%s7750_s3 + $0xc80] sm:$0xff]  ;;  %v1745_v19 = vld [vmem:[%s7750_s3 + $0x9b0] sm:$0xff] }
 0x28d   :  { %4360 = vmatprep.subr.bf16.mxu0 %v4359_v47  ;;  %v1678_v47 = vld [vmem:[%s7750_s3 + $0x798] sm:$0xff] }
 0x28e   :  { %v4415_v37 = vpack.c.bf16 %v1678_v47, %v1677_v40  ;;  %v2029_v42 = vcombine.high %v6913_v23, %v6913_v23  ;;  %v1670_v40 = vld [vmem:[%s7750_s3 + $0x758] sm:$0xff]  ;;  %v1687_v47 = vld [vmem:[%s7750_s3 + $0x7e0] sm:$0xff] }
 0x28f   :  { %v4433_v28 = vpack.c.bf16 %v1670_v40, %v1669_v22  ;;  %v1820_v22 = vld [vmem:[%s7750_s3 + $0xc08] sm:$0xff] }
 0x290   :  { %4362 = vmatpush3.bf16.msra.mxu0 %v4361_v36  ;;  %v6822_v39 = vld [vmem:[#allocation2 + $0x20] sm:$0xff]  ;;  %v1661_v36 = vld [vmem:[%s7750_s3 + $0x710] sm:$0xff] }
 0x291   :  { %4364 = vmatprep.subr.bf16.mxu0 %v4363_v10  ;;  %v2037_v45 = vrot.slane %v6822_v39, %v5819_v17  ;;  %v1763_v10 = vld [vmem:[%s7750_s3 + $0xa40] sm:$0xff]  ;;  %v4417_v46 = vpack.c.bf16 %v1662_v38, %v1661_v36  ;;  %v1690_v38 = vld [vmem:[%s7750_s3 + $0x7f8] sm:$0xff]  ;;  %v2030_v24 = vcombine.high %v6822_v39, %v6822_v39  ;;  %v1741_v39 = vld [vmem:[%s7750_s3 + $0x990] sm:$0xff] }
 0x292   :  { %v1671_v36 = vld [vmem:[%s7750_s3 + $0x760] sm:$0xff] }
 0x293   :  { %v2045_v56 = vcombine.high %v2037_v45, %v2037_v45 }
 0x294   :  { %4366 = vmatpush3.bf16.msra.mxu0 %v4365_v12  ;;  %v1782_v12 = vld [vmem:[%s7750_s3 + $0xad8] sm:$0xff] }
 0x295   :  { %4368 = vmatprep.subr.bf16.mxu0 %v4367_v44  ;;  %2754 = vmatprep.mubr.f32.mxu1 %v2045_v56  ;;  %v1680_v44 = vld [vmem:[%s7750_s3 + $0x7a8] sm:$0xff]  ;;  %v4527_v14 = vpack.c.bf16 %v1782_v12, %v1781_v2 }
 0x296   :  { %2755 = vmatmul.mubr.f32.vlgmr.msra.gmra.mrb[8].mxu1 %v2037_v45  ;;  %v4525_v45 = vpack.c.bf16 %v1764_v15, %v1763_v10  ;;  %v1664_v56 = vld [vmem:[%s7750_s3 + $0x728] sm:$0xff] }
 0x297   :  { %4510 = vmatpush3.bf16.msra.mxu1 %v4509_v62  ;;  %v1783_v62 = vld [vmem:[%s7750_s3 + $0xae0] sm:$0xff]  ;;  %v4421_v53 = vpack.c.bf16 %v1664_v56, %v1663_v33  ;;  %v1672_v10 = vld [vmem:[%s7750_s3 + $0x768] sm:$0xff] }
 0x298   :  { %4370 = vmatpush3.bf16.msra.mxu0 %v4369_v50  ;;  %4512 = vmatprep.subr.bf16.mxu1 %v4511_v3  ;;  %v1784_v50 = vld [vmem:[%s7750_s3 + $0xae8] sm:$0xff]  ;;  %v1682_v3 = vld [vmem:[%s7750_s3 + $0x7b8] sm:$0xff]  ;;  %v4437_v2 = vpack.c.bf16 %v1672_v10, %v1671_v36  ;;  %v1739_v33 = vld [vmem:[%s7750_s3 + $0x980] sm:$0xff] }
 0x299   :  { %4372 = vmatprep.subr.bf16.mxu0 %v4371_v31  ;;  %v1665_v31 = vld [vmem:[%s7750_s3 + $0x730] sm:$0xff]  ;;  %v4531_v43 = vpack.c.bf16 %v1784_v50, %v1783_v62  ;;  %v4423_v5 = vpack.c.bf16 %v1682_v3, %v1681_v51  ;;  %v1723_v50 = vld [vmem:[%s7750_s3 + $0x900] sm:$0xff]  ;;  %v1724_v51 = vld [vmem:[%s7750_s3 + $0x908] sm:$0xff]  ;;  %v7073_v3 = vrot.slane %v2030_v24, %v5819_v17 }
 0x29a   :  { %v4425_v63 = vpack.c.bf16 %v1666_v59, %v1665_v31  ;;  %v1725_v59 = vld [vmem:[%s7750_s3 + $0x910] sm:$0xff]  ;;  %v1750_v36 = vld [vmem:[%s7750_s3 + $0x9d8] sm:$0xff] }
 0x29b   :  { %4514 = vmatpush3.bf16.msra.mxu1 %v4513_v60  ;;  %v1785_v60 = vld [vmem:[%s7750_s3 + $0xaf0] sm:$0xff] }
 0x29c   :  { %4374 = vmatpush3.bf16.msra.mxu0 %v4373_v61  ;;  %4516 = vmatprep.subr.bf16.mxu1 %v4515_v48  ;;  %v1786_v61 = vld [vmem:[%s7750_s3 + $0xaf8] sm:$0xff]  ;;  %v1684_v48 = vld [vmem:[%s7750_s3 + $0x7c8] sm:$0xff] }
 0x29d   :  { %4376 = vmatprep.subr.bf16.mxu0 %v4375_v0  ;;  %v1667_v0 = vld [vmem:[%s7750_s3 + $0x740] sm:$0xff]  ;;  %v4535_v7 = vpack.c.bf16 %v1786_v61, %v1785_v60  ;;  %v4427_v1 = vpack.c.bf16 %v1684_v48, %v1683_v27  ;;  %v1726_v60 = vld [vmem:[%s7750_s3 + $0x918] sm:$0xff]  ;;  %v2046_v61 = vcombine.high %v7073_v3, %v7073_v3  ;;  %v1744_v48 = vld [vmem:[%s7750_s3 + $0x9a8] sm:$0xff] }
 0x29e   :  { %v4429_v35 = vpack.c.bf16 %v1668_v21, %v1667_v0  ;;  %v1743_v27 = vld [vmem:[%s7750_s3 + $0x9a0] sm:$0xff] }
 0x29f   :  { %4518 = vmatpush3.bf16.msra.mxu1 %v4517_v29  ;;  %v1836_v29 = vld [vmem:[%s7750_s3 + $0xc88] sm:$0xff]  ;;  %v4483_v0 = vpack.c.bf16 %v1744_v48, %v1743_v27  ;;  %v1738_v48 = vld [vmem:[%s7750_s3 + $0x978] sm:$0xff] }
 0x2a0   :  { %4378 = vmatpush3.bf16.msra.mxu0 %v4377_v16  ;;  %4520 = vmatprep.subr.bf16.mxu1 %v4519_v26  ;;  %v1685_v16 = vld [vmem:[%s7750_s3 + $0x7d0] sm:$0xff]  ;;  %v1686_v26 = vld [vmem:[%s7750_s3 + $0x7d8] sm:$0xff] }
 0x2a1   :  { %4412 = vmatprep.subr.bf16.mxu0 %v4411_v8  ;;  %v4571_v8 = vpack.c.bf16 %v1836_v29, %v1835_v41  ;;  %v4431_v32 = vpack.c.bf16 %v1686_v26, %v1685_v16  ;;  %v1729_v41 = vld [vmem:[%s7750_s3 + $0x930] sm:$0xff]  ;;  %v1730_v29 = vld [vmem:[%s7750_s3 + $0x938] sm:$0xff]  ;;  %v1747_v16 = vld [vmem:[%s7750_s3 + $0x9c0] sm:$0xff] }
 0x2a2   :  { %v1748_v26 = vld [vmem:[%s7750_s3 + $0x9c8] sm:$0xff] }
 0x2a3   :  { %2545 = vmatmul.mubr.f32.vlgmr.msra.gmra.mrb[20].mxu0 %v6756_v20  ;;  %4522 = vmatpush3.bf16.msra.mxu1 %v4521_v6  ;;  %v4419_v20 = vpack.c.bf16 %v1680_v44, %v1679_v4  ;;  %v1673_v4 = vld [vmem:[%s7750_s3 + $0x770] sm:$0xff]  ;;  %v1674_v44 = vld [vmem:[%s7750_s3 + $0x778] sm:$0xff]  ;;  %v4491_v40 = vpack.c.bf16 %v1748_v26, %v1747_v16  ;;  %v1787_v16 = vld [vmem:[%s7750_s3 + $0xb00] sm:$0xff] }
 0x2a4   :  { %4414 = vmatpush3.bf16.msra.mxu0 %v4413_v30  ;;  %2684 = vmatprep.mubr.f32.mxu0 %v2029_v42  ;;  %v4435_v30 = vpack.c.bf16 %v1688_v55, %v1687_v47  ;;  %v1732_v55 = vld [vmem:[%s7750_s3 + $0x948] sm:$0xff] }
 0x2a5   :  { %4416 = vmatprep.subr.bf16.mxu0 %v4415_v37  ;;  %4524 = vmatprep.subr.bf16.mxu1 %v4523_v49  ;;  %v1689_v37 = vld [vmem:[%s7750_s3 + $0x7f0] sm:$0xff]  ;;  %v1788_v26 = vld [vmem:[%s7750_s3 + $0xb08] sm:$0xff] }
 0x2a6   :  { %v4439_v42 = vpack.c.bf16 %v1690_v38, %v1689_v37  ;;  %v1733_v38 = vld [vmem:[%s7750_s3 + $0x950] sm:$0xff] }
 0x2a7   :  { %4526 = vmatpush3.bf16.msra.mxu1 %v4525_v45 }
 0x2a8   :  { %4418 = vmatpush3.bf16.msra.mxu0 %v4417_v46  ;;  %4528 = vmatprep.subr.bf16.mxu1 %v4527_v14  ;;  %v1216_v46 = vld [vmem:[%s7748_s1 + $0x28] sm:$0xff] }
 0x2a9   :  { %4420 = vmatprep.subr.bf16.mxu0 %v4419_v20  ;;  %v1740_v14 = vld [vmem:[%s7750_s3 + $0x988] sm:$0xff]  ;;  %v4441_v20 = vpack.c.bf16 %v1674_v44, %v1673_v4  ;;  %v1734_v44 = vld [vmem:[%s7750_s3 + $0x958] sm:$0xff] }
 0x2aa   :  { %v4475_v62 = vpack.c.bf16 %v1740_v14, %v1739_v33  ;;  %v1751_v33 = vld [vmem:[%s7750_s3 + $0x9e0] sm:$0xff]  ;;  %v1752_v14 = vld [vmem:[%s7750_s3 + $0x9e8] sm:$0xff] }
 0x2ab   :  { %4530 = vmatpush3.bf16.msra.mxu1 %v4529_v52  ;;  %v1742_v52 = vld [vmem:[%s7750_s3 + $0x998] sm:$0xff] }
 0x2ac   :  { %4422 = vmatpush3.bf16.msra.mxu0 %v4421_v53  ;;  %4532 = vmatprep.subr.bf16.mxu1 %v4531_v43  ;;  %v4477_v43 = vpack.c.bf16 %v1724_v51, %v1723_v50  ;;  %v1824_v50 = vld [vmem:[%s7750_s3 + $0xc28] sm:$0xff]  ;;  %v4499_v51 = vpack.c.bf16 %v1752_v14, %v1751_v33 }
 0x2ad   :  { %4424 = vmatprep.subr.bf16.mxu0 %v4423_v5  ;;  %v4479_v5 = vpack.c.bf16 %v1742_v52, %v1741_v39  ;;  %v1736_v39 = vld [vmem:[%s7750_s3 + $0x968] sm:$0xff]  ;;  %v1841_v52 = vld [vmem:[%s7750_s3 + $0xcb0] sm:$0xff] }
 0x2ae   :  { %v1832_v33 = vld [vmem:[%s7750_s3 + $0xc68] sm:$0xff] }
 0x2af   :  { %4534 = vmatpush3.bf16.msra.mxu1 %v4533_v18  ;;  %v1792_v14 = vld [vmem:[%s7750_s3 + $0xb28] sm:$0xff] }
 0x2b0   :  { %4426 = vmatpush3.bf16.msra.mxu0 %v4425_v63  ;;  %4536 = vmatprep.subr.bf16.mxu1 %v4535_v7  ;;  %v4481_v63 = vpack.c.bf16 %v1726_v60, %v1725_v59  ;;  %v1727_v7 = vld [vmem:[%s7750_s3 + $0x920] sm:$0xff]  ;;  %v1825_v60 = vld [vmem:[%s7750_s3 + $0xc30] sm:$0xff] }
 0x2b1   :  { %4428 = vmatprep.subr.bf16.mxu0 %v4427_v1  ;;  %v4485_v1 = vpack.c.bf16 %v1728_v13, %v1727_v7  ;;  %v1804_v7 = vld [vmem:[%s7750_s3 + $0xb88] sm:$0xff] }
 0x2b3   :  { %4538 = vmatpush3.bf16.msra.mxu1 %v4537_v9  ;;  %v1731_v9 = vld [vmem:[%s7750_s3 + $0x940] sm:$0xff] }
 0x2b4   :  { %4430 = vmatpush3.bf16.msra.mxu0 %v4429_v35  ;;  %4572 = vmatprep.subr.bf16.mxu1 %v4571_v8  ;;  %v4489_v35 = vpack.c.bf16 %v1730_v29, %v1729_v41  ;;  %v4493_v37 = vpack.c.bf16 %v1732_v55, %v1731_v9  ;;  %v1828_v41 = vld [vmem:[%s7750_s3 + $0xc48] sm:$0xff]  ;;  %v1805_v9 = vld [vmem:[%s7750_s3 + $0xb90] sm:$0xff] }
 0x2b5   :  { %v3665_v6 = vpop.f32.mrb[2].mxu1  ;;  %4432 = vmatprep.subr.bf16.mxu0 %v4431_v32  ;;  %v1819_v32 = vld [vmem:[%s7750_s3 + $0xc00] sm:$0xff]  ;;  %v1789_v55 = vld [vmem:[%s7750_s3 + $0xb10] sm:$0xff] }
 0x2b6   :  { %v3666_v15 = vpop.f32.mrb[3].mxu1 }
 0x2b7   :  { %v7047_v49 = vadd.f32 %v3666_v15, %v3665_v6  ;;  %v1838_v6 = vld [vmem:[%s7750_s3 + $0xc98] sm:$0xff]  ;;  %v4573_v15 = vpack.c.bf16 %v1820_v22, %v1819_v32  ;;  %v1845_v32 = vld [vmem:[%s7750_s3 + $0xcd0] sm:$0xff] }
 0x2b8   :  { %4434 = vmatpush3.bf16.msra.mxu0 %v4433_v28  ;;  %v1837_v28 = vld [vmem:[%s7750_s3 + $0xc90] sm:$0xff]  ;;  %v1846_v22 = vld [vmem:[%s7750_s3 + $0xcd8] sm:$0xff] }
 0x2b9   :  { %v3554_v12 = vpop.f32.mrb[10].mxu0  ;;  %4436 = vmatprep.subr.bf16.mxu0 %v4435_v30  ;;  %v1749_v30 = vld [vmem:[%s7750_s3 + $0x9d0] sm:$0xff] }
 0x2ba   :  { %v3555_v45 = vpop.f32.mrb[11].mxu0  ;;  %v4495_v4 = vpack.c.bf16 %v1750_v36, %v1749_v30  ;;  %v1790_v36 = vld [vmem:[%s7750_s3 + $0xb18] sm:$0xff] }
 0x2bb   :  { %v3556_v34 = vadd.f32 %v3555_v45, %v3554_v12  ;;  %v1821_v12 = vld [vmem:[%s7750_s3 + $0xc10] sm:$0xff]  ;;  %v1839_v45 = vld [vmem:[%s7750_s3 + $0xca0] sm:$0xff] }
 0x2bc   :  { %4438 = vmatpush3.bf16.msra.mxu0 %v4437_v2  ;;  %v4575_v2 = vpack.c.bf16 %v1838_v6, %v1837_v28  ;;  %v1829_v28 = vld [vmem:[%s7750_s3 + $0xc50] sm:$0xff]  ;;  %v1830_v6 = vld [vmem:[%s7750_s3 + $0xc58] sm:$0xff] }
 0x2bd   :  { %v1224_v56 = vmul.f32 %v3556_v34, %v1216_v46  ;;  %4440 = vmatprep.subr.bf16.mxu0 %v4439_v42  ;;  %v1822_v42 = vld [vmem:[%s7750_s3 + $0xc18] sm:$0xff]  ;;  %v1840_v46 = vld [vmem:[%s7750_s3 + $0xca8] sm:$0xff]  ;;  %v4497_v34 = vpack.c.bf16 %v1734_v44, %v1733_v38  ;;  %v1791_v44 = vld [vmem:[%s7750_s3 + $0xb20] sm:$0xff] }
 0x2be   :  { %v4577_v24 = vpack.c.bf16 %v1822_v42, %v1821_v12  ;;  %v1808_v12 = vld [vmem:[%s7750_s3 + $0xba8] sm:$0xff]  ;;  %v4593_v42 = vpack.c.bf16 %v1830_v6, %v1829_v28  ;;  %v1817_v28 = vld [vmem:[%s7750_s3 + $0xbf0] sm:$0xff]  ;;  %v1818_v6 = vld [vmem:[%s7750_s3 + $0xbf8] sm:$0xff] }
 0x2bf   :  { %1352 = vst [vmem:[#allocation2 + $0x28] sm:$0x3] %v1224_v56  ;;  %v1360_v53 = vrot.slane %v1224_v56, %v5819_v17  ;;  %v1364_v31 = vcombine.high %v1224_v56, %v1224_v56  ;;  %v4579_v56 = vpack.c.bf16 %v1840_v46, %v1839_v45  ;;  %v1831_v46 = vld [vmem:[%s7750_s3 + $0xc60] sm:$0xff] }
 0x2c0   :  { %4442 = vmatpush3.bf16.msra.mxu0 %v4441_v20  ;;  %v1735_v20 = vld [vmem:[%s7750_s3 + $0x960] sm:$0xff] }
 0x2c1   :  { %v1361_v57 = vcombine.high %v1360_v53, %v1360_v53  ;;  %v1371_v58 = vrot.slane %v1364_v31, %v5819_v17  ;;  %3499 = vst.sshfl [vmem:[#allocation2 + $0x2c] sm:$0x3 pattern:$0x76325410] %v1364_v31  ;;  %4476 = vmatprep.subr.bf16.mxu0 %v4475_v62  ;;  %v1823_v62 = vld [vmem:[%s7750_s3 + $0xc20] sm:$0xff]  ;;  %v1842_v53 = vld [vmem:[%s7750_s3 + $0xcb8] sm:$0xff] }
 0x2c2   :  { %v1753_v31 = vld [vmem:[%s7750_s3 + $0x9f0] sm:$0xff]  ;;  %v4583_v59 = vpack.c.bf16 %v1842_v53, %v1841_v52  ;;  %v1834_v53 = vld [vmem:[%s7750_s3 + $0xc78] sm:$0xff] }
 0x2c3   :  { %1363 = vst [vmem:[#allocation2 + $0x2a] sm:$0x3] %v1361_v57  ;;  %v1374_v18 = vcombine.high %v1371_v58, %v1371_v58  ;;  %2685 = vmatmul.mubr.f32.vlgmr.msra.gmra.mrb[22].mxu0 %v6913_v23  ;;  %v1746_v23 = vld [vmem:[%s7750_s3 + $0x9b8] sm:$0xff]  ;;  %v4581_v57 = vpack.c.bf16 %v1824_v50, %v1823_v62  ;;  %v4501_v58 = vpack.c.bf16 %v1736_v39, %v1735_v20  ;;  %v1809_v20 = vld [vmem:[%s7750_s3 + $0xbb0] sm:$0xff] }
 0x2c4   :  { %4478 = vmatpush3.bf16.msra.mxu0 %v4477_v43  ;;  %2824 = vmatprep.mubr.f32.mxu0 %v2046_v61  ;;  %v4487_v21 = vpack.c.bf16 %v1746_v23, %v1745_v19  ;;  %v1754_v43 = vld [vmem:[%s7750_s3 + $0x9f8] sm:$0xff]  ;;  %v4597_v62 = vpack.c.bf16 %v1832_v33, %v1831_v46  ;;  %v4549_v50 = vpack.c.bf16 %v1792_v14, %v1791_v44  ;;  %v1833_v52 = vld [vmem:[%s7750_s3 + $0xc70] sm:$0xff]  ;;  %v1852_v14 = vld [vmem:[%s7750_s3 + $0xd08] sm:$0xff] }
 0x2c5   :  { %1376 = vst [vmem:[#allocation2 + $0x2e] sm:$0x3] %v1374_v18  ;;  %4480 = vmatprep.subr.bf16.mxu0 %v4479_v5  ;;  %v1737_v5 = vld [vmem:[%s7750_s3 + $0x970] sm:$0xff]  ;;  %v1826_v61 = vld [vmem:[%s7750_s3 + $0xc38] sm:$0xff]  ;;  %v4503_v27 = vpack.c.bf16 %v1754_v43, %v1753_v31  ;;  %v1843_v18 = vld [vmem:[%s7750_s3 + $0xcc0] sm:$0xff] }
 0x2c6   :  { %v4585_v19 = vpack.c.bf16 %v1826_v61, %v1825_v60  ;;  %v4505_v23 = vpack.c.bf16 %v1738_v48, %v1737_v5  ;;  %v1794_v43 = vld [vmem:[%s7750_s3 + $0xb38] sm:$0xff]  ;;  %v1811_v5 = vld [vmem:[%s7750_s3 + $0xbc0] sm:$0xff]  ;;  %v4601_v60 = vpack.c.bf16 %v1834_v53, %v1833_v52  ;;  %v1872_v52 = vld [vmem:[%s7750_s3 + $0xda8] sm:$0xff] }
 0x2c8   :  { %4482 = vmatpush3.bf16.msra.mxu0 %v4481_v63  ;;  %v1844_v63 = vld [vmem:[%s7750_s3 + $0xcc8] sm:$0xff] }
 0x2c9   :  { %4484 = vmatprep.subr.bf16.mxu0 %v4483_v0  ;;  %v1803_v0 = vld [vmem:[%s7750_s3 + $0xb80] sm:$0xff] }
 0x2ca   :  { %v4539_v29 = vpack.c.bf16 %v1804_v7, %v1803_v0  ;;  %v1813_v0 = vld [vmem:[%s7750_s3 + $0xbd0] sm:$0xff]  ;;  %v1814_v7 = vld [vmem:[%s7750_s3 + $0xbd8] sm:$0xff] }
 0x2cc   :  { %4486 = vmatpush3.bf16.msra.mxu0 %v4485_v1  ;;  %v7125_v8 = vld [vmem:[#allocation2 + $0x28] sm:$0xff]  ;;  %v4587_v1 = vpack.c.bf16 %v1844_v63, %v1843_v18  ;;  %v1795_v18 = vld [vmem:[%s7750_s3 + $0xb40] sm:$0xff] }
 0x2cd   :  { %4488 = vmatprep.subr.bf16.mxu0 %v4487_v21  ;;  %v2054_v47 = vrot.slane %v7125_v8, %v5819_v17  ;;  %v2047_v13 = vcombine.high %v7125_v8, %v7125_v8  ;;  %v1827_v21 = vld [vmem:[%s7750_s3 + $0xc40] sm:$0xff]  ;;  %v1806_v8 = vld [vmem:[%s7750_s3 + $0xb98] sm:$0xff]  ;;  %v1796_v63 = vld [vmem:[%s7750_s3 + $0xb48] sm:$0xff] }
 0x2ce   :  { %v4543_v30 = vpack.c.bf16 %v1806_v8, %v1805_v9 }
 0x2cf   :  { %v2062_v10 = vcombine.high %v2054_v47, %v2054_v47 }
 0x2d0   :  { %4490 = vmatpush3.bf16.msra.mxu0 %v4489_v35  ;;  %v7240_v35 = vrot.slane %v2047_v13, %v5819_v17  ;;  %v4557_v13 = vpack.c.bf16 %v1796_v63, %v1795_v18  ;;  %v1858_v63 = vld [vmem:[%s7750_s3 + $0xd38] sm:$0xff] }
 0x2d1   :  { %4492 = vmatprep.subr.bf16.mxu0 %v4491_v40  ;;  %2894 = vmatprep.mubr.f32.mxu1 %v2062_v10  ;;  %v4589_v40 = vpack.c.bf16 %v1828_v41, %v1827_v21  ;;  %v4591_v10 = vpack.c.bf16 %v1846_v22, %v1845_v32  ;;  %v1798_v21 = vld [vmem:[%s7750_s3 + $0xb58] sm:$0xff]  ;;  %v1799_v22 = vld [vmem:[%s7750_s3 + $0xb60] sm:$0xff] }
 0x2d2   :  { %2895 = vmatmul.mubr.f32.vlgmr.msra.gmra.mrb[10].mxu1 %v2054_v47  ;;  %v4541_v47 = vpack.c.bf16 %v1788_v26, %v1787_v16  ;;  %v2063_v38 = vcombine.high %v7240_v35, %v7240_v35  ;;  %v1816_v16 = vld [vmem:[%s7750_s3 + $0xbe8] sm:$0xff] }
 0x2d3   :  { %4574 = vmatpush3.bf16.msra.mxu1 %v4573_v15  ;;  %v1847_v15 = vld [vmem:[%s7750_s3 + $0xce0] sm:$0xff] }
 0x2d4   :  { %4494 = vmatpush3.bf16.msra.mxu0 %v4493_v37  ;;  %4576 = vmatprep.subr.bf16.mxu1 %v4575_v2  ;;  %v1848_v37 = vld [vmem:[%s7750_s3 + $0xce8] sm:$0xff]  ;;  %v1807_v2 = vld [vmem:[%s7750_s3 + $0xba0] sm:$0xff] }
 0x2d5   :  { %4496 = vmatprep.subr.bf16.mxu0 %v4495_v4  ;;  %v4545_v4 = vpack.c.bf16 %v1790_v36, %v1789_v55  ;;  %v4595_v45 = vpack.c.bf16 %v1848_v37, %v1847_v15  ;;  %v1217_v55 = vld [vmem:[%s7748_s1 + $0x30] sm:$0xff]  ;;  %v4567_v15 = vpack.c.bf16 %v1818_v6, %v1817_v28  ;;  %v1904_v28 = vld [vmem:[%s7750_s3 + $0xea8] sm:$0xff] }
 0x2d6   :  { %v1801_v37 = vld [vmem:[%s7750_s3 + $0xb70] sm:$0xff] }
 0x2d7   :  { %4578 = vmatpush3.bf16.msra.mxu1 %v4577_v24  ;;  %v1849_v24 = vld [vmem:[%s7750_s3 + $0xcf0] sm:$0xff] }
 0x2d8   :  { %4498 = vmatpush3.bf16.msra.mxu0 %v4497_v34  ;;  %4580 = vmatprep.subr.bf16.mxu1 %v4579_v56  ;;  %v1850_v34 = vld [vmem:[%s7750_s3 + $0xcf8] sm:$0xff]  ;;  %v1877_v6 = vld [vmem:[%s7750_s3 + $0xdd0] sm:$0xff] }
 0x2d9   :  { %4500 = vmatprep.subr.bf16.mxu0 %v4499_v51  ;;  %v1810_v56 = vld [vmem:[%s7750_s3 + $0xbb8] sm:$0xff]  ;;  %v1793_v51 = vld [vmem:[%s7750_s3 + $0xb30] sm:$0xff]  ;;  %v4599_v39 = vpack.c.bf16 %v1850_v34, %v1849_v24 }
 0x2da   :  { %v4551_v31 = vpack.c.bf16 %v1810_v56, %v1809_v20  ;;  %v4553_v61 = vpack.c.bf16 %v1794_v43, %v1793_v51  ;;  %v1869_v24 = vld [vmem:[%s7750_s3 + $0xd90] sm:$0xff]  ;;  %v1870_v34 = vld [vmem:[%s7750_s3 + $0xd98] sm:$0xff]  ;;  %v1855_v43 = vld [vmem:[%s7750_s3 + $0xd20] sm:$0xff] }
 0x2db   :  { %4582 = vmatpush3.bf16.msra.mxu1 %v4581_v57  ;;  %v1899_v57 = vld [vmem:[%s7750_s3 + $0xe80] sm:$0xff]  ;;  %v1854_v51 = vld [vmem:[%s7750_s3 + $0xd18] sm:$0xff] }
 0x2dc   :  { %4502 = vmatpush3.bf16.msra.mxu0 %v4501_v58  ;;  %4584 = vmatprep.subr.bf16.mxu1 %v4583_v59  ;;  %v1900_v58 = vld [vmem:[%s7750_s3 + $0xe88] sm:$0xff] }
 0x2dd   :  { %4504 = vmatprep.subr.bf16.mxu0 %v4503_v27  ;;  %v1812_v59 = vld [vmem:[%s7750_s3 + $0xbc8] sm:$0xff]  ;;  %v4635_v27 = vpack.c.bf16 %v1900_v58, %v1899_v57  ;;  %v1873_v58 = vld [vmem:[%s7750_s3 + $0xdb0] sm:$0xff] }
 0x2de   :  { %v4555_v48 = vpack.c.bf16 %v1812_v59, %v1811_v5  ;;  %v1856_v57 = vld [vmem:[%s7750_s3 + $0xd28] sm:$0xff]  ;;  %v1857_v5 = vld [vmem:[%s7750_s3 + $0xd30] sm:$0xff] }
 0x2df   :  { %4586 = vmatpush3.bf16.msra.mxu1 %v4585_v19  ;;  %v4613_v59 = vpack.c.bf16 %v1856_v57, %v1855_v43  ;;  %v1865_v43 = vld [vmem:[%s7750_s3 + $0xd70] sm:$0xff] }
 0x2e0   :  { %4506 = vmatpush3.bf16.msra.mxu0 %v4505_v23  ;;  %4588 = vmatprep.subr.bf16.mxu1 %v4587_v1  ;;  %v4559_v23 = vpack.c.bf16 %v1814_v7, %v1813_v0  ;;  %v1797_v1 = vld [vmem:[%s7750_s3 + $0xb50] sm:$0xff] }
 0x2e1   :  { %4540 = vmatprep.subr.bf16.mxu0 %v4539_v29  ;;  %v1815_v29 = vld [vmem:[%s7750_s3 + $0xbe0] sm:$0xff]  ;;  %v4561_v9 = vpack.c.bf16 %v1798_v21, %v1797_v1  ;;  %v1901_v7 = vld [vmem:[%s7750_s3 + $0xe90] sm:$0xff] }
 0x2e2   :  { %v4563_v32 = vpack.c.bf16 %v1816_v16, %v1815_v29  ;;  %v4617_v29 = vpack.c.bf16 %v1858_v63, %v1857_v5  ;;  %v1859_v16 = vld [vmem:[%s7750_s3 + $0xd40] sm:$0xff] }
 0x2e3   :  { %2825 = vmatmul.mubr.f32.vlgmr.msra.gmra.mrb[24].mxu0 %v7073_v3  ;;  %4590 = vmatpush3.bf16.msra.mxu1 %v4589_v40  ;;  %v4547_v3 = vpack.c.bf16 %v1808_v12, %v1807_v2  ;;  %v1800_v40 = vld [vmem:[%s7750_s3 + $0xb68] sm:$0xff]  ;;  %v1867_v2 = vld [vmem:[%s7750_s3 + $0xd80] sm:$0xff] }
 0x2e4   :  { %4542 = vmatpush3.bf16.msra.mxu0 %v4541_v47  ;;  %2964 = vmatprep.mubr.f32.mxu0 %v2063_v38  ;;  %v4565_v36 = vpack.c.bf16 %v1800_v40, %v1799_v22  ;;  %v1802_v38 = vld [vmem:[%s7750_s3 + $0xb78] sm:$0xff]  ;;  %v1868_v12 = vld [vmem:[%s7750_s3 + $0xd88] sm:$0xff] }
 0x2e5   :  { %4544 = vmatprep.subr.bf16.mxu0 %v4543_v30  ;;  %4592 = vmatprep.subr.bf16.mxu1 %v4591_v10  ;;  %v4569_v44 = vpack.c.bf16 %v1802_v38, %v1801_v37  ;;  %v4603_v33 = vpack.c.bf16 %v1868_v12, %v1867_v2  ;;  %v1887_v38 = vld [vmem:[%s7750_s3 + $0xe20] sm:$0xff]  ;;  %v1888_v2 = vld [vmem:[%s7750_s3 + $0xe28] sm:$0xff] }
 0x2e7   :  { %4594 = vmatpush3.bf16.msra.mxu1 %v4593_v42 }
 0x2e8   :  { %4546 = vmatpush3.bf16.msra.mxu0 %v4545_v4  ;;  %4596 = vmatprep.subr.bf16.mxu1 %v4595_v45 }
 0x2e9   :  { %4548 = vmatprep.subr.bf16.mxu0 %v4547_v3  ;;  %v1851_v3 = vld [vmem:[%s7750_s3 + $0xd00] sm:$0xff] }
 0x2ea   :  { %v4605_v56 = vpack.c.bf16 %v1852_v14, %v1851_v3  ;;  %v1863_v14 = vld [vmem:[%s7750_s3 + $0xd60] sm:$0xff] }
 0x2eb   :  { %4598 = vmatpush3.bf16.msra.mxu1 %v4597_v62  ;;  %v4607_v62 = vpack.c.bf16 %v1870_v34, %v1869_v24  ;;  %v1889_v34 = vld [vmem:[%s7750_s3 + $0xe30] sm:$0xff] }
 0x2ec   :  { %4550 = vmatpush3.bf16.msra.mxu0 %v4549_v50  ;;  %4600 = vmatprep.subr.bf16.mxu1 %v4599_v39  ;;  %v1853_v50 = vld [vmem:[%s7750_s3 + $0xd10] sm:$0xff]  ;;  %v1871_v39 = vld [vmem:[%s7750_s3 + $0xda0] sm:$0xff] }
 0x2ed   :  { %4552 = vmatprep.subr.bf16.mxu0 %v4551_v31  ;;  %v4609_v53 = vpack.c.bf16 %v1854_v51, %v1853_v50  ;;  %v4611_v31 = vpack.c.bf16 %v1872_v52, %v1871_v39  ;;  %v1907_v50 = vld [vmem:[%s7750_s3 + $0xec0] sm:$0xff]  ;;  %v1908_v51 = vld [vmem:[%s7750_s3 + $0xec8] sm:$0xff]  ;;  %v1881_v39 = vld [vmem:[%s7750_s3 + $0xdf0] sm:$0xff] }
 0x2ee   :  { %v1882_v52 = vld [vmem:[%s7750_s3 + $0xdf8] sm:$0xff]  ;;  %v4651_v57 = vpack.c.bf16 %v1908_v51, %v1907_v50 }
 0x2ef   :  { %4602 = vmatpush3.bf16.msra.mxu1 %v4601_v60  ;;  %v4631_v5 = vpack.c.bf16 %v1882_v52, %v1881_v39  ;;  %v1923_v39 = vld [vmem:[%s7750_s3 + $0xf40] sm:$0xff]  ;;  %v1924_v52 = vld [vmem:[%s7750_s3 + $0xf48] sm:$0xff] }
 0x2f0   :  { %4554 = vmatpush3.bf16.msra.mxu0 %v4553_v61  ;;  %4636 = vmatprep.subr.bf16.mxu1 %v4635_v27  ;;  %v1883_v61 = vld [vmem:[%s7750_s3 + $0xe00] sm:$0xff]  ;;  %v1884_v27 = vld [vmem:[%s7750_s3 + $0xe08] sm:$0xff] }
 0x2f1   :  { %v3735_v19 = vpop.f32.mrb[4].mxu1  ;;  %4556 = vmatprep.subr.bf16.mxu0 %v4555_v48 }
 0x2f2   :  { %v3736_v41 = vpop.f32.mrb[5].mxu1 }
 0x2f3   :  { %v7350_v26 = vadd.f32 %v3736_v41, %v3735_v19  ;;  %v1875_v19 = vld [vmem:[%s7750_s3 + $0xdc0] sm:$0xff]  ;;  %v4637_v41 = vpack.c.bf16 %v1884_v27, %v1883_v61  ;;  %v1910_v61 = vld [vmem:[%s7750_s3 + $0xed8] sm:$0xff] }
 0x2f4   :  { %4558 = vmatpush3.bf16.msra.mxu0 %v4557_v13  ;;  %v1902_v13 = vld [vmem:[%s7750_s3 + $0xe98] sm:$0xff]  ;;  %v1931_v27 = vld [vmem:[%s7750_s3 + $0xf80] sm:$0xff] }
 0x2f5   :  { %v3557_v8 = vpop.f32.mrb[12].mxu0  ;;  %4560 = vmatprep.subr.bf16.mxu0 %v4559_v23  ;;  %v1876_v23 = vld [vmem:[%s7750_s3 + $0xdc8] sm:$0xff] }
 0x2f6   :  { %v3558_v47 = vpop.f32.mrb[13].mxu0  ;;  %v4619_v40 = vpack.c.bf16 %v1876_v23, %v1875_v19  ;;  %v1894_v19 = vld [vmem:[%s7750_s3 + $0xe58] sm:$0xff] }
 0x2f7   :  { %v3559_v30 = vadd.f32 %v3558_v47, %v3557_v8  ;;  %v1885_v8 = vld [vmem:[%s7750_s3 + $0xe10] sm:$0xff]  ;;  %v1860_v47 = vld [vmem:[%s7750_s3 + $0xd48] sm:$0xff] }
 0x2f8   :  { %4562 = vmatpush3.bf16.msra.mxu0 %v4561_v9  ;;  %v4639_v9 = vpack.c.bf16 %v1902_v13, %v1901_v7  ;;  %v1893_v13 = vld [vmem:[%s7750_s3 + $0xe50] sm:$0xff] }
 0x2f9   :  { %v1225_v10 = vmul.f32 %v3559_v30, %v1217_v55  ;;  %4564 = vmatprep.subr.bf16.mxu0 %v4563_v32  ;;  %v1886_v32 = vld [vmem:[%s7750_s3 + $0xe18] sm:$0xff]  ;;  %v1903_v55 = vld [vmem:[%s7750_s3 + $0xea0] sm:$0xff] }
 0x2fa   :  { %v1878_v30 = vld [vmem:[%s7750_s3 + $0xdd8] sm:$0xff]  ;;  %v4643_v37 = vpack.c.bf16 %v1904_v28, %v1903_v55  ;;  %v1896_v55 = vld [vmem:[%s7750_s3 + $0xe68] sm:$0xff] }
 0x2fb   :  { %1377 = vst [vmem:[#allocation2 + $0x30] sm:$0x3] %v1225_v10  ;;  %v1385_v42 = vrot.slane %v1225_v10, %v5819_v17  ;;  %v1389_v4 = vcombine.high %v1225_v10, %v1225_v10  ;;  %v4621_v10 = vpack.c.bf16 %v1860_v47, %v1859_v16  ;;  %v4623_v12 = vpack.c.bf16 %v1878_v30, %v1877_v6  ;;  %v1933_v16 = vld [vmem:[%s7750_s3 + $0xf90] sm:$0xff]  ;;  %v1895_v47 = vld [vmem:[%s7750_s3 + $0xe60] sm:$0xff]  ;;  %v1918_v6 = vld [vmem:[%s7750_s3 + $0xf18] sm:$0xff] }
 0x2fc   :  { %4566 = vmatpush3.bf16.msra.mxu0 %v4565_v36  ;;  %v4641_v36 = vpack.c.bf16 %v1886_v32, %v1885_v8  ;;  %v4657_v8 = vpack.c.bf16 %v1894_v19, %v1893_v13  ;;  %v1913_v30 = vld [vmem:[%s7750_s3 + $0xef0] sm:$0xff]  ;;  %v1927_v19 = vld [vmem:[%s7750_s3 + $0xf60] sm:$0xff] }
 0x2fd   :  { %v1386_v45 = vcombine.high %v1385_v42, %v1385_v42  ;;  %v1396_v46 = vrot.slane %v1389_v4, %v5819_v17  ;;  %3500 = vst.sshfl [vmem:[#allocation2 + $0x34] sm:$0x3 pattern:$0x76325410] %v1389_v4  ;;  %4568 = vmatprep.subr.bf16.mxu0 %v4567_v15  ;;  %v1861_v15 = vld [vmem:[%s7750_s3 + $0xd50] sm:$0xff]  ;;  %v1862_v42 = vld [vmem:[%s7750_s3 + $0xd58] sm:$0xff] }
 0x2fe   :  { %v1905_v4 = vld [vmem:[%s7750_s3 + $0xeb0] sm:$0xff]  ;;  %v4625_v3 = vpack.c.bf16 %v1862_v42, %v1861_v15  ;;  %v1936_v15 = vld [vmem:[%s7750_s3 + $0xfa8] sm:$0xff]  ;;  %v1898_v42 = vld [vmem:[%s7750_s3 + $0xe78] sm:$0xff] }
 0x2ff   :  { %1388 = vst [vmem:[#allocation2 + $0x32] sm:$0x3] %v1386_v45  ;;  %v1399_v20 = vcombine.high %v1396_v46, %v1396_v46  ;;  %v1879_v45 = vld [vmem:[%s7750_s3 + $0xde0] sm:$0xff]  ;;  %v1880_v46 = vld [vmem:[%s7750_s3 + $0xde8] sm:$0xff] }
 0x300   :  { %4570 = vmatpush3.bf16.msra.mxu0 %v4569_v44  ;;  %v1906_v44 = vld [vmem:[%s7750_s3 + $0xeb8] sm:$0xff] }
 0x301   :  { %1401 = vst [vmem:[#allocation2 + $0x36] sm:$0x3] %v1399_v20  ;;  %4604 = vmatprep.subr.bf16.mxu0 %v4603_v33  ;;  %v4645_v33 = vpack.c.bf16 %v1888_v2, %v1887_v38  ;;  %v4647_v24 = vpack.c.bf16 %v1906_v44, %v1905_v4  ;;  %v1890_v20 = vld [vmem:[%s7750_s3 + $0xe38] sm:$0xff]  ;;  %v1920_v44 = vld [vmem:[%s7750_s3 + $0xf28] sm:$0xff] }
 0x303   :  { %2965 = vmatmul.mubr.f32.vlgmr.msra.gmra.mrb[26].mxu0 %v7240_v35  ;;  %v1874_v35 = vld [vmem:[%s7750_s3 + $0xdb8] sm:$0xff] }
 0x304   :  { %4606 = vmatpush3.bf16.msra.mxu0 %v4605_v56  ;;  %v4615_v18 = vpack.c.bf16 %v1874_v35, %v1873_v58  ;;  %v4627_v56 = vpack.c.bf16 %v1880_v46, %v1879_v45  ;;  %v1891_v58 = vld [vmem:[%s7750_s3 + $0xe40] sm:$0xff]  ;;  %v1892_v35 = vld [vmem:[%s7750_s3 + $0xe48] sm:$0xff]  ;;  %v1937_v45 = vld [vmem:[%s7750_s3 + $0xfb0] sm:$0xff] }
 0x305   :  { %4608 = vmatprep.subr.bf16.mxu0 %v4607_v62  ;;  %v1864_v62 = vld [vmem:[%s7750_s3 + $0xd68] sm:$0xff]  ;;  %v1938_v46 = vld [vmem:[%s7750_s3 + $0xfb8] sm:$0xff] }
 0x308   :  { %4610 = vmatpush3.bf16.msra.mxu0 %v4609_v53  ;;  %v1433_v60 = vld [vmem:[#allocation2 + $0x30] sm:$0xff]  ;;  %v4649_v53 = vpack.c.bf16 %v1890_v20, %v1889_v34  ;;  %v1922_v34 = vld [vmem:[%s7750_s3 + $0xf38] sm:$0xff]  ;;  %v1939_v20 = vld [vmem:[%s7750_s3 + $0xfc0] sm:$0xff] }
 0x309   :  { %4612 = vmatprep.subr.bf16.mxu0 %v4611_v31  ;;  %v2071_v48 = vrot.slane %v1433_v60, %v5819_v17  ;;  %v2064_v0 = vcombine.high %v1433_v60, %v1433_v60  ;;  %v4629_v31 = vpack.c.bf16 %v1864_v62, %v1863_v14  ;;  %v1909_v60 = vld [vmem:[%s7750_s3 + $0xed0] sm:$0xff]  ;;  %v4679_v14 = vpack.c.bf16 %v1938_v46, %v1937_v45 }
 0x30a   :  { %v4655_v7 = vpack.c.bf16 %v1910_v61, %v1909_v60  ;;  %v1943_v61 = vld [vmem:[%s7750_s3 + $0xfe0] sm:$0xff] }
 0x30b   :  { %v2079_v1 = vcombine.high %v2071_v48, %v2071_v48  ;;  %v7444_v21 = vrot.slane %v2064_v0, %v5819_v17  ;;  %v1915_v0 = vld [vmem:[%s7750_s3 + $0xf00] sm:$0xff] }
 0x30c   :  { %4614 = vmatpush3.bf16.msra.mxu0 %v4613_v59  ;;  %v1866_v59 = vld [vmem:[%s7750_s3 + $0xd78] sm:$0xff] }
 0x30d   :  { %3034 = vmatprep.mubr.f32.mxu1 %v2079_v1  ;;  %4616 = vmatprep.subr.bf16.mxu0 %v4615_v18  ;;  %v2080_v22 = vcombine.high %v7444_v21, %v7444_v21  ;;  %v4653_v18 = vpack.c.bf16 %v1892_v35, %v1891_v58  ;;  %v4633_v63 = vpack.c.bf16 %v1866_v59, %v1865_v43  ;;  %v1916_v1 = vld [vmem:[%s7750_s3 + $0xf08] sm:$0xff]  ;;  %v1942_v43 = vld [vmem:[%s7750_s3 + $0xfd8] sm:$0xff] }
 0x30e   :  { %3035 = vmatmul.mubr.f32.vlgmr.msra.gmra.mrb[12].mxu1 %v2071_v48  ;;  %v1932_v48 = vld [vmem:[%s7750_s3 + $0xf88] sm:$0xff]  ;;  %v4669_v32 = vpack.c.bf16 %v1916_v1, %v1915_v0  ;;  %v4685_v58 = vpack.c.bf16 %v1924_v52, %v1923_v39  ;;  %v1926_v59 = vld [vmem:[%s7750_s3 + $0xf58] sm:$0xff] }
 0x30f   :  { %3104 = vmatprep.mubr.f32.mxu0 %v2080_v22  ;;  %4638 = vmatpush3.bf16.msra.mxu1 %v4637_v41  ;;  %v4667_v23 = vpack.c.bf16 %v1932_v48, %v1931_v27  ;;  %v1911_v41 = vld [vmem:[%s7750_s3 + $0xee0] sm:$0xff]  ;;  %v1917_v22 = vld [vmem:[%s7750_s3 + $0xf10] sm:$0xff]  ;;  %v1944_v27 = vld [vmem:[%s7750_s3 + $0xfe8] sm:$0xff] }
 0x310   :  { %4618 = vmatpush3.bf16.msra.mxu0 %v4617_v29  ;;  %4640 = vmatprep.subr.bf16.mxu1 %v4639_v9  ;;  %v1912_v29 = vld [vmem:[%s7750_s3 + $0xee8] sm:$0xff]  ;;  %v1934_v9 = vld [vmem:[%s7750_s3 + $0xf98] sm:$0xff]  ;;  %v4673_v38 = vpack.c.bf16 %v1918_v6, %v1917_v22  ;;  %v4691_v13 = vpack.c.bf16 %v1944_v27, %v1943_v61 }
 0x311   :  { %4620 = vmatprep.subr.bf16.mxu0 %v4619_v40  ;;  %v4659_v40 = vpack.c.bf16 %v1912_v29, %v1911_v41  ;;  %v4671_v28 = vpack.c.bf16 %v1934_v9, %v1933_v16  ;;  %v1945_v29 = vld [vmem:[%s7750_s3 + $0xff0] sm:$0xff]  ;;  %v1946_v16 = vld [vmem:[%s7750_s3 + $0xff8] sm:$0xff] }
 0x312   :  { %v1930_v6 = vld [vmem:[%s7750_s3 + $0xf78] sm:$0xff] }
 0x313   :  { %4642 = vmatpush3.bf16.msra.mxu1 %v4641_v36  ;;  %v1914_v36 = vld [vmem:[%s7750_s3 + $0xef8] sm:$0xff] }
 0x314   :  { %4622 = vmatpush3.bf16.msra.mxu0 %v4621_v10  ;;  %4644 = vmatprep.subr.bf16.mxu1 %v4643_v37  ;;  %v1935_v10 = vld [vmem:[%s7750_s3 + $0xfa0] sm:$0xff]  ;;  %v4661_v37 = vpack.c.bf16 %v1896_v55, %v1895_v47  ;;  %v4663_v2 = vpack.c.bf16 %v1914_v36, %v1913_v30  ;;  %v4695_v55 = vpack.c.bf16 %v1946_v16, %v1945_v29 }
 0x315   :  { %4624 = vmatprep.subr.bf16.mxu0 %v4623_v12  ;;  %v1897_v12 = vld [vmem:[%s7750_s3 + $0xe70] sm:$0xff]  ;;  %v4675_v4 = vpack.c.bf16 %v1936_v15, %v1935_v10 }
 0x317   :  { %4646 = vmatpush3.bf16.msra.mxu1 %v4645_v33  ;;  %v4665_v33 = vpack.c.bf16 %v1898_v42, %v1897_v12 }
 0x318   :  { %4626 = vmatpush3.bf16.msra.mxu0 %v4625_v3  ;;  %4648 = vmatprep.subr.bf16.mxu1 %v4647_v24  ;;  %v1921_v24 = vld [vmem:[%s7750_s3 + $0xf30] sm:$0xff] }
 0x319   :  { %4628 = vmatprep.subr.bf16.mxu0 %v4627_v56  ;;  %v1940_v56 = vld [vmem:[%s7750_s3 + $0xfc8] sm:$0xff]  ;;  %v4681_v62 = vpack.c.bf16 %v1922_v34, %v1921_v24 }
 0x31a   :  { %v4683_v51 = vpack.c.bf16 %v1940_v56, %v1939_v20 }
 0x31b   :  { %4650 = vmatpush3.bf16.msra.mxu1 %v4649_v53 }
 0x31c   :  { %4630 = vmatpush3.bf16.msra.mxu0 %v4629_v31  ;;  %4652 = vmatprep.subr.bf16.mxu1 %v4651_v57  ;;  %v1941_v31 = vld [vmem:[%s7750_s3 + $0xfd0] sm:$0xff] }
 0x31d   :  { %4632 = vmatprep.subr.bf16.mxu0 %v4631_v5  ;;  %v4687_v35 = vpack.c.bf16 %v1942_v43, %v1941_v31  ;;  %v1925_v5 = vld [vmem:[%s7750_s3 + $0xf50] sm:$0xff] }
 0x31f   :  { %4654 = vmatpush3.bf16.msra.mxu1 %v4653_v18  ;;  %v1218_v18 = vld [vmem:[%s7748_s1 + $0x38] sm:$0xff] }
 0x320   :  { %4634 = vmatpush3.bf16.msra.mxu0 %v4633_v63  ;;  %4656 = vmatprep.subr.bf16.mxu1 %v4655_v7  ;;  %v3502_v63 = vld [vmem:[%s7751_s4] ss:$0 sm:$0xff]  ;;  %v4689_v7 = vpack.c.bf16 %v1926_v59, %v1925_v5  ;;  %v4943_v5 = vmov 0.0|0.0  }
 0x321   :  { %4668 = vmatprep.subr.bf16.mxu0 %v4667_v23  ;;  %v1928_v23 = vld [vmem:[%s7750_s3 + $0xf68] sm:$0xff]  ;;  %v2197_v9 = vadd.f32 %v6780_v25, %v3502_v63 }
 0x322   :  { %v4693_v47 = vpack.c.bf16 %v1928_v23, %v1927_v19 }
 0x323   :  { %3105 = vmatmul.mubr.f32.vlgmr.msra.gmra.mrb[28].mxu0 %v7444_v21  ;;  %4658 = vmatpush3.bf16.msra.mxu1 %v4657_v8  ;;  %v1919_v21 = vld [vmem:[%s7750_s3 + $0xf20] sm:$0xff] }
 0x324   :  { %4670 = vmatpush3.bf16.msra.mxu0 %v4669_v32  ;;  %4660 = vmatprep.subr.bf16.mxu1 %v4659_v40  ;;  %v4677_v3 = vpack.c.bf16 %v1920_v44, %v1919_v21 }
 0x325   :  { %4672 = vmatprep.subr.bf16.mxu0 %v4671_v28  ;;  %v1929_v28 = vld [vmem:[%s7750_s3 + $0xf70] sm:$0xff] }
 0x326   :  { %v4697_v15 = vpack.c.bf16 %v1930_v6, %v1929_v28 }
 0x327   :  { %4662 = vmatpush3.bf16.msra.mxu1 %v4661_v37 }
 0x328   :  { %4674 = vmatpush3.bf16.msra.mxu0 %v4673_v38  ;;  %4664 = vmatprep.subr.bf16.mxu1 %v4663_v2 }
 0x329   :  { %4676 = vmatprep.subr.bf16.mxu0 %v4675_v4 }
 0x32b   :  { %4666 = vmatpush3.bf16.msra.mxu1 %v4665_v33 }
 0x32c   :  { %4678 = vmatpush3.bf16.msra.mxu0 %v4677_v3  ;;  %4699 = vmatprep.subr.bf16.mxu1 %v4943_v5 }
 0x32d   :  { %v3805_v50 = vpop.f32.mrb[6].mxu1  ;;  %4680 = vmatprep.subr.bf16.mxu0 %v4679_v14 }
 0x32e   :  { %v3806_v53 = vpop.f32.mrb[7].mxu1 }
 0x32f   :  { %v7635_v57 = vadd.f32 %v3806_v53, %v3805_v50 }
 0x330   :  { %4682 = vmatpush3.bf16.msra.mxu0 %v4681_v62 }
 0x331   :  { %4684 = vmatprep.subr.bf16.mxu0 %v4683_v51 }
 0x332   :  { %v3560_v60 = vpop.f32.mrb[14].mxu0 }
 0x333   :  { %v3561_v48 = vpop.f32.mrb[15].mxu0 }
 0x334   :  { %v3562_v0 = vadd.f32 %v3561_v48, %v3560_v60  ;;  %4686 = vmatpush3.bf16.msra.mxu0 %v4685_v58  ;;  %v3252_v58 = vld [vmem:[%s7752_s5 + $0x8] sm:$0xff]  ;;  %v3254_v60 = vld [vmem:[%s7752_s5 + $0x18] sm:$0xff] }
 0x335   :  { %4688 = vmatprep.subr.bf16.mxu0 %v4687_v35  ;;  %v3253_v35 = vld [vmem:[%s7752_s5 + $0x10] sm:$0xff] }
 0x336   :  { %v1226_v1 = vmul.f32 %v3562_v0, %v1218_v18  ;;  %v3630_v41 = vpop.f32.mrb[16].mxu0  ;;  %v4703_v61 = vpack.c.bf16 %v3254_v60, %v3253_v35 }
 0x337   :  { %v3631_v8 = vpop.f32.mrb[17].mxu0 }
 0x338   :  { %1402 = vst [vmem:[#allocation2 + $0x38] sm:$0x3] %v1226_v1  ;;  %v1410_v32 = vrot.slane %v1226_v1, %v5819_v17  ;;  %v1414_v22 = vcombine.high %v1226_v1, %v1226_v1  ;;  %v3632_v40 = vadd.f32 %v3631_v8, %v3630_v41  ;;  %4690 = vmatpush3.bf16.msra.mxu0 %v4689_v7 }
 0x339   :  { %4692 = vmatprep.subr.bf16.mxu0 %v4691_v13 }
 0x33a   :  { %v1411_v30 = vcombine.high %v1410_v32, %v1410_v32  ;;  %v1421_v25 = vrot.slane %v1414_v22, %v5819_v17  ;;  %3501 = vst.sshfl [vmem:[#allocation2 + $0x3c] sm:$0x3 pattern:$0x76325410] %v1414_v22  ;;  %v2267_v36 = vadd.f32 %v3632_v40, %v2197_v9 }
 0x33c   :  { %1413 = vst [vmem:[#allocation2 + $0x3a] sm:$0x3] %v1411_v30  ;;  %v1424_v10 = vcombine.high %v1421_v25, %v1421_v25  ;;  %4694 = vmatpush3.bf16.msra.mxu0 %v4693_v47  ;;  %v2337_v37 = vadd.f32 %v7047_v49, %v2267_v36 }
 0x33d   :  { %4696 = vmatprep.subr.bf16.mxu0 %v4695_v55 }
 0x33e   :  { %1426 = vst [vmem:[#allocation2 + $0x3e] sm:$0x3] %v1424_v10 }
 0x340   :  { %4698 = vmatpush3.bf16.msra.mxu0 %v4697_v15  ;;  %v3337_v15 = vld [vmem:[%s7754_s7] sm:$0xff] }
 0x345   :  { %v1434_v38 = vld [vmem:[#allocation2 + $0x38] sm:$0xff] }
 0x346   :  { %v2088_v2 = vrot.slane %v1434_v38, %v5819_v17  ;;  %v2081_v12 = vcombine.high %v1434_v38, %v1434_v38  ;;  %v3339_v38 = vld [vmem:[%s7754_s7 + $0x10] sm:$0xff] }
 0x348   :  { %v2096_v42 = vcombine.high %v2088_v2, %v2088_v2  ;;  %v2095_v4 = vrot.slane %v2081_v12, %v5819_v17  ;;  %v3340_v12 = vld [vmem:[%s7754_s7 + $0x18] sm:$0xff] }
 0x34a   :  { %3174 = vmatprep.mubr.f32.mxu1 %v2096_v42  ;;  %v2097_v21 = vcombine.high %v2095_v4, %v2095_v4  ;;  %v4709_v42 = vpack.c.bf16 %v3340_v12, %v3339_v38 }
 0x34b   :  { %3175 = vmatmul.mubr.f32.vlgmr.msra.gmra.mrb[14].mxu1 %v2088_v2 }
 0x34c   :  { %3244 = vmatprep.mubr.f32.mxu0 %v2097_v21  ;;  %4141 = vmatprep.mubr.msk.f32.mxu1 %vm4944_vm1, %v4941_v54 }
 0x34d   :  { %3245 = vmatmul.mubr.f32.vlgmr.msra.gmra.mrb[30].mxu0 %v2095_v4 }
 0x356   :  { %v3700_v44 = vpop.f32.mrb[18].mxu0 }
 0x357   :  { %v3701_v45 = vpop.f32.mrb[19].mxu0 }
 0x358   :  { %v3702_v46 = vadd.f32 %v3701_v45, %v3700_v44 }
 0x35a   :  { %v2407_v33 = vadd.f32 %v3702_v46, %v2337_v37  ;;  %v3338_v37 = vld [vmem:[%s7754_s7 + $0x8] sm:$0xff]  ;;  %v3423_v46 = vld [vmem:[%s7756_s9] sm:$0x1] }
 0x35b   :  { %v4706_v2 = vpack.c.bf16 %v3338_v37, %v3337_v15  ;;  %vm3425_vm3 = vcmp.ne.f32.partialorder %v3423_v46, %v3423_v46 }
 0x35c   :  { %v2477_v49 = vadd.f32 %v7350_v26, %v2407_v33  ;;  %v3251_v26 = vld [vmem:[%s7752_s5] sm:$0xff]  ;;  %v3427_v33 = vand.u32 2147483647, %v3423_v46 }
 0x35d   :  { %v4700_v59 = vpack.c.bf16 %v3252_v58, %v3251_v26 }
 0x35f   :  { %4701 = vmatpush3.bf16.msra.mxu1 %v4700_v59 }
 0x360   :  { %4702 = vmatprep.subr.bf16.mxu1 %v4943_v5 }
 0x363   :  { %4704 = vmatpush3.bf16.msra.mxu1 %v4703_v61 }
 0x364   :  { %4705 = vmatprep.subr.bf16.mxu1 %v4943_v5 }
 0x369   :  { %v3875_v3 = vpop.f32.mrb[8].mxu1 }
 0x36a   :  { %v3876_v14 = vpop.f32.mrb[9].mxu1 }
 0x36b   :  { %v3877_v24 = vadd.f32 %v3876_v14, %v3875_v3 }
 0x376   :  { %v3770_v34 = vpop.f32.mrb[20].mxu0 }
 0x377   :  { %v3771_v20 = vpop.f32.mrb[21].mxu0 }
 0x378   :  { %v3772_v56 = vadd.f32 %v3771_v20, %v3770_v34 }
 0x37a   :  { %v2547_v62 = vadd.f32 %v3772_v56, %v2477_v49  ;;  %v3428_v49 = vsub.f32 0.0, %v3427_v33 }
 0x37c   :  { %v2617_v17 = vadd.f32 %v7635_v57, %v2547_v62  ;;  %v3429_v3 = vmul.f32 1.442695, %v3428_v49 }
 0x396   :  { %v3840_v50 = vpop.f32.mrb[22].mxu0 }
 0x397   :  { %v3841_v51 = vpop.f32.mrb[23].mxu0 }
 0x398   :  { %v3842_v39 = vadd.f32 %v3841_v51, %v3840_v50  ;;  %v3424_v51 = vmax.f32 %v3423_v46, 0.0 }
 0x39a   :  { %v2687_v52 = vadd.f32 %v3842_v39, %v2617_v17 }
 0x39c   :  { %v2757_v53 = vadd.f32 %v3877_v24, %v2687_v52 }
 0x3a5   :  { %v3945_v31 = vpop.f32.mrb[10].mxu1 }
 0x3a6   :  { %v3946_v43 = vpop.f32.mrb[11].mxu1 }
 0x3a7   :  { %v3947_v57 = vadd.f32 %v3946_v43, %v3945_v31 }
 0x3b6   :  { %v3910_v27 = vpop.f32.mrb[24].mxu0 }
 0x3b7   :  { %v3911_v48 = vpop.f32.mrb[25].mxu0 }
 0x3b8   :  { %v3912_v18 = vadd.f32 %v3911_v48, %v3910_v27 }
 0x3ba   :  { %v2827_v63 = vadd.f32 %v3912_v18, %v2757_v53  ;;  %v3446_v53 = vsub.s32 0, %v5809_v11 }
 0x3bc   :  { %v2897_v0 = vadd.f32 %v3947_v57, %v2827_v63 }
 0x3d6   :  { %v3980_v7 = vpop.f32.mrb[26].mxu0 }
 0x3d7   :  { %v3981_v13 = vpop.f32.mrb[27].mxu0 }
 0x3d8   :  { %v3982_v19 = vadd.f32 %v3981_v13, %v3980_v7 }
 0x3da   :  { %v2967_v23 = vadd.f32 %v3982_v19, %v2897_v0 }
 0x3e1   :  { %v4015_v1 = vpop.f32.mrb[12].mxu1 }
 0x3e2   :  { %v4016_v41 = vpop.f32.mrb[13].mxu1 }
 0x3e3   :  { %v4017_v29 = vadd.f32 %v4016_v41, %v4015_v1 }
 0x3e5   :  { %v3037_v16 = vadd.f32 %v4017_v29, %v2967_v23 }
 0x3f6   :  { %v4050_v9 = vpop.f32.mrb[28].mxu0 }
 0x3f7   :  { %v4051_v8 = vpop.f32.mrb[29].mxu0 }
 0x3f8   :  { %v4052_v32 = vadd.f32 %v4051_v8, %v4050_v9 }
 0x3fa   :  { %v3107_v22 = vadd.f32 %v4052_v32, %v3037_v16 }
 0x41e   :  { %v4085_v40 = vpop.f32.mrb[14].mxu1 }
 0x41f   :  { %v4086_v47 = vpop.f32.mrb[15].mxu1 }
 0x420   :  { %v4087_v55 = vadd.f32 %v4086_v47, %v4085_v40  ;;  %v4120_v28 = vpop.f32.mrb[30].mxu0 }
 0x421   :  { %v4121_v6 = vpop.f32.mrb[31].mxu0 }
 0x422   :  { %v3177_v30 = vadd.f32 %v4087_v55, %v3107_v22  ;;  %v4122_v25 = vadd.f32 %v4121_v6, %v4120_v28 }
 0x424   :  { %v3247_v36 = vadd.f32 %v4122_v25, %v3177_v30 }
 0x426   :  { %4863 = vtanh.f32 %v3247_v36 }
 0x430   :  { %v4864_v10 = vpop.eup %4863 }
 0x431   :  { %4142 = vmatmul.mubr.msk.f32.vlgmr.msra.gmra.mrb[16].mxu1 %vm3262_vm15, %v4864_v10 }
 0x432   :  { %4152 = vmatprep.mubr.msk.f32.mxu1 %vm4944_vm1, %v4941_v54  ;;  %4707 = vmatpush3.bf16.msra.mxu1 %v4706_v2  ;;  %v3503_v54 = vld [vmem:[%s7753_s6] ss:$0 sm:$0xff]  ;;  %s4945_s6 = smov [#allocation5]  }
 0x433   :  { %4708 = vmatprep.subr.bf16.mxu1 %v4943_v5  ;;  %s3466_s7 = sshll.u32 %s4945_s6, 4  ;;  %s3467_s7 = int_to_ptr.vmem [resolvable:$true] %s3466_s7 }
 0x434   :  { %s4875_s9 = scalar_lea.vmem %s3467_s7, 32  ;;  %p4880_p1 = scmp.lt.s32.totalorder %s3467_s7, %s3467_s7 }
 0x435   :  { %p4876_p0 = scmp.ne.s32.totalorder %s3467_s7, %s4875_s9  ;;  %p4881_p2 = scmp.lt.s32.totalorder %s4875_s9, %s4875_s9 }
 0x436   :  { %4710 = vmatpush3.bf16.msra.mxu1 %v4709_v42 }
 0x437   :  { %p4882_p3 = por %p4881_p2, %p4880_p1 }
 0x439   :  { %p4883_p4 = pnand %p4882_p3, %p4876_p0 }
 0x504   :  { %v3332_v4 = vpop.f32.mrb[16].mxu1 }
 0x505   :  { %v3333_v21 = vadd.f32 %v3503_v54, %v3332_v4  ;;  %v4143_v44 = vpop.f32.mrb[17].mxu1 }
 0x507   :  { %4865 = vtanh.f32 %v3333_v21 }
 0x508   :  { %4867 = vpow2.f32 %v3429_v3 }
 0x511   :  { %v4866_v45 = vpop.eup %4865 }
 0x512   :  { %4153 = vmatmul.mubr.msk.f32.vlgmr.msra.gmra.mrb[18].mxu1 %vm3262_vm15, %v4866_v45  ;;  %v4868_v14 = vpop.eup %4867 }
 0x513   :  { %v3431_v24 = vadd.f32 1.0, %v4868_v14  ;;  %v3434_v34 = vmul.f32 -0.5, %v4868_v14  ;;  %v3437_v62 = vand.u32 2147483647, %v4868_v14 }
 0x515   :  { %4869 = vlog2.f32 %v3431_v24  ;;  %v3435_v20 = vadd.f32 1.0, %v3434_v34  ;;  %vm3438_vm2 = vcmp.lt.f32.partialorder %v3437_v62, 0.0004427343 }
 0x517   :  { %v3436_v50 = vmul.f32 %v4868_v14, %v3435_v20 }
 0x51f   :  { %v4870_v56 = vpop.eup %4869 }
 0x520   :  { %v3433_v17 = vmul.f32 0.6931472, %v4870_v56 }
 0x522   :  { %v3439_v39 = vsel %vm3438_vm2, %v3436_v50, %v3433_v17 }
 0x523   :  { %v3440_v52 = vadd.f32 %v3439_v39, %v3424_v51 }
 0x525   :  { %v3441_v31 = vsel %vm3425_vm3, %v3423_v46, %v3440_v52 }
 0x526   :  { %v3442_v43 = vadd.f32 0.01, %v3441_v31 }
 0x528   :  { %v3447_v26 = vrot.slane %v3442_v43, %v3446_v53 }
 0x52a   :  { %3449 = vst.msk [vmem:[#allocation5] sm:$0x3] %vm3421_vm4, %v3447_v26 }
 0x52b   :  { %4886 = shalt.err (!%p4883_p4)
}
 0x52c   :  { %s4887_s14 = scalar_lea.hbm %s7758_s11, 32 }
 0x52d   :  { %p4888_p5 = scmp.ne.s32.totalorder %s7758_s11, %s4887_s14  ;;  %p4891_p6 = scmp.lt.u32.totalorder %s4887_s14, %s7758_s11 }
 0x52f   :  { %p4893_p7 = pnand %p4891_p6, %p4888_p5 }
 0x531   :  { %4896 = shalt.err (!%p4893_p7)
}
 0x532   :  { %3469 = dma.vmem_to_hbm [thread:$0]  %s3467_s7, 32, %s7758_s11, [#allocation6]   ;;  %v3505_v11 = vld [vmem:[%s7755_s8] ss:$0 sm:$0xff] }
 0x533   :  { %s4946_s22 = smov [#allocation3]  }
 0x534   :  { %s3456_s23 = sshll.u32 %s4946_s22, 4  ;;  %s3457_s23 = int_to_ptr.vmem [resolvable:$true] %s3456_s23 }
 0x535   :  { %s4897_s5 = scalar_lea.vmem %s3457_s23, 32  ;;  %p4902_p9 = scmp.lt.s32.totalorder %s3457_s23, %s3457_s23 }
 0x536   :  { %p4898_p8 = scmp.ne.s32.totalorder %s3457_s23, %s4897_s5  ;;  %p4903_p10 = scmp.lt.s32.totalorder %s4897_s5, %s4897_s5 }
 0x538   :  { %p4904_p11 = por %p4903_p10, %p4902_p9 }
 0x53a   :  { %p4905_p12 = pnand %p4904_p11, %p4898_p8 }
 0x5e5   :  { %v3417_v58 = vpop.f32.mrb[18].mxu1 }
 0x5e6   :  { %v3418_v35 = vadd.f32 %v3505_v11, %v3417_v58  ;;  %v4154_v57 = vpop.f32.mrb[19].mxu1 }
 0x5e8   :  { %3422 = vst.msk [vmem:[#allocation3] sm:$0x3] %vm3421_vm4, %v3418_v35 }
 0x5e9   :  { %4908 = shalt.err (!%p4905_p12)
}
 0x5ea   :  { %s4909_s25 = scalar_lea.hbm %s7757_s10, 32 }
 0x5eb   :  { %p4910_p13 = scmp.ne.s32.totalorder %s7757_s10, %s4909_s25  ;;  %p4913_p0 = scmp.lt.u32.totalorder %s4909_s25, %s7757_s10 }
 0x5ed   :  { %p4915_p1 = pnand %p4913_p0, %p4910_p13 }
 0x5ef   :  { %4918 = shalt.err (!%p4915_p1)
}
 0x5f0   :  { %3459 = dma.vmem_to_hbm [thread:$0]  %s3457_s23, 32, %s7757_s10, [#allocation4]  }
 0x5f1   :  { %4919 = dma.done.wait [#allocation4], 32  }
 0x5f2   :  { %4920 = vsyncadd [#allocation4], 4294967264 }
 0x5f3   :  { %4921 = dma.done.wait [#allocation6], 32  }
 0x5f4   :  { %4922 = vsyncadd [#allocation6], 4294967264 }
 0x5f5   :  { %3476 = vsyncpa [#allocation4], 1 }
 0x5f6   :  { %3477 = vsyncpa [#allocation6], 1 }

</bundles_post_ra>
